<compile_context>
chip_gen: v5e
topology: v5e:2x2
jax: 0.10.0
libtpu: 0.0.40
codegen_flags: <defaults>
</compile_context>

<pallas_src>
import numpy as np
import jax
import jax.numpy as jnp
from jax import lax
from jax.experimental import pallas as pl
from jax.experimental.pallas import tpu as pltpu


def encoder_pool_kernel(x_q_ref, x_kv_ref, mask_bias_ref, arg1_ref,
                        wq_ref, bq_ref, wk_ref, bk_ref, wv_ref, bv_ref,
                        wo_ref, bo_ref, w1_ref, b1_ref, w2_ref, b2_ref,
                        o_ref,
                        q_scratch, m_scratch, l_scratch, acc_scratch,
                        k_cache, v_cache):
    f32 = jnp.float32
    bf16 = jnp.bfloat16

    b = pl.program_id(0)
    qi = pl.program_id(1)
    ki = pl.program_id(2)
    n_kv = pl.num_programs(2)

    x_q = x_q_ref[0]                                # (tq, H) bf16
    hdim = x_q.shape[-1]
    scale = f32(1.0 / np.sqrt(hdim))

    # qi == 0: project K/V for this KV tile once per batch row and cache it in
    # VMEM; every later query tile of the same row reuses the cached bf16 K/V.
    @pl.when(qi == 0)
    def _():
        x_kv = x_kv_ref[0]                          # (tk, H) bf16
        k = jnp.dot(x_kv, wk_ref[...], preferred_element_type=f32) + bk_ref[...]
        v = jnp.dot(x_kv, wv_ref[...], preferred_element_type=f32) + bv_ref[...]
        k_cache[ki] = k.astype(bf16)
        v_cache[ki] = v.astype(bf16)

    # ki == 0: project Q for this query tile (1/sqrt(H) scale folded in) and
    # reset the online-softmax running state.
    @pl.when(ki == 0)
    def _():
        q = jnp.dot(x_q, wq_ref[...], preferred_element_type=f32) + bq_ref[...]
        q_scratch[...] = (q * scale).astype(bf16)
        m_scratch[...] = jnp.full_like(m_scratch, -jnp.inf)
        l_scratch[...] = jnp.zeros_like(l_scratch)
        acc_scratch[...] = jnp.zeros_like(acc_scratch)

    k = k_cache[ki]                                 # (tk, H) bf16
    v = v_cache[ki]                                 # (tk, H) bf16

    # Scores: contract Q and K on the H axis directly (no k.T / XLU round
    # trip); single add of the precomputed (1, tk) mask bias.
    s = lax.dot_general(q_scratch[...], k, (((1,), (1,)), ((), ())),
                        preferred_element_type=f32)              # (tq, tk)
    s = s + mask_bias_ref[b * n_kv + ki]

    # NOTE: a KV tile that is entirely padded transiently pollutes l/acc; a
    # later unmasked tile drives alpha→0, so the result stays correct unless a
    # query row's entire key set is masked (same caveat as the reference).
    m_prev = m_scratch[...]                                       # (tq, 1)
    m_new = jnp.maximum(m_prev, jnp.max(s, axis=-1, keepdims=True))
    alpha = jnp.exp(m_prev - m_new)
    p = jnp.exp(s - m_new)                                        # f32
    l_scratch[...] = alpha * l_scratch[...] + jnp.sum(p, axis=-1, keepdims=True)
    acc_scratch[...] = alpha * acc_scratch[...] + jnp.dot(
        p.astype(bf16), v, preferred_element_type=f32)
    m_scratch[...] = m_new

    # Last KV tile: finalize attention, out-proj + FFN + residuals, then the
    # arg1-weighted pooling partial for this (batch, query-tile).
    @pl.when(ki == n_kv - 1)
    def _():
        attn = acc_scratch[...] * pl.reciprocal(l_scratch[...], approx=True)
        attn = jnp.dot(attn.astype(bf16), wo_ref[...],
                       preferred_element_type=f32) + bo_ref[...]
        h = x_q.astype(f32) + attn

        ffn = jnp.dot(h.astype(bf16), w1_ref[...], preferred_element_type=f32) + b1_ref[...]
        ffn = jnp.maximum(ffn, 0.0)
        ffn = jnp.dot(ffn.astype(bf16), w2_ref[...], preferred_element_type=f32) + b2_ref[...]
        out = h + ffn                                             # (tq, H) "encoder output"

        # arg1_vec partial for this q tile: sum_t arg1[t] * out[t, :]
        o_ref[0, 0] = jnp.sum(out * arg1_ref[0], axis=0, keepdims=True)   # (1, H)


def _tile_defaults():
    # tk=256 fills the 256-wide MXU of v6e/v7x; v5e's MXU is 4x128^2, so
    # 128-wide tiles already map natively and keep vreg/store pressure low.
    try:
        kind = jax.devices()[0].device_kind.lower()
    except Exception:
        kind = ""
    if ("v5 lite" in kind) or ("v5e" in kind) or ("v5litepod" in kind):
        return 128, 128
    return 128, 256


def _vmem_limit_bytes():
    # ~75% of physical VMEM, capped at 96 MiB (v7x has only 64 MiB physical;
    # v5e/v6e have 128 MiB). Conservative fallback if the query fails.
    try:
        cap = pltpu.get_tpu_info().vmem_capacity_bytes
    except Exception:
        cap = 64 * 1024 * 1024
    return int(min(cap * 3 // 4, 96 * 1024 * 1024))


def full_cross_encoder_single(input_ids, attention_mask, arg1, params, *, tq=None, tk=None):
    """arg1_vec = (encoder(input_ids, attention_mask) * arg1[..., None]).sum(1)."""
    d_tq, d_tk = _tile_defaults()
    tq = d_tq if tq is None else tq
    tk = d_tk if tk is None else tk

    # Glue: embedding gather stays in plain JAX (bf16 table).
    x = params["emb"][input_ids]                    # (B, S, H) bf16
    B, S, H = x.shape
    tq = min(tq, S)
    tk = min(tk, S)
    assert S % tq == 0 and S % tk == 0, "sequence length must divide the tile sizes"
    nq, nk = S // tq, S // tk

    # Additive mask bias, precomputed once and kept fully resident in VMEM;
    # shape (B*nk, 1, tk) so the kernel does a single dynamic-leading-index load.
    mask_bias = ((attention_mask.astype(jnp.float32) - 1.0) * 1e9).reshape(B * nk, 1, tk)
    arg13 = arg1.astype(jnp.float32).reshape(B, S, 1)

    weight_names = ("wq", "bq", "wk", "bk", "wv", "bv",
                    "wo", "bo", "w1", "b1", "w2", "b2")
    weights = [params[n] for n in weight_names]
    # Whole array resident in VMEM, no double-buffering.
    resident = pl.BlockSpec(memory_space=pltpu.MemorySpace.VMEM)

    grid = (B, nq, nk)
    in_specs = [
        # Query-side activations: re-DMA'd only when qi changes.
        pl.BlockSpec((1, tq, H), lambda b, qi, ki: (b, qi, 0)),
        # Key/value-side activations: only needed while filling the K/V cache
        # (qi == 0); for qi > 0 the index map pins the block so no re-DMA.
        pl.BlockSpec((1, tk, H), lambda b, qi, ki: (b, jnp.where(qi == 0, ki, 0), 0)),
        resident,                                                   # mask bias (resident)
        pl.BlockSpec((1, tq, 1), lambda b, qi, ki: (b, qi, 0)),     # arg1 (per q tile)
    ] + [resident] * len(weights)

    out = pl.pallas_call(
        encoder_pool_kernel,
        out_shape=jax.ShapeDtypeStruct((B, nq, 1, H), jnp.float32),
        grid=grid,
        in_specs=in_specs,
        out_specs=pl.BlockSpec((1, 1, 1, H), lambda b, qi, ki: (b, qi, 0, 0)),
        scratch_shapes=[
            pltpu.VMEM((tq, H), jnp.bfloat16),      # cached Q projection (scaled)
            pltpu.VMEM((tq, 1), jnp.float32),       # running max  m
            pltpu.VMEM((tq, 1), jnp.float32),       # running sum  l
            pltpu.VMEM((tq, H), jnp.float32),       # running attention accumulator
            pltpu.VMEM((nk, tk, H), jnp.bfloat16),  # projected K cache (per batch row)
            pltpu.VMEM((nk, tk, H), jnp.bfloat16),  # projected V cache (per batch row)
        ],
        compiler_params=pltpu.CompilerParams(
            # qi must stay "arbitrary": the K/V cache is filled at qi == 0 and
            # reused by later query tiles of the same batch row, so qi of one
            # batch may not be split across cores. Batch is safely parallel.
            dimension_semantics=("parallel", "arbitrary", "arbitrary"),
            vmem_limit_bytes=_vmem_limit_bytes(),
        ),
    )(x, x, mask_bias, arg13, *weights)

    # Per-(batch, q-tile) pooled partials -> final arg1_vec.
    return out.sum(axis=(1, 2))


def reference(input_ids, attention_mask, arg1, params):
    """Pure-JAX reference with the same bf16-matmul / f32-accumulate semantics."""
    f32, bf16 = jnp.float32, jnp.bfloat16
    x = params["emb"][input_ids]                    # (B, S, H) bf16
    H = x.shape[-1]

    def mm(a, w, b):
        return jnp.dot(a.astype(bf16), w, preferred_element_type=f32) + b

    q = mm(x, params["wq"], params["bq"])
    k = mm(x, params["wk"], params["bk"])
    v = mm(x, params["wv"], params["bv"])
    scores = jnp.einsum("bsh,bth->bst", q.astype(bf16), k.astype(bf16),
                        preferred_element_type=f32) / np.sqrt(H)
    scores = scores + (attention_mask.astype(f32)[:, None, :] - 1.0) * 1e9
    p = jax.nn.softmax(scores, axis=-1)
    attn = jnp.einsum("bst,bth->bsh", p.astype(bf16), v.astype(bf16),
                      preferred_element_type=f32)
    attn = mm(attn, params["wo"], params["bo"])
    h = x.astype(f32) + attn
    ffn = jnp.maximum(mm(h, params["w1"], params["b1"]), 0.0)
    out = h + mm(ffn, params["w2"], params["b2"])
    return (out * arg1.astype(f32)[..., None]).sum(1)


def make_params(key, vocab, H, F):
    ks = jax.random.split(key, 13)

    def xavier(k, shape):
        lim = float(np.sqrt(6.0 / (shape[0] + shape[1])))
        return jax.random.uniform(k, shape, jnp.float32, -lim, lim).astype(jnp.bfloat16)

    def bias(k, n):
        return 0.01 * jax.random.normal(k, (1, n), jnp.float32)

    return {
        "emb": (0.02 * jax.random.normal(ks[0], (vocab, H), jnp.float32)).astype(jnp.bfloat16),
        "wq": xavier(ks[1], (H, H)), "bq": bias(ks[2], H),
        "wk": xavier(ks[3], (H, H)), "bk": bias(ks[4], H),
        "wv": xavier(ks[5], (H, H)), "bv": bias(ks[6], H),
        "wo": xavier(ks[7], (H, H)), "bo": bias(ks[8], H),
        "w1": xavier(ks[9], (H, F)), "b1": bias(ks[10], F),
        "w2": xavier(ks[11], (F, H)), "b2": bias(ks[12], H),
    }


if __name__ == "__main__":
    # Small but tiling-friendly shapes (H multiple of 128, S tiled by 128/256).
    B, S, H, F, VOCAB = 2, 256, 128, 256, 512
    key = jax.random.PRNGKey(0)
    kp, kid, karg = jax.random.split(key, 3)

    params = make_params(kp, VOCAB, H, F)

    input_ids = jax.random.randint(kid, (B, S), 0, VOCAB, dtype=jnp.int32)
    attention_mask = jnp.ones((B, S), jnp.float32).at[1, S - 5:].set(0.0)  # pad tail of row 1
    # arg1: 0/1 indicator of the mention-span positions to pool over.
    arg1 = (jax.random.uniform(karg, (B, S)) > 0.5).astype(jnp.float32)
    arg1 = arg1.at[:, 1].set(1.0)  # ensure a non-empty span

    out = full_cross_encoder_single(input_ids, attention_mask, arg1, params)
    out = jax.block_until_ready(out)

    ref = reference(input_ids, attention_mask, arg1, params)
    assert out.shape == (B, H) and out.dtype == jnp.float32
    # Tolerance reflects intentional bf16 matmul inputs, online softmax and
    # approx reciprocal vs. the one-shot reference; catches gross errors.
    np.testing.assert_allclose(np.asarray(out), np.asarray(ref), rtol=1e-2, atol=1e-2)

    print("KERNEL_OK")
</pallas_src>

<mosaic_0001>
module attributes {stable_mosaic.version = 11 : i64} {
  func.func @encoder_pool_kernel(%arg0: i32, %arg1: i32, %arg2: i32, %arg3: memref<1x128x128xbf16, #tpu.memory_space<vmem>>, %arg4: memref<1x256x128xbf16, #tpu.memory_space<vmem>>, %arg5: memref<2x1x256xf32, #tpu.memory_space<vmem>>, %arg6: memref<1x128x1xf32, #tpu.memory_space<vmem>>, %arg7: memref<128x128xbf16, #tpu.memory_space<vmem>>, %arg8: memref<1x128xf32, #tpu.memory_space<vmem>>, %arg9: memref<128x128xbf16, #tpu.memory_space<vmem>>, %arg10: memref<1x128xf32, #tpu.memory_space<vmem>>, %arg11: memref<128x128xbf16, #tpu.memory_space<vmem>>, %arg12: memref<1x128xf32, #tpu.memory_space<vmem>>, %arg13: memref<128x128xbf16, #tpu.memory_space<vmem>>, %arg14: memref<1x128xf32, #tpu.memory_space<vmem>>, %arg15: memref<128x256xbf16, #tpu.memory_space<vmem>>, %arg16: memref<1x256xf32, #tpu.memory_space<vmem>>, %arg17: memref<256x128xbf16, #tpu.memory_space<vmem>>, %arg18: memref<1x128xf32, #tpu.memory_space<vmem>>, %arg19: memref<1x1x1x128xf32, #tpu.memory_space<vmem>>, %arg20: memref<128x128xbf16, #tpu.memory_space<vmem>>, %arg21: memref<128x1xf32, #tpu.memory_space<vmem>>, %arg22: memref<128x1xf32, #tpu.memory_space<vmem>>, %arg23: memref<128x128xf32, #tpu.memory_space<vmem>>, %arg24: memref<1x256x128xbf16, #tpu.memory_space<vmem>>, %arg25: memref<1x256x128xbf16, #tpu.memory_space<vmem>>) attributes {dimension_semantics = [#tpu.dimension_semantics<parallel>, #tpu.dimension_semantics<arbitrary>, #tpu.dimension_semantics<arbitrary>], iteration_bounds = array<i64: 2, 2, 1>, scalar_prefetch = 0 : i64, scratch_operands = 6 : i64, tpu.core_type = #tpu.core_type<tc>, window_params = [{transform_indices = @transform_0, window_bounds = array<i64: 1, 128, 128>}, {transform_indices = @transform_1, window_bounds = array<i64: 1, 256, 128>}, {pipeline_mode = #tpu.pipeline_mode<synchronous>, transform_indices = @transform_2, window_bounds = array<i64: 2, 1, 256>}, {transform_indices = @transform_3, window_bounds = array<i64: 1, 128, 1>}, {pipeline_mode = #tpu.pipeline_mode<synchronous>, transform_indices = @transform_4, window_bounds = array<i64: 128, 128>}, {pipeline_mode = #tpu.pipeline_mode<synchronous>, transform_indices = @transform_5, window_bounds = array<i64: 1, 128>}, {pipeline_mode = #tpu.pipeline_mode<synchronous>, transform_indices = @transform_6, window_bounds = array<i64: 128, 128>}, {pipeline_mode = #tpu.pipeline_mode<synchronous>, transform_indices = @transform_7, window_bounds = array<i64: 1, 128>}, {pipeline_mode = #tpu.pipeline_mode<synchronous>, transform_indices = @transform_8, window_bounds = array<i64: 128, 128>}, {pipeline_mode = #tpu.pipeline_mode<synchronous>, transform_indices = @transform_9, window_bounds = array<i64: 1, 128>}, {pipeline_mode = #tpu.pipeline_mode<synchronous>, transform_indices = @transform_10, window_bounds = array<i64: 128, 128>}, {pipeline_mode = #tpu.pipeline_mode<synchronous>, transform_indices = @transform_11, window_bounds = array<i64: 1, 128>}, {pipeline_mode = #tpu.pipeline_mode<synchronous>, transform_indices = @transform_12, window_bounds = array<i64: 128, 256>}, {pipeline_mode = #tpu.pipeline_mode<synchronous>, transform_indices = @transform_13, window_bounds = array<i64: 1, 256>}, {pipeline_mode = #tpu.pipeline_mode<synchronous>, transform_indices = @transform_14, window_bounds = array<i64: 256, 128>}, {pipeline_mode = #tpu.pipeline_mode<synchronous>, transform_indices = @transform_15, window_bounds = array<i64: 1, 128>}, {transform_indices = @transform_16, window_bounds = array<i64: 1, 1, 1, 128>}]} {
    %c0 = arith.constant 0 : index
    %c0_0 = arith.constant 0 : index
    %c0_1 = arith.constant 0 : index
    %0 = vector.load %arg3[%c0, %c0_0, %c0_1] : memref<1x128x128xbf16, #tpu.memory_space<vmem>>, vector<1x128x128xbf16>
    %1 = vector.shape_cast %0 : vector<1x128x128xbf16> to vector<128x128xbf16>
    %c0_i32 = arith.constant 0 : i32
    %2 = arith.cmpi eq, %arg1, %c0_i32 : i32
    %3 = arith.extui %2 : i1 to i32
    %c0_i32_2 = arith.constant 0 : i32
    %4 = arith.cmpi ne, %3, %c0_i32_2 : i32
    scf.if %4 {
      %c0_31 = arith.constant 0 : index
      %c0_32 = arith.constant 0 : index
      %c0_33 = arith.constant 0 : index
      %49 = vector.load %arg4[%c0_31, %c0_32, %c0_33] : memref<1x256x128xbf16, #tpu.memory_space<vmem>>, vector<1x256x128xbf16>
      %50 = vector.shape_cast %49 : vector<1x256x128xbf16> to vector<256x128xbf16>
      %c0_34 = arith.constant 0 : index
      %c0_35 = arith.constant 0 : index
      %51 = vector.load %arg9[%c0_34, %c0_35] : memref<128x128xbf16, #tpu.memory_space<vmem>>, vector<128x128xbf16>
      %cst_36 = arith.constant dense<0.000000e+00> : vector<256x128xf32>
      %52 = tpu.matmul %50, %51, %cst_36 {dimension_numbers = #tpu.dot_dimension_numbers<[1], [0], [0], [1], [0, 0, 1, 1], [], []>} : vector<256x128xbf16>, vector<128x128xbf16>, vector<256x128xf32> -> vector<256x128xf32>
      %c0_37 = arith.constant 0 : index
      %c0_38 = arith.constant 0 : index
      %53 = vector.load %arg10[%c0_37, %c0_38] : memref<1x128xf32, #tpu.memory_space<vmem>>, vector<1x128xf32>
      %54 = vector.broadcast %53 : vector<1x128xf32> to vector<256x128xf32>
      %55 = arith.addf %52, %54 : vector<256x128xf32>
      %c0_39 = arith.constant 0 : index
      %c0_40 = arith.constant 0 : index
      %56 = vector.load %arg11[%c0_39, %c0_40] : memref<128x128xbf16, #tpu.memory_space<vmem>>, vector<128x128xbf16>
      %cst_41 = arith.constant dense<0.000000e+00> : vector<256x128xf32>
      %57 = tpu.matmul %50, %56, %cst_41 {dimension_numbers = #tpu.dot_dimension_numbers<[1], [0], [0], [1], [0, 0, 1, 1], [], []>} : vector<256x128xbf16>, vector<128x128xbf16>, vector<256x128xf32> -> vector<256x128xf32>
      %c0_42 = arith.constant 0 : index
      %c0_43 = arith.constant 0 : index
      %58 = vector.load %arg12[%c0_42, %c0_43] : memref<1x128xf32, #tpu.memory_space<vmem>>, vector<1x128xf32>
      %59 = vector.broadcast %58 : vector<1x128xf32> to vector<256x128xf32>
      %60 = arith.addf %57, %59 : vector<256x128xf32>
      %61 = arith.truncf %55 : vector<256x128xf32> to vector<256x128xbf16>
      %62 = arith.index_cast %arg2 : i32 to index
      %c0_44 = arith.constant 0 : index
      %c0_45 = arith.constant 0 : index
      %63 = vector.load %arg24[%62, %c0_44, %c0_45] : memref<1x256x128xbf16, #tpu.memory_space<vmem>>, vector<1x256x128xbf16>
      %64 = vector.shape_cast %63 : vector<1x256x128xbf16> to vector<256x128xbf16>
      %65 = vector.shape_cast %61 : vector<256x128xbf16> to vector<1x256x128xbf16>
      tpu.vector_store %arg24[%62, %c0_44, %c0_45], %65 {strides = array<i32>} : memref<1x256x128xbf16, #tpu.memory_space<vmem>>, vector<1x256x128xbf16>,
      %66 = arith.truncf %60 : vector<256x128xf32> to vector<256x128xbf16>
      %67 = arith.index_cast %arg2 : i32 to index
      %c0_46 = arith.constant 0 : index
      %c0_47 = arith.constant 0 : index
      %68 = vector.load %arg25[%67, %c0_46, %c0_47] : memref<1x256x128xbf16, #tpu.memory_space<vmem>>, vector<1x256x128xbf16>
      %69 = vector.shape_cast %68 : vector<1x256x128xbf16> to vector<256x128xbf16>
      %70 = vector.shape_cast %66 : vector<256x128xbf16> to vector<1x256x128xbf16>
      tpu.vector_store %arg25[%67, %c0_46, %c0_47], %70 {strides = array<i32>} : memref<1x256x128xbf16, #tpu.memory_space<vmem>>, vector<1x256x128xbf16>,
    } else {
    }
    %c0_i32_3 = arith.constant 0 : i32
    %5 = arith.cmpi eq, %arg2, %c0_i32_3 : i32
    %6 = arith.extui %5 : i1 to i32
    %cst = arith.constant 0.0883883461 : f32
    %c0_i32_4 = arith.constant 0 : i32
    %7 = arith.cmpi ne, %6, %c0_i32_4 : i32
    scf.if %7 {
      %c0_31 = arith.constant 0 : index
      %c0_32 = arith.constant 0 : index
      %49 = vector.load %arg7[%c0_31, %c0_32] : memref<128x128xbf16, #tpu.memory_space<vmem>>, vector<128x128xbf16>
      %cst_33 = arith.constant dense<0.000000e+00> : vector<128x128xf32>
      %50 = tpu.matmul %1, %49, %cst_33 {dimension_numbers = #tpu.dot_dimension_numbers<[1], [0], [0], [1], [0, 0, 1, 1], [], []>} : vector<128x128xbf16>, vector<128x128xbf16>, vector<128x128xf32> -> vector<128x128xf32>
      %c0_34 = arith.constant 0 : index
      %c0_35 = arith.constant 0 : index
      %51 = vector.load %arg8[%c0_34, %c0_35] : memref<1x128xf32, #tpu.memory_space<vmem>>, vector<1x128xf32>
      %52 = vector.broadcast %51 : vector<1x128xf32> to vector<128x128xf32>
      %53 = arith.addf %50, %52 : vector<128x128xf32>
      %54 = vector.broadcast %cst : f32 to vector<128x128xf32>
      %55 = arith.mulf %53, %54 : vector<128x128xf32>
      %56 = arith.truncf %55 : vector<128x128xf32> to vector<128x128xbf16>
      %c0_36 = arith.constant 0 : index
      %c0_37 = arith.constant 0 : index
      %57 = vector.load %arg20[%c0_36, %c0_37] : memref<128x128xbf16, #tpu.memory_space<vmem>>, vector<128x128xbf16>
      tpu.vector_store %arg20[%c0_36, %c0_37], %56 {strides = array<i32>} : memref<128x128xbf16, #tpu.memory_space<vmem>>, vector<128x128xbf16>,
      %cst_38 = arith.constant 0xFF800000 : f32
      %58 = vector.broadcast %cst_38 : f32 to vector<128x1xf32>
      %c0_39 = arith.constant 0 : index
      %c0_40 = arith.constant 0 : index
      %59 = vector.load %arg21[%c0_39, %c0_40] : memref<128x1xf32, #tpu.memory_space<vmem>>, vector<128x1xf32>
      tpu.vector_store %arg21[%c0_39, %c0_40], %58 {strides = array<i32>} : memref<128x1xf32, #tpu.memory_space<vmem>>, vector<128x1xf32>,
      %cst_41 = arith.constant 0.000000e+00 : f32
      %60 = vector.broadcast %cst_41 : f32 to vector<128x1xf32>
      %c0_42 = arith.constant 0 : index
      %c0_43 = arith.constant 0 : index
      %61 = vector.load %arg22[%c0_42, %c0_43] : memref<128x1xf32, #tpu.memory_space<vmem>>, vector<128x1xf32>
      tpu.vector_store %arg22[%c0_42, %c0_43], %60 {strides = array<i32>} : memref<128x1xf32, #tpu.memory_space<vmem>>, vector<128x1xf32>,
      %cst_44 = arith.constant 0.000000e+00 : f32
      %62 = vector.broadcast %cst_44 : f32 to vector<128x128xf32>
      %c0_45 = arith.constant 0 : index
      %c0_46 = arith.constant 0 : index
      %63 = vector.load %arg23[%c0_45, %c0_46] : memref<128x128xf32, #tpu.memory_space<vmem>>, vector<128x128xf32>
      tpu.vector_store %arg23[%c0_45, %c0_46], %62 {strides = array<i32>} : memref<128x128xf32, #tpu.memory_space<vmem>>, vector<128x128xf32>,
    } else {
    }
    %8 = arith.index_cast %arg2 : i32 to index
    %c0_5 = arith.constant 0 : index
    %c0_6 = arith.constant 0 : index
    %9 = vector.load %arg24[%8, %c0_5, %c0_6] : memref<1x256x128xbf16, #tpu.memory_space<vmem>>, vector<1x256x128xbf16>
    %10 = vector.shape_cast %9 : vector<1x256x128xbf16> to vector<256x128xbf16>
    %11 = arith.index_cast %arg2 : i32 to index
    %c0_7 = arith.constant 0 : index
    %c0_8 = arith.constant 0 : index
    %12 = vector.load %arg25[%11, %c0_7, %c0_8] : memref<1x256x128xbf16, #tpu.memory_space<vmem>>, vector<1x256x128xbf16>
    %13 = vector.shape_cast %12 : vector<1x256x128xbf16> to vector<256x128xbf16>
    %c0_9 = arith.constant 0 : index
    %c0_10 = arith.constant 0 : index
    %14 = vector.load %arg20[%c0_9, %c0_10] : memref<128x128xbf16, #tpu.memory_space<vmem>>, vector<128x128xbf16>
    %cst_11 = arith.constant dense<0.000000e+00> : vector<128x256xf32>
    %15 = tpu.matmul %14, %10, %cst_11 {dimension_numbers = #tpu.dot_dimension_numbers<[1], [1], [0], [0], [0, 0, 1, 0], [], []>} : vector<128x128xbf16>, vector<256x128xbf16>, vector<128x256xf32> -> vector<128x256xf32>
    %c1_i32 = arith.constant 1 : i32
    %16 = arith.muli %arg0, %c1_i32 : i32
    %17 = arith.addi %16, %arg2 : i32
    %18 = arith.index_cast %17 : i32 to index
    %c0_12 = arith.constant 0 : index
    %c0_13 = arith.constant 0 : index
    %19 = vector.load %arg5[%18, %c0_12, %c0_13] : memref<2x1x256xf32, #tpu.memory_space<vmem>>, vector<1x1x256xf32>
    %20 = vector.shape_cast %19 : vector<1x1x256xf32> to vector<1x256xf32>
    %21 = vector.broadcast %20 : vector<1x256xf32> to vector<128x256xf32>
    %22 = arith.addf %15, %21 : vector<128x256xf32>
    %c0_14 = arith.constant 0 : index
    %c0_15 = arith.constant 0 : index
    %23 = vector.load %arg21[%c0_14, %c0_15] : memref<128x1xf32, #tpu.memory_space<vmem>>, vector<128x1xf32>
    %cst_16 = arith.constant dense<0xFF800000> : vector<128xf32>
    %24 = vector.multi_reduction <maximumf>, %22, %cst_16 [1] : vector<128x256xf32> to vector<128xf32>
    %25 = vector.shape_cast %24 : vector<128xf32> to vector<128x1xf32>
    %26 = arith.maximumf %23, %25 : vector<128x1xf32>
    %27 = arith.subf %23, %26 : vector<128x1xf32>
    %28 = math.exp %27 : vector<128x1xf32>
    %29 = vector.broadcast %26 : vector<128x1xf32> to vector<128x256xf32>
    %30 = arith.subf %22, %29 : vector<128x256xf32>
    %31 = math.exp %30 : vector<128x256xf32>
    %c0_17 = arith.constant 0 : index
    %c0_18 = arith.constant 0 : index
    %32 = vector.load %arg22[%c0_17, %c0_18] : memref<128x1xf32, #tpu.memory_space<vmem>>, vector<128x1xf32>
    %33 = arith.mulf %28, %32 : vector<128x1xf32>
    %cst_19 = arith.constant dense<0.000000e+00> : vector<128xf32>
    %34 = vector.multi_reduction <add>, %31, %cst_19 [1] : vector<128x256xf32> to vector<128xf32>
    %35 = vector.shape_cast %34 : vector<128xf32> to vector<128x1xf32>
    %36 = arith.addf %33, %35 : vector<128x1xf32>
    %c0_20 = arith.constant 0 : index
    %c0_21 = arith.constant 0 : index
    %37 = vector.load %arg22[%c0_20, %c0_21] : memref<128x1xf32, #tpu.memory_space<vmem>>, vector<128x1xf32>
    tpu.vector_store %arg22[%c0_20, %c0_21], %36 {strides = array<i32>} : memref<128x1xf32, #tpu.memory_space<vmem>>, vector<128x1xf32>,
    %c0_22 = arith.constant 0 : index
    %c0_23 = arith.constant 0 : index
    %38 = vector.load %arg23[%c0_22, %c0_23] : memref<128x128xf32, #tpu.memory_space<vmem>>, vector<128x128xf32>
    %39 = vector.broadcast %28 : vector<128x1xf32> to vector<128x128xf32>
    %40 = arith.mulf %39, %38 : vector<128x128xf32>
    %41 = arith.truncf %31 : vector<128x256xf32> to vector<128x256xbf16>
    %cst_24 = arith.constant dense<0.000000e+00> : vector<128x128xf32>
    %42 = tpu.matmul %41, %13, %cst_24 {dimension_numbers = #tpu.dot_dimension_numbers<[1], [0], [0], [1], [0, 0, 1, 1], [], []>} : vector<128x256xbf16>, vector<256x128xbf16>, vector<128x128xf32> -> vector<128x128xf32>
    %43 = arith.addf %40, %42 : vector<128x128xf32>
    %c0_25 = arith.constant 0 : index
    %c0_26 = arith.constant 0 : index
    %44 = vector.load %arg23[%c0_25, %c0_26] : memref<128x128xf32, #tpu.memory_space<vmem>>, vector<128x128xf32>
    tpu.vector_store %arg23[%c0_25, %c0_26], %43 {strides = array<i32>} : memref<128x128xf32, #tpu.memory_space<vmem>>, vector<128x128xf32>,
    %c0_27 = arith.constant 0 : index
    %c0_28 = arith.constant 0 : index
    %45 = vector.load %arg21[%c0_27, %c0_28] : memref<128x1xf32, #tpu.memory_space<vmem>>, vector<128x1xf32>
    tpu.vector_store %arg21[%c0_27, %c0_28], %26 {strides = array<i32>} : memref<128x1xf32, #tpu.memory_space<vmem>>, vector<128x1xf32>,
    %c0_i32_29 = arith.constant 0 : i32
    %46 = arith.cmpi eq, %arg2, %c0_i32_29 : i32
    %47 = arith.extui %46 : i1 to i32
    %c0_i32_30 = arith.constant 0 : i32
    %48 = arith.cmpi ne, %47, %c0_i32_30 : i32
    scf.if %48 {
      %c0_31 = arith.constant 0 : index
      %c0_32 = arith.constant 0 : index
      %49 = vector.load %arg23[%c0_31, %c0_32] : memref<128x128xf32, #tpu.memory_space<vmem>>, vector<128x128xf32>
      %c0_33 = arith.constant 0 : index
      %c0_34 = arith.constant 0 : index
      %50 = vector.load %arg22[%c0_33, %c0_34] : memref<128x1xf32, #tpu.memory_space<vmem>>, vector<128x1xf32>
      %51 = tpu.reciprocal %50 {approx = true} : vector<128x1xf32> -> vector<128x1xf32>
      %52 = vector.broadcast %51 : vector<128x1xf32> to vector<128x128xf32>
      %53 = arith.mulf %49, %52 : vector<128x128xf32>
      %54 = arith.truncf %53 : vector<128x128xf32> to vector<128x128xbf16>
      %c0_35 = arith.constant 0 : index
      %c0_36 = arith.constant 0 : index
      %55 = vector.load %arg13[%c0_35, %c0_36] : memref<128x128xbf16, #tpu.memory_space<vmem>>, vector<128x128xbf16>
      %cst_37 = arith.constant dense<0.000000e+00> : vector<128x128xf32>
      %56 = tpu.matmul %54, %55, %cst_37 {dimension_numbers = #tpu.dot_dimension_numbers<[1], [0], [0], [1], [0, 0, 1, 1], [], []>} : vector<128x128xbf16>, vector<128x128xbf16>, vector<128x128xf32> -> vector<128x128xf32>
      %c0_38 = arith.constant 0 : index
      %c0_39 = arith.constant 0 : index
      %57 = vector.load %arg14[%c0_38, %c0_39] : memref<1x128xf32, #tpu.memory_space<vmem>>, vector<1x128xf32>
      %58 = vector.broadcast %57 : vector<1x128xf32> to vector<128x128xf32>
      %59 = arith.addf %56, %58 : vector<128x128xf32>
      %60 = arith.extf %1 : vector<128x128xbf16> to vector<128x128xf32>
      %61 = arith.addf %60, %59 : vector<128x128xf32>
      %62 = arith.truncf %61 : vector<128x128xf32> to vector<128x128xbf16>
      %c0_40 = arith.constant 0 : index
      %c0_41 = arith.constant 0 : index
      %63 = vector.load %arg15[%c0_40, %c0_41] : memref<128x256xbf16, #tpu.memory_space<vmem>>, vector<128x256xbf16>
      %cst_42 = arith.constant dense<0.000000e+00> : vector<128x256xf32>
      %64 = tpu.matmul %62, %63, %cst_42 {dimension_numbers = #tpu.dot_dimension_numbers<[1], [0], [0], [1], [0, 0, 1, 1], [], []>} : vector<128x128xbf16>, vector<128x256xbf16>, vector<128x256xf32> -> vector<128x256xf32>
      %c0_43 = arith.constant 0 : index
      %c0_44 = arith.constant 0 : index
      %65 = vector.load %arg16[%c0_43, %c0_44] : memref<1x256xf32, #tpu.memory_space<vmem>>, vector<1x256xf32>
      %66 = vector.broadcast %65 : vector<1x256xf32> to vector<128x256xf32>
      %67 = arith.addf %64, %66 : vector<128x256xf32>
      %cst_45 = arith.constant 0.000000e+00 : f32
      %68 = vector.broadcast %cst_45 : f32 to vector<128x256xf32>
      %69 = arith.maximumf %67, %68 : vector<128x256xf32>
      %70 = arith.truncf %69 : vector<128x256xf32> to vector<128x256xbf16>
      %c0_46 = arith.constant 0 : index
      %c0_47 = arith.constant 0 : index
      %71 = vector.load %arg17[%c0_46, %c0_47] : memref<256x128xbf16, #tpu.memory_space<vmem>>, vector<256x128xbf16>
      %cst_48 = arith.constant dense<0.000000e+00> : vector<128x128xf32>
      %72 = tpu.matmul %70, %71, %cst_48 {dimension_numbers = #tpu.dot_dimension_numbers<[1], [0], [0], [1], [0, 0, 1, 1], [], []>} : vector<128x256xbf16>, vector<256x128xbf16>, vector<128x128xf32> -> vector<128x128xf32>
      %c0_49 = arith.constant 0 : index
      %c0_50 = arith.constant 0 : index
      %73 = vector.load %arg18[%c0_49, %c0_50] : memref<1x128xf32, #tpu.memory_space<vmem>>, vector<1x128xf32>
      %74 = vector.broadcast %73 : vector<1x128xf32> to vector<128x128xf32>
      %75 = arith.addf %72, %74 : vector<128x128xf32>
      %76 = arith.addf %61, %75 : vector<128x128xf32>
      %c0_51 = arith.constant 0 : index
      %c0_52 = arith.constant 0 : index
      %c0_53 = arith.constant 0 : index
      %77 = vector.load %arg6[%c0_51, %c0_52, %c0_53] : memref<1x128x1xf32, #tpu.memory_space<vmem>>, vector<1x128x1xf32>
      %78 = vector.shape_cast %77 : vector<1x128x1xf32> to vector<128x1xf32>
      %79 = vector.broadcast %78 : vector<128x1xf32> to vector<128x128xf32>
      %80 = arith.mulf %76, %79 : vector<128x128xf32>
      %cst_54 = arith.constant dense<0.000000e+00> : vector<128xf32>
      %81 = vector.multi_reduction <add>, %80, %cst_54 [0] : vector<128x128xf32> to vector<128xf32>
      %82 = vector.shape_cast %81 : vector<128xf32> to vector<1x128xf32>
      %c0_55 = arith.constant 0 : index
      %c0_56 = arith.constant 0 : index
      %c0_57 = arith.constant 0 : index
      %c0_58 = arith.constant 0 : index
      %83 = vector.load %arg19[%c0_55, %c0_56, %c0_57, %c0_58] : memref<1x1x1x128xf32, #tpu.memory_space<vmem>>, vector<1x1x1x128xf32>
      %84 = vector.shape_cast %83 : vector<1x1x1x128xf32> to vector<1x128xf32>
      %85 = vector.shape_cast %82 : vector<1x128xf32> to vector<1x1x1x128xf32>
      tpu.vector_store %arg19[%c0_55, %c0_56, %c0_57, %c0_58], %85 {strides = array<i32>} : memref<1x1x1x128xf32, #tpu.memory_space<vmem>>, vector<1x1x1x128xf32>,
    } else {
    }
    return
  }
  func.func @transform_0(%arg0: i32, %arg1: i32, %arg2: i32) -> (i32, i32, i32) {
    %c0_i32 = arith.constant 0 : i32
    %c0_i32_0 = arith.constant 0 : i32
    return %arg0, %arg1, %c0_i32 : i32, i32, i32
  }
  func.func @transform_1(%arg0: i32, %arg1: i32, %arg2: i32) -> (i32, i32, i32) {
    %c0_i32 = arith.constant 0 : i32
    %0 = arith.cmpi eq, %arg1, %c0_i32 : i32
    %c0_i32_0 = arith.constant 0 : i32
    %1 = arith.select %0, %arg2, %c0_i32_0 : i32
    %c0_i32_1 = arith.constant 0 : i32
    %c0_i32_2 = arith.constant 0 : i32
    return %arg0, %1, %c0_i32_1 : i32, i32, i32
  }
  func.func @transform_2(%arg0: i32, %arg1: i32, %arg2: i32) -> (i32, i32, i32) {
    %c0_i32 = arith.constant 0 : i32
    %c0_i32_0 = arith.constant 0 : i32
    %c0_i32_1 = arith.constant 0 : i32
    %c0_i32_2 = arith.constant 0 : i32
    return %c0_i32, %c0_i32_0, %c0_i32_1 : i32, i32, i32
  }
  func.func @transform_3(%arg0: i32, %arg1: i32, %arg2: i32) -> (i32, i32, i32) {
    %c0_i32 = arith.constant 0 : i32
    %c0_i32_0 = arith.constant 0 : i32
    return %arg0, %arg1, %c0_i32 : i32, i32, i32
  }
  func.func @transform_4(%arg0: i32, %arg1: i32, %arg2: i32) -> (i32, i32) {
    %c0_i32 = arith.constant 0 : i32
    %c0_i32_0 = arith.constant 0 : i32
    %c0_i32_1 = arith.constant 0 : i32
    return %c0_i32, %c0_i32_0 : i32, i32
  }
  func.func @transform_5(%arg0: i32, %arg1: i32, %arg2: i32) -> (i32, i32) {
    %c0_i32 = arith.constant 0 : i32
    %c0_i32_0 = arith.constant 0 : i32
    %c0_i32_1 = arith.constant 0 : i32
    return %c0_i32, %c0_i32_0 : i32, i32
  }
  func.func @transform_6(%arg0: i32, %arg1: i32, %arg2: i32) -> (i32, i32) {
    %c0_i32 = arith.constant 0 : i32
    %c0_i32_0 = arith.constant 0 : i32
    %c0_i32_1 = arith.constant 0 : i32
    return %c0_i32, %c0_i32_0 : i32, i32
  }
  func.func @transform_7(%arg0: i32, %arg1: i32, %arg2: i32) -> (i32, i32) {
    %c0_i32 = arith.constant 0 : i32
    %c0_i32_0 = arith.constant 0 : i32
    %c0_i32_1 = arith.constant 0 : i32
    return %c0_i32, %c0_i32_0 : i32, i32
  }
  func.func @transform_8(%arg0: i32, %arg1: i32, %arg2: i32) -> (i32, i32) {
    %c0_i32 = arith.constant 0 : i32
    %c0_i32_0 = arith.constant 0 : i32
    %c0_i32_1 = arith.constant 0 : i32
    return %c0_i32, %c0_i32_0 : i32, i32
  }
  func.func @transform_9(%arg0: i32, %arg1: i32, %arg2: i32) -> (i32, i32) {
    %c0_i32 = arith.constant 0 : i32
    %c0_i32_0 = arith.constant 0 : i32
    %c0_i32_1 = arith.constant 0 : i32
    return %c0_i32, %c0_i32_0 : i32, i32
  }
  func.func @transform_10(%arg0: i32, %arg1: i32, %arg2: i32) -> (i32, i32) {
    %c0_i32 = arith.constant 0 : i32
    %c0_i32_0 = arith.constant 0 : i32
    %c0_i32_1 = arith.constant 0 : i32
    return %c0_i32, %c0_i32_0 : i32, i32
  }
  func.func @transform_11(%arg0: i32, %arg1: i32, %arg2: i32) -> (i32, i32) {
    %c0_i32 = arith.constant 0 : i32
    %c0_i32_0 = arith.constant 0 : i32
    %c0_i32_1 = arith.constant 0 : i32
    return %c0_i32, %c0_i32_0 : i32, i32
  }
  func.func @transform_12(%arg0: i32, %arg1: i32, %arg2: i32) -> (i32, i32) {
    %c0_i32 = arith.constant 0 : i32
    %c0_i32_0 = arith.constant 0 : i32
    %c0_i32_1 = arith.constant 0 : i32
    return %c0_i32, %c0_i32_0 : i32, i32
  }
  func.func @transform_13(%arg0: i32, %arg1: i32, %arg2: i32) -> (i32, i32) {
    %c0_i32 = arith.constant 0 : i32
    %c0_i32_0 = arith.constant 0 : i32
    %c0_i32_1 = arith.constant 0 : i32
    return %c0_i32, %c0_i32_0 : i32, i32
  }
  func.func @transform_14(%arg0: i32, %arg1: i32, %arg2: i32) -> (i32, i32) {
    %c0_i32 = arith.constant 0 : i32
    %c0_i32_0 = arith.constant 0 : i32
    %c0_i32_1 = arith.constant 0 : i32
    return %c0_i32, %c0_i32_0 : i32, i32
  }
  func.func @transform_15(%arg0: i32, %arg1: i32, %arg2: i32) -> (i32, i32) {
    %c0_i32 = arith.constant 0 : i32
    %c0_i32_0 = arith.constant 0 : i32
    %c0_i32_1 = arith.constant 0 : i32
    return %c0_i32, %c0_i32_0 : i32, i32
  }
  func.func @transform_16(%arg0: i32, %arg1: i32, %arg2: i32) -> (i32, i32, i32, i32) {
    %c0_i32 = arith.constant 0 : i32
    %c0_i32_0 = arith.constant 0 : i32
    %c0_i32_1 = arith.constant 0 : i32
    return %arg0, %arg1, %c0_i32, %c0_i32_0 : i32, i32, i32, i32
  }
}

</mosaic_0001>

<bundles_post_ra>
// kernel: tpu_custom_call.1
= control target key start
LH: loop header
LB: loop body
LE: loop exit
PB: predicated region body
PF: predicated region fallthrough
CT: control target
= control target key end

     0   :  { %s6572_s0 = inlined_call_operand.vmem [shape: bf16[2,256,128], index: 0, kind: input, shape index: {}]   ;;  %s6573_s1 = inlined_call_operand.vmem [shape: bf16[2,256,128], index: 1, kind: input, shape index: {}]   ;;  %s6574_s2 = inlined_call_operand.vmem [shape: f32[2,1,256], index: 2, kind: input, shape index: {}]   ;;  %s6575_s3 = inlined_call_operand.vmem [shape: f32[2,256,1], index: 3, kind: input, shape index: {}]   ;;  %s6576_s4 = inlined_call_operand.hbm [shape: bf16[128,128], index: 4, kind: input, shape index: {}]   ;;  %s6577_s5 = inlined_call_operand.hbm [shape: f32[1,128], index: 5, kind: input, shape index: {}]   ;;  %s6578_s6 = inlined_call_operand.hbm [shape: bf16[128,128], index: 6, kind: input, shape index: {}]   ;;  %s6579_s7 = inlined_call_operand.vmem [shape: f32[1,128], index: 7, kind: input, shape index: {}]   ;;  %s6580_s8 = inlined_call_operand.hbm [shape: bf16[128,128], index: 8, kind: input, shape index: {}]   ;;  %s6581_s9 = inlined_call_operand.vmem [shape: f32[1,128], index: 9, kind: input, shape index: {}]   ;;  %s6582_s10 = inlined_call_operand.hbm [shape: bf16[128,128], index: 10, kind: input, shape index: {}]   ;;  %s6583_s11 = inlined_call_operand.vmem [shape: f32[1,128], index: 11, kind: input, shape index: {}]   ;;  %s6584_s12 = inlined_call_operand.hbm [shape: bf16[128,256], index: 12, kind: input, shape index: {}]   ;;  %s6585_s13 = inlined_call_operand.vmem [shape: f32[1,256], index: 13, kind: input, shape index: {}]   ;;  %s6586_s14 = inlined_call_operand.hbm [shape: bf16[256,128], index: 14, kind: input, shape index: {}]   ;;  %s6587_s15 = inlined_call_operand.vmem [shape: f32[1,128], index: 15, kind: input, shape index: {}]   ;;  %s6588_s16 = inlined_call_operand.hbm [shape: f32[2,2,1,128], index: 16, kind: output, shape index: {}]  }
   0x1   :  { %6621 = sst [smem:[#allocation57_spill]] %s6572_s0 }
   0x2   :  { %6622 = sst [smem:[#allocation58_spill]] %s6577_s5 }
   0x3   :  { %6623 = sst [smem:[#allocation59_spill]] %s6580_s8 }
   0x4   :  { %6624 = sst [smem:[#allocation60_spill]] %s6584_s12 }
   0x5   :  { %6625 = sst [smem:[#allocation61_spill]] %s6585_s13 }
   0x6   :  { %6626 = sst [smem:[#allocation62_spill]] %s6587_s15 }
   0x7   :  { %6627 = sst [smem:[#allocation63_spill]] %s6588_s16 }
   0x8   :  { %21 = vsyncpa [#allocation9], 0 }
   0x9   :  { %22 = vsyncpa [#allocation12], 0 }
   0xa   :  { %23 = vsyncpa [#allocation15], 0 }
   0xb   :  { %24 = vsyncpa [#allocation18], 0 }
   0xc   :  { %25 = vsyncpa [#allocation10], 0 }
   0xd   :  { %27 = vsyncpa [#allocation10 + $0x1], 0  ;;  %s5536_s21 = smov 0   ;;  %s5538_s22 = smov 0  }
   0xe   :  { %s5540_s23 = smov 0   ;;  %s5542_s24 = smov 0  }
   0xf   :  { %s5544_s25 = smov 0   ;;  %s5546_s26 = smov 0  }
  0x10   :  { %s5548_s27 = smov 0   ;;  %s5550_s28 = smov 0  }
  0x11 LB: > { %6628 = sst [smem:[#allocation26_spill]] %s5407_s21  ;;  %s3888_s29 = sadd.s32 4294967295, %s5435_s28   ;;  %s5435_s28 = sphi %s5550_s28, %s33_s28   ;;  %s5431_s27 = sphi %s5548_s27, %s6713_s27   ;;  %s5427_s26 = sphi %s5546_s26, %s6712_s26   ;;  %s5423_s25 = sphi %s5544_s25, %s6711_s25   ;;  %s5419_s24 = sphi %s5542_s24, %s6710_s24   ;;  %s5415_s23 = sphi %s5540_s23, %s6709_s23   ;;  %s5411_s22 = sphi %s5538_s22, %s6715_s22   ;;  %s5407_s21 = sphi %s5536_s21, %s6714_s21  }
  0x12   : > { %6629 = sst [smem:[#allocation27_spill]] %s5415_s23  ;;  %s3889_s30 = sadd.s32 4294967294, %s5435_s28  }
  0x13   : > { %6630 = sst [smem:[#allocation28_spill]] %s5427_s26  ;;  %s48_s0 = sadd.s32 1, %s5427_s26 }
  0x14   : > { %6631 = sst [smem:[#allocation29_spill]] %s5431_s27  ;;  %s52_s17 = sadd.s32 1, %s5431_s27 }
  0x15   : > { %6632 = sst [smem:[#allocation30_spill]] %s5435_s28  ;;  %p50_p0 = scmp.ge.s32.totalorder %s48_s0, 2 }
  0x16   : > { %s422_s18 = sadd.s32 1, %s5415_s23  ;;  %p432_p1 = scmp.ne.s32.totalorder %s5415_s23, %s5411_s22 }
  0x17   : > { %p433_p2 = scmp.eq.s32.totalorder %s3888_s29, 3  ;;  %s6717_s0 = smov (%p50_p0, %s48_s0), 0 }
  0x18   : > { %6633 = sst [smem:[#allocation31_spill]] %s6717_s0  ;;  %s6719_s17 = smov (!%p50_p0, %s52_s17), %s5431_s27 }
  0x19   : > { %s418_s19 = ssub.s32 %s5427_s26, %s6717_s0  ;;  %p5588_p3 = por %p433_p2, %p432_p1 }
  0x1a   : > { %p54_p4 = scmp.ge.s32.totalorder %s6719_s17, 2  ;;  %p438_p5 = scmp.ne.s32.totalorder %s5411_s22, %s5407_s21 }
  0x1b   : > { %s6634_s20 = scalar_select %p5588_p3, 1, 0 }
  0x1c   : > { %p439_p6 = scmp.eq.s32.totalorder %s3889_s30, 3  ;;  %p3890_p7 = scmp.ge.s32.totalorder %s5435_s28, 1 }
  0x1d   : > { %6635 = sst [smem:[#allocation32_spill]] %s6634_s20  ;;  %s6721_s17 = smov (%p54_p4, %s6719_s17), 0 }
  0x1e   : > { %6636 = sst [smem:[#allocation33_spill]] %s6721_s17  ;;  %p5597_p8 = por %p439_p6, %p438_p5 }
  0x1f   : > { %p446_p9 = scmp.lt.s32.totalorder %s5435_s28, 5  ;;  %s417_s15 = ssub.s32 %s5431_s27, %s6721_s17 }
  0x20   : > { %s6637_s16 = scalar_select %p5597_p8, 1, 0 }
  0x21   : > { %s419_s13 = sor.u32 %s418_s19, %s417_s15  ;;  %p5604_p10 = pnand %p3890_p7, %p446_p9 }
  0x22   : > { %6638 = sst [smem:[#allocation34_spill]] %s6637_s16  ;;  %p420_p11 = scmp.eq.s32.totalorder %s419_s13, 0 }
  0x23   : > { %p5608_p12 = scmp.eq.s32.totalorder %s3888_s29, 0  ;;  %p4860_p13 = pneg %p5604_p10 }
  0x24   : > { %s6641_s5 = sld [smem:[#allocation58_spill]]  ;;  %s5437_s13 = smov [#allocation11]  }
  0x25   : > { %s5618_s28 = scalar_select %p420_p11, %s5415_s23, %s422_s18  }
  0x26   : > { %p5622_p0 = pnand %p5608_p12, %p4860_p13  ;;  %s477_s29 = sshll.u32 %s5437_s13, 4  ;;  %s478_s29 = int_to_ptr.vmem [resolvable:$true] %s477_s29 }
  0x27   : > { %6642 = sst [smem:[#allocation35_spill]] %s5618_s28  ;;  %s5438_s18 = smov [#allocation14]  }
  0x28   : > { %s6644_s8 = sld [smem:[#allocation59_spill]]  ;;  %s505_s30 = sshll.u32 %s5438_s18, 4  ;;  %s506_s30 = int_to_ptr.vmem [resolvable:$true] %s505_s30 }
  0x29   : > { %s6645_s12 = sld [smem:[#allocation60_spill]]  ;;  %s5439_s23 = smov 64  }
  0x2a   : > { %s475_s16 = sshll.u32 %s6641_s5, 4  ;;  %s5440_s20 = smov 4   ;;  %s476_s16 = int_to_ptr.hbm [resolvable:$true] %s475_s16 }
  0x2b   : > { %4866 = dma.hbm_to_vmem [thread:$0]  (!%p5622_p0), %s476_s16, 16, %s478_s29, [#allocation12]  }
  0x2c   : > { %s5441_s16 = smov [#allocation17]   ;;  %s5442_s13 = smov 128  }
  0x2d   : > { %s539_s17 = sshll.u32 %s5441_s16, 4  ;;  %s5443_s29 = smov 8   ;;  %s540_s17 = int_to_ptr.vmem [resolvable:$true] %s539_s17 }
  0x2e   : > { %s503_s21 = sshll.u32 %s6644_s8, 4  ;;  %s460_s27 = sshll.u32 %s6576_s4, 4  ;;  %s504_s21 = int_to_ptr.hbm [resolvable:$true] %s503_s21  ;;  %s461_s27 = int_to_ptr.hbm [resolvable:$true] %s460_s27 }
  0x2f   : > { %s537_s28 = sshll.u32 %s6645_s12, 4  ;;  %s5444_s18 = smov [#allocation8]   ;;  %s538_s28 = int_to_ptr.hbm [resolvable:$true] %s537_s28 }
  0x30   : > { %4872 = dma.hbm_to_vmem [thread:$0]  (!%p5622_p0), %s504_s21, 1024, %s506_s30, [#allocation15], %s5439_s23, %s5439_s23, %s5440_s20  }
  0x31   : > { %4878 = dma.hbm_to_vmem [thread:$0]  (!%p5622_p0), %s538_s28, 2048, %s540_s17, [#allocation18], %s5442_s13, %s5442_s13, %s5443_s29  }
  0x32   : > { %s462_s8 = sshll.u32 %s5444_s18, 4  ;;  %s486_s30 = sshll.u32 %s6578_s6, 4  ;;  %s463_s8 = int_to_ptr.vmem [resolvable:$true] %s462_s8  ;;  %s487_s30 = int_to_ptr.hbm [resolvable:$true] %s486_s30 }
  0x33   : > { %4863 = dma.hbm_to_vmem [thread:$0]  (!%p5622_p0), %s461_s27, 1024, %s463_s8, [#allocation9], %s5439_s23, %s5439_s23, %s5440_s20  }
  0x34   : > { %s5445_s28 = smov [#allocation13]   ;;  %s520_s29 = sshll.u32 %s6582_s10, 4  ;;  %s521_s29 = int_to_ptr.hbm [resolvable:$true] %s520_s29 }
  0x35   : > { %s488_s16 = sshll.u32 %s5445_s28, 4  ;;  %s554_s5 = sshll.u32 %s6586_s14, 4  ;;  %s489_s16 = int_to_ptr.vmem [resolvable:$true] %s488_s16  ;;  %s555_s5 = int_to_ptr.hbm [resolvable:$true] %s554_s5 }
  0x36   : > { %4869 = dma.hbm_to_vmem [thread:$0]  (!%p5622_p0), %s487_s30, 1024, %s489_s16, [#allocation12], %s5439_s23, %s5439_s23, %s5440_s20  }
  0x37   : > { %s5446_s8 = smov [#allocation16]   ;;  %s5447_s18 = smov [#allocation19]  }
  0x38   : > { %s522_s27 = sshll.u32 %s5446_s8, 4  ;;  %s556_s21 = sshll.u32 %s5447_s18, 4  ;;  %s523_s27 = int_to_ptr.vmem [resolvable:$true] %s522_s27  ;;  %s557_s21 = int_to_ptr.vmem [resolvable:$true] %s556_s21 }
  0x39   : > { %4875 = dma.hbm_to_vmem [thread:$0]  (!%p5622_p0), %s521_s29, 1024, %s523_s27, [#allocation15], %s5439_s23, %s5439_s23, %s5440_s20  }
  0x3a   : > { %4881 = dma.hbm_to_vmem [thread:$0]  (!%p5622_p0), %s555_s5, 2048, %s557_s21, [#allocation18], %s5439_s23, %s5439_s23, %s5440_s20  }
  0x3b   : > { %618 = sbr.rel (%p5604_p10) target bundleno = 1890 (0x762), region = 84 }
  0x40   : > { %5386 = dma.done.wait (%p5608_p12), [#allocation9], 1024  }
  0x41   : > { %5388 = vsyncadd (%p5608_p12), [#allocation9], 4294966272 }
  0x42   : > { %5390 = dma.done.wait (%p5608_p12), [#allocation12], 1040  }
  0x43   : > { %5392 = vsyncadd (%p5608_p12), [#allocation12], 4294966256 }
  0x44   : > { %5394 = dma.done.wait (%p5608_p12), [#allocation15], 2048  }
  0x45   : > { %5396 = vsyncadd (%p5608_p12), [#allocation15], 4294965248 }
  0x46   : > { %5398 = dma.done.wait (%p5608_p12), [#allocation18], 4096  }
  0x47   : > { %5400 = vsyncadd (%p5608_p12), [#allocation18], 4294963200  ;;  %s3907_s23 = sshll.u32 %s5419_s24, 4  ;;  %p723_p1 = scmp.lt.s32.totalorder %s5423_s25, 1 }
  0x48   : > { %p725_p2 = scmp.lt.s32.totalorder %s3907_s23, 31  ;;  %s720_s0 = sand.u32 1, %s5411_s22  }
  0x49   : > { %s724_s20 = scalar_select %p723_p1, %s5423_s25, 1 }
  0x4a   : > { %s6723_s23 = smov (!%p725_p2, %s3907_s23), 31  ;;  %s6646_s5 = sld [smem:[#allocation57_spill]] }
  0x4b   : > { %s3908_s15 = sshll.u32 %s724_s20, 5  ;;  %s4432_s30 = sshll.u32 %s724_s20, 7 }
  0x4c   : > { %s728_s28 = sadd.s32 %s3908_s15, %s6723_s23  ;;  %s5698_s13 = scalar_lea.vmem %s6573_s1, %s4432_s30 }
  0x4d   : > { %s3909_s26 = sshll.u32 %s728_s28, 2  ;;  %s3914_s29 = sshll.u32 %s728_s28, 3 }
  0x4e   : > { %s5706_s21 = scalar_lea.vmem %s6575_s3, %s3914_s29  ;;  %s5758_s23 = scalar_lea.vmem [#allocation20], %s720_s0 }
  0x4f   : > { %p3915_p4 = scmp.ne.s32.totalorder %s5419_s24, 0 }
  0x50   : > { %s730_s8 = scalar_lea.vmem %s6646_s5, %s3909_s26 }
  0x51   : > { %v5708_v0 = vld [vmem:[%s730_s8] sm:$0xff]   ;;  %v5714_v3 = vld [vmem:[%s730_s8 + $0x8] sm:$0xff]   ;;  %v5720_v6 = vld [vmem:[%s730_s8 + $0x10] sm:$0xff]  }
  0x52   : > { %6647 = vst [vmem:[#allocation36_spill] sm:$0xff] %v5708_v0  ;;  %v5710_v1 = vld [vmem:[%s730_s8] sm:$0xf]  ;;  %v5712_v2 = vld [vmem:[%s730_s8] sm:$0xf0]  ;;  %v5726_v9 = vld [vmem:[%s730_s8 + $0x18] sm:$0xff]  }
  0x53   : > { %6648 = vst [vmem:[#allocation37_spill] sm:$0xff] %v5714_v3  ;;  %v5716_v4 = vld [vmem:[%s730_s8 + $0x8] sm:$0xf]  ;;  %v5718_v5 = vld [vmem:[%s730_s8 + $0x8] sm:$0xf0]  ;;  %v5732_v12 = vld [vmem:[%s730_s8 + $0x20] sm:$0xff]  }
  0x54   : > { %6649 = vst [vmem:[#allocation38_spill] sm:$0xff] %v5720_v6  ;;  %v5722_v7 = vld [vmem:[%s730_s8 + $0x10] sm:$0xf]  ;;  %v5724_v8 = vld [vmem:[%s730_s8 + $0x10] sm:$0xf0]  ;;  %v5738_v15 = vld [vmem:[%s730_s8 + $0x28] sm:$0xff]  }
  0x55   : > { %6650 = vst [vmem:[#allocation39_spill] sm:$0xff] %v5726_v9  ;;  %v5728_v10 = vld [vmem:[%s730_s8 + $0x18] sm:$0xf]  ;;  %v5730_v11 = vld [vmem:[%s730_s8 + $0x18] sm:$0xf0]  ;;  %v5744_v18 = vld [vmem:[%s730_s8 + $0x30] sm:$0xff]  }
  0x56   : > { %6651 = vst [vmem:[#allocation40_spill] sm:$0xff] %v5732_v12  ;;  %v5734_v13 = vld [vmem:[%s730_s8 + $0x20] sm:$0xf]  ;;  %v5736_v14 = vld [vmem:[%s730_s8 + $0x20] sm:$0xf0]  ;;  %v5750_v21 = vld [vmem:[%s730_s8 + $0x38] sm:$0xff]  }
  0x57   : > { %6652 = vst [vmem:[#allocation41_spill] sm:$0xff] %v5738_v15  ;;  %v5740_v16 = vld [vmem:[%s730_s8 + $0x28] sm:$0xf]  ;;  %v5742_v17 = vld [vmem:[%s730_s8 + $0x28] sm:$0xf0]  ;;  %775 = sbr.rel (%p3915_p4) target bundleno = 382 (0x17e), region = 116 }
  0x58   : > { %6653 = vst [vmem:[#allocation42_spill] sm:$0xff] %v5744_v18  ;;  %v5746_v19 = vld [vmem:[%s730_s8 + $0x30] sm:$0xf]  ;;  %v5748_v20 = vld [vmem:[%s730_s8 + $0x30] sm:$0xf0] }
  0x59   : > { %6654 = vst [vmem:[#allocation43_spill] sm:$0xff] %v5750_v21  ;;  %v5752_v22 = vld [vmem:[%s730_s8 + $0x38] sm:$0xf]  ;;  %v5754_v23 = vld [vmem:[%s730_s8 + $0x38] sm:$0xf0] }
  0x5c   : > { %v4464_v24 = vld [vmem:[#allocation13 + $0x38] sm:$0xff]  ;;  %v4463_v26 = vld [vmem:[#allocation13 + $0x30] sm:$0xff]  ;;  %v4462_v28 = vld [vmem:[#allocation13 + $0x28] sm:$0xff] }
  0x5d   : > { %v4472_v25 = vld [vmem:[#allocation14 + $0x38] sm:$0xff]  ;;  %972 = vmatpush.bf16.msra.mxu0 %v4464_v24  ;;  %4798 = vmatpush.bf16.msra.mxu2 %v4464_v24  ;;  %v4471_v27 = vld [vmem:[#allocation14 + $0x30] sm:$0xff]  ;;  %v4470_v29 = vld [vmem:[#allocation14 + $0x28] sm:$0xff] }
  0x5e   : > { %1129 = vmatpush.bf16.msra.mxu1 %v4472_v25  ;;  %4806 = vmatpush.bf16.msra.mxu3 %v4472_v25  ;;  %v4461_v30 = vld [vmem:[#allocation13 + $0x20] sm:$0xff]  ;;  %v4460_v32 = vld [vmem:[#allocation13 + $0x18] sm:$0xff]  ;;  %v4459_v34 = vld [vmem:[#allocation13 + $0x10] sm:$0xff] }
  0x5f   : > { %v4469_v31 = vld [vmem:[#allocation14 + $0x20] sm:$0xff]  ;;  %v4468_v33 = vld [vmem:[#allocation14 + $0x18] sm:$0xff]  ;;  %v4467_v35 = vld [vmem:[#allocation14 + $0x10] sm:$0xff] }
  0x60   : > { %v4458_v36 = vld [vmem:[#allocation13 + $0x8] sm:$0xff]  ;;  %v4457_v38 = vld [vmem:[#allocation13] sm:$0xff]  ;;  %v4444_v46 = vld [vmem:[%s5698_s13 + $0x18] sm:$0xff] }
  0x61   : > { %973 = vmatpush.bf16.msra.mxu0 %v4463_v26  ;;  %4799 = vmatpush.bf16.msra.mxu2 %v4463_v26  ;;  %v4466_v37 = vld [vmem:[#allocation14 + $0x8] sm:$0xff]  ;;  %v4465_v39 = vld [vmem:[#allocation14] sm:$0xff]  ;;  %v4452_v47 = vld [vmem:[%s5698_s13 + $0x58] sm:$0xff] }
  0x62   : > { %1130 = vmatpush.bf16.msra.mxu1 %v4471_v27  ;;  %4807 = vmatpush.bf16.msra.mxu3 %v4471_v27  ;;  %v4441_v40 = vld [vmem:[%s5698_s13] sm:$0xff]  ;;  %v4442_v42 = vld [vmem:[%s5698_s13 + $0x8] sm:$0xff]  ;;  %v4443_v44 = vld [vmem:[%s5698_s13 + $0x10] sm:$0xff] }
  0x63   : > { %v4449_v41 = vld [vmem:[%s5698_s13 + $0x40] sm:$0xff]  ;;  %v4450_v43 = vld [vmem:[%s5698_s13 + $0x48] sm:$0xff]  ;;  %v4451_v45 = vld [vmem:[%s5698_s13 + $0x50] sm:$0xff] }
  0x64   : > { %v4445_v48 = vld [vmem:[%s5698_s13 + $0x20] sm:$0xff]  ;;  %v4446_v50 = vld [vmem:[%s5698_s13 + $0x28] sm:$0xff]  ;;  %v4447_v52 = vld [vmem:[%s5698_s13 + $0x30] sm:$0xff] }
  0x65   : > { %974 = vmatpush.bf16.msra.mxu0 %v4462_v28  ;;  %4800 = vmatpush.bf16.msra.mxu2 %v4462_v28  ;;  %v4453_v49 = vld [vmem:[%s5698_s13 + $0x60] sm:$0xff]  ;;  %v4454_v51 = vld [vmem:[%s5698_s13 + $0x68] sm:$0xff]  ;;  %v4455_v53 = vld [vmem:[%s5698_s13 + $0x70] sm:$0xff] }
  0x66   : > { %1131 = vmatpush.bf16.msra.mxu1 %v4470_v29  ;;  %4808 = vmatpush.bf16.msra.mxu3 %v4470_v29  ;;  %v4448_v54 = vld [vmem:[%s5698_s13 + $0x38] sm:$0xff]  ;;  %v5780_v58 = vld [vmem:[%s6579_s7] ss:$0 sm:$0xff] }
  0x67   : > { %v4456_v55 = vld [vmem:[%s5698_s13 + $0x78] sm:$0xff]  ;;  %v5785_v59 = vld [vmem:[%s6581_s9] ss:$0 sm:$0xff] }
  0x69   : > { %975 = vmatpush.bf16.msra.mxu0 %v4461_v30  ;;  %4801 = vmatpush.bf16.msra.mxu2 %v4461_v30 }
  0x6a   : > { %1132 = vmatpush.bf16.msra.mxu1 %v4469_v31  ;;  %4809 = vmatpush.bf16.msra.mxu3 %v4469_v31 }
  0x6d   : > { %976 = vmatpush.bf16.msra.mxu0 %v4460_v32  ;;  %4802 = vmatpush.bf16.msra.mxu2 %v4460_v32 }
  0x6e   : > { %1133 = vmatpush.bf16.msra.mxu1 %v4468_v33  ;;  %4810 = vmatpush.bf16.msra.mxu3 %v4468_v33 }
  0x71   : > { %977 = vmatpush.bf16.msra.mxu0 %v4459_v34  ;;  %4803 = vmatpush.bf16.msra.mxu2 %v4459_v34 }
  0x72   : > { %1134 = vmatpush.bf16.msra.mxu1 %v4467_v35  ;;  %4811 = vmatpush.bf16.msra.mxu3 %v4467_v35 }
  0x75   : > { %978 = vmatpush.bf16.msra.mxu0 %v4458_v36  ;;  %4804 = vmatpush.bf16.msra.mxu2 %v4458_v36 }
  0x76   : > { %1135 = vmatpush.bf16.msra.mxu1 %v4466_v37  ;;  %4812 = vmatpush.bf16.msra.mxu3 %v4466_v37 }
  0x79   : > { %979 = vmatpush.bf16.msra.mxu0 %v4457_v38  ;;  %4805 = vmatpush.bf16.msra.mxu2 %v4457_v38 }
  0x7a   : > { %1136 = vmatpush.bf16.msra.mxu1 %v4465_v39  ;;  %4813 = vmatpush.bf16.msra.mxu3 %v4465_v39 }
  0x7c   : > { %980 = vmatmul.bf16.vlgmr.msra.gmra.mxu0 %v4441_v40  ;;  %1020 = vmatmul.bf16.vlgmr.msra.gmra.mxu2 %v4449_v41 }
  0x7d   : > { %1137 = vmatmul.bf16.vlgmr.msra.gmra.mxu1 %v4441_v40  ;;  %1177 = vmatmul.bf16.vlgmr.msra.gmra.mxu3 %v4449_v41 }
  0x8c   : > { %985 = vmatmul.bf16.gmra.mxu0 %v4442_v42  ;;  %1025 = vmatmul.bf16.gmra.mxu2 %v4450_v43 }
  0x8d   : > { %1142 = vmatmul.bf16.gmra.mxu1 %v4442_v42  ;;  %1182 = vmatmul.bf16.gmra.mxu3 %v4450_v43 }
  0x9c   : > { %990 = vmatmul.bf16.gmra.mxu0 %v4443_v44  ;;  %1030 = vmatmul.bf16.gmra.mxu2 %v4451_v45 }
  0x9d   : > { %1147 = vmatmul.bf16.gmra.mxu1 %v4443_v44  ;;  %1187 = vmatmul.bf16.gmra.mxu3 %v4451_v45 }
  0xac   : > { %995 = vmatmul.bf16.gmra.mxu0 %v4444_v46  ;;  %1035 = vmatmul.bf16.gmra.mxu2 %v4452_v47 }
  0xad   : > { %1152 = vmatmul.bf16.gmra.mxu1 %v4444_v46  ;;  %1192 = vmatmul.bf16.gmra.mxu3 %v4452_v47 }
  0xbc   : > { %1000 = vmatmul.bf16.gmra.mxu0 %v4445_v48  ;;  %1040 = vmatmul.bf16.gmra.mxu2 %v4453_v49 }
  0xbd   : > { %1157 = vmatmul.bf16.gmra.mxu1 %v4445_v48  ;;  %1197 = vmatmul.bf16.gmra.mxu3 %v4453_v49 }
  0xcc   : > { %1005 = vmatmul.bf16.gmra.mxu0 %v4446_v50  ;;  %1045 = vmatmul.bf16.gmra.mxu2 %v4454_v51 }
  0xcd   : > { %1162 = vmatmul.bf16.gmra.mxu1 %v4446_v50  ;;  %1202 = vmatmul.bf16.gmra.mxu3 %v4454_v51 }
  0xdc   : > { %1010 = vmatmul.bf16.gmra.mxu0 %v4447_v52  ;;  %1050 = vmatmul.bf16.gmra.mxu2 %v4455_v53 }
  0xdd   : > { %1167 = vmatmul.bf16.gmra.mxu1 %v4447_v52  ;;  %1207 = vmatmul.bf16.gmra.mxu3 %v4455_v53 }
  0xec   : > { %1015 = vmatmul.bf16.gmra.mxu0 %v4448_v54  ;;  %1055 = vmatmul.bf16.gmra.mxu2 %v4456_v55 }
  0xed   : > { %1172 = vmatmul.bf16.gmra.mxu1 %v4448_v54  ;;  %1212 = vmatmul.bf16.gmra.mxu3 %v4456_v55 }
  0xf9   : > { %v981_v56 = vpop.f32.mrf.mxu0 }
  0xfa   : > { %v1138_v57 = vpop.f32.mrf.mxu1  ;;  %v982_v63 = vadd.f32 %v5780_v58, %v981_v56 }
  0xfb   : > { %v1139_v26 = vadd.f32 %v5785_v59, %v1138_v57 }
  0xff   : > { %v1021_v60 = vpop.f32.mrf.mxu2 }
 0x100   : > { %v1178_v61 = vpop.f32.mrf.mxu3  ;;  %v1022_v31 = vadd.f32 %v5780_v58, %v1021_v60 }
 0x101   : > { %v983_v62 = vpop.f32.mrf.mxu0  ;;  %v1179_v34 = vadd.f32 %v5785_v59, %v1178_v61 }
 0x102   : > { %v984_v24 = vadd.f32 %v5780_v58, %v983_v62  ;;  %v1140_v25 = vpop.f32.mrf.mxu1 }
 0x103   : > { %v1141_v27 = vadd.f32 %v5785_v59, %v1140_v25 }
 0x104   : > { %v4564_v28 = vpack.c.bf16 %v984_v24, %v982_v63 }
 0x105   : > { %v4644_v29 = vpack.c.bf16 %v1141_v27, %v1139_v26 }
 0x106   : > { %4565 = vst [vmem:[#allocation6] sm:$0xff] %v4564_v28  }
 0x107   : > { %4645 = vst [vmem:[#allocation7 + $0x30] sm:$0xff] %v4644_v29   ;;  %v1023_v30 = vpop.f32.mrf.mxu2 }
 0x108   : > { %v1024_v32 = vadd.f32 %v5780_v58, %v1023_v30  ;;  %v1180_v33 = vpop.f32.mrf.mxu3 }
 0x109   : > { %v1181_v35 = vadd.f32 %v5785_v59, %v1180_v33  ;;  %v986_v36 = vpop.f32.mrf.mxu0 }
 0x10a   : > { %v4604_v37 = vpack.c.bf16 %v1024_v32, %v1022_v31  ;;  %v1143_v38 = vpop.f32.mrf.mxu1  ;;  %v987_v43 = vadd.f32 %v5780_v58, %v986_v36 }
 0x10b   : > { %v4684_v39 = vpack.c.bf16 %v1181_v35, %v1179_v34  ;;  %v1144_v46 = vadd.f32 %v5785_v59, %v1143_v38 }
 0x10c   : > { %4768 = vst [vmem:[#allocation6 + $0x28] sm:$0xff] %v4604_v37  }
 0x10d   : > { %4783 = vst [vmem:[#allocation7 + $0x78] sm:$0xff] %v4684_v39  }
 0x10f   : > { %v1026_v40 = vpop.f32.mrf.mxu2 }
 0x110   : > { %v1183_v41 = vpop.f32.mrf.mxu3  ;;  %v1027_v51 = vadd.f32 %v5780_v58, %v1026_v40 }
 0x111   : > { %v988_v42 = vpop.f32.mrf.mxu0  ;;  %v1184_v54 = vadd.f32 %v5785_v59, %v1183_v41 }
 0x112   : > { %v989_v44 = vadd.f32 %v5780_v58, %v988_v42  ;;  %v1145_v45 = vpop.f32.mrf.mxu1 }
 0x113   : > { %v1146_v47 = vadd.f32 %v5785_v59, %v1145_v45 }
 0x114   : > { %v4569_v48 = vpack.c.bf16 %v989_v44, %v987_v43 }
 0x115   : > { %v4649_v49 = vpack.c.bf16 %v1146_v47, %v1144_v46 }
 0x116   : > { %4761 = vst [vmem:[#allocation6 + $0x18] sm:$0xff] %v4569_v48  }
 0x117   : > { %4776 = vst [vmem:[#allocation7] sm:$0xff] %v4649_v49   ;;  %v1028_v50 = vpop.f32.mrf.mxu2 }
 0x118   : > { %v1029_v52 = vadd.f32 %v5780_v58, %v1028_v50  ;;  %v1185_v53 = vpop.f32.mrf.mxu3 }
 0x119   : > { %v1186_v55 = vadd.f32 %v5785_v59, %v1185_v53  ;;  %v991_v56 = vpop.f32.mrf.mxu0 }
 0x11a   : > { %v4609_v57 = vpack.c.bf16 %v1029_v52, %v1027_v51  ;;  %v1148_v60 = vpop.f32.mrf.mxu1  ;;  %v992_v25 = vadd.f32 %v5780_v58, %v991_v56 }
 0x11b   : > { %v4689_v61 = vpack.c.bf16 %v1186_v55, %v1184_v54  ;;  %v1149_v28 = vadd.f32 %v5785_v59, %v1148_v60 }
 0x11c   : > { %4769 = vst [vmem:[#allocation6 + $0x40] sm:$0xff] %v4609_v57  }
 0x11d   : > { %4784 = vst [vmem:[#allocation7 + $0x50] sm:$0xff] %v4689_v61  }
 0x11f   : > { %v1031_v62 = vpop.f32.mrf.mxu2 }
 0x120   : > { %v1188_v63 = vpop.f32.mrf.mxu3  ;;  %v1032_v33 = vadd.f32 %v5780_v58, %v1031_v62 }
 0x121   : > { %v993_v24 = vpop.f32.mrf.mxu0  ;;  %v1189_v36 = vadd.f32 %v5785_v59, %v1188_v63 }
 0x122   : > { %v994_v26 = vadd.f32 %v5780_v58, %v993_v24  ;;  %v1150_v27 = vpop.f32.mrf.mxu1 }
 0x123   : > { %v1151_v29 = vadd.f32 %v5785_v59, %v1150_v27 }
 0x124   : > { %v4574_v30 = vpack.c.bf16 %v994_v26, %v992_v25 }
 0x125   : > { %v4654_v31 = vpack.c.bf16 %v1151_v29, %v1149_v28 }
 0x126   : > { %4762 = vst [vmem:[#allocation6 + $0x50] sm:$0xff] %v4574_v30  }
 0x127   : > { %4777 = vst [vmem:[#allocation7 + $0x40] sm:$0xff] %v4654_v31   ;;  %v1033_v32 = vpop.f32.mrf.mxu2 }
 0x128   : > { %v1034_v34 = vadd.f32 %v5780_v58, %v1033_v32  ;;  %v1190_v35 = vpop.f32.mrf.mxu3 }
 0x129   : > { %v1191_v37 = vadd.f32 %v5785_v59, %v1190_v35  ;;  %v996_v38 = vpop.f32.mrf.mxu0 }
 0x12a   : > { %v4614_v39 = vpack.c.bf16 %v1034_v34, %v1032_v33  ;;  %v1153_v40 = vpop.f32.mrf.mxu1  ;;  %v997_v45 = vadd.f32 %v5780_v58, %v996_v38 }
 0x12b   : > { %v4694_v41 = vpack.c.bf16 %v1191_v37, %v1189_v36  ;;  %v1154_v48 = vadd.f32 %v5785_v59, %v1153_v40 }
 0x12c   : > { %4770 = vst [vmem:[#allocation6 + $0x38] sm:$0xff] %v4614_v39  }
 0x12d   : > { %4785 = vst [vmem:[#allocation7 + $0x18] sm:$0xff] %v4694_v41  }
 0x12f   : > { %v1036_v42 = vpop.f32.mrf.mxu2 }
 0x130   : > { %v1193_v43 = vpop.f32.mrf.mxu3  ;;  %v1037_v53 = vadd.f32 %v5780_v58, %v1036_v42 }
 0x131   : > { %v998_v44 = vpop.f32.mrf.mxu0  ;;  %v1194_v56 = vadd.f32 %v5785_v59, %v1193_v43 }
 0x132   : > { %v999_v46 = vadd.f32 %v5780_v58, %v998_v44  ;;  %v1155_v47 = vpop.f32.mrf.mxu1 }
 0x133   : > { %v1156_v49 = vadd.f32 %v5785_v59, %v1155_v47 }
 0x134   : > { %v4579_v50 = vpack.c.bf16 %v999_v46, %v997_v45 }
 0x135   : > { %v4659_v51 = vpack.c.bf16 %v1156_v49, %v1154_v48 }
 0x136   : > { %4763 = vst [vmem:[#allocation6 + $0x60] sm:$0xff] %v4579_v50  }
 0x137   : > { %4778 = vst [vmem:[#allocation7 + $0x58] sm:$0xff] %v4659_v51   ;;  %v1038_v52 = vpop.f32.mrf.mxu2 }
 0x138   : > { %v1039_v54 = vadd.f32 %v5780_v58, %v1038_v52  ;;  %v1195_v55 = vpop.f32.mrf.mxu3 }
 0x139   : > { %v1196_v57 = vadd.f32 %v5785_v59, %v1195_v55  ;;  %v1001_v60 = vpop.f32.mrf.mxu0 }
 0x13a   : > { %v4619_v61 = vpack.c.bf16 %v1039_v54, %v1037_v53  ;;  %v1158_v62 = vpop.f32.mrf.mxu1  ;;  %v1002_v27 = vadd.f32 %v5780_v58, %v1001_v60 }
 0x13b   : > { %v4699_v63 = vpack.c.bf16 %v1196_v57, %v1194_v56  ;;  %v1159_v30 = vadd.f32 %v5785_v59, %v1158_v62 }
 0x13c   : > { %4771 = vst [vmem:[#allocation6 + $0x8] sm:$0xff] %v4619_v61  }
 0x13d   : > { %4786 = vst [vmem:[#allocation7 + $0x70] sm:$0xff] %v4699_v63  }
 0x13f   : > { %v1041_v24 = vpop.f32.mrf.mxu2 }
 0x140   : > { %v1198_v25 = vpop.f32.mrf.mxu3  ;;  %v1042_v35 = vadd.f32 %v5780_v58, %v1041_v24 }
 0x141   : > { %v1003_v26 = vpop.f32.mrf.mxu0  ;;  %v1199_v38 = vadd.f32 %v5785_v59, %v1198_v25 }
 0x142   : > { %v1004_v28 = vadd.f32 %v5780_v58, %v1003_v26  ;;  %v1160_v29 = vpop.f32.mrf.mxu1 }
 0x143   : > { %v1161_v31 = vadd.f32 %v5785_v59, %v1160_v29 }
 0x144   : > { %v4584_v32 = vpack.c.bf16 %v1004_v28, %v1002_v27 }
 0x145   : > { %v4664_v33 = vpack.c.bf16 %v1161_v31, %v1159_v30 }
 0x146   : > { %4764 = vst [vmem:[#allocation6 + $0x68] sm:$0xff] %v4584_v32  }
 0x147   : > { %4779 = vst [vmem:[#allocation7 + $0x8] sm:$0xff] %v4664_v33   ;;  %v1043_v34 = vpop.f32.mrf.mxu2 }
 0x148   : > { %v1044_v36 = vadd.f32 %v5780_v58, %v1043_v34  ;;  %v1200_v37 = vpop.f32.mrf.mxu3 }
 0x149   : > { %v1201_v39 = vadd.f32 %v5785_v59, %v1200_v37  ;;  %v1006_v40 = vpop.f32.mrf.mxu0 }
 0x14a   : > { %v4624_v41 = vpack.c.bf16 %v1044_v36, %v1042_v35  ;;  %v1163_v42 = vpop.f32.mrf.mxu1  ;;  %v1007_v47 = vadd.f32 %v5780_v58, %v1006_v40 }
 0x14b   : > { %v4704_v43 = vpack.c.bf16 %v1201_v39, %v1199_v38  ;;  %v1164_v50 = vadd.f32 %v5785_v59, %v1163_v42 }
 0x14c   : > { %4772 = vst [vmem:[#allocation6 + $0x58] sm:$0xff] %v4624_v41  }
 0x14d   : > { %4787 = vst [vmem:[#allocation7 + $0x60] sm:$0xff] %v4704_v43  }
 0x14f   : > { %v1046_v44 = vpop.f32.mrf.mxu2 }
 0x150   : > { %v1203_v45 = vpop.f32.mrf.mxu3  ;;  %v1047_v55 = vadd.f32 %v5780_v58, %v1046_v44 }
 0x151   : > { %v1008_v46 = vpop.f32.mrf.mxu0  ;;  %v1204_v60 = vadd.f32 %v5785_v59, %v1203_v45 }
 0x152   : > { %v1009_v48 = vadd.f32 %v5780_v58, %v1008_v46  ;;  %v1165_v49 = vpop.f32.mrf.mxu1 }
 0x153   : > { %v1166_v51 = vadd.f32 %v5785_v59, %v1165_v49 }
 0x154   : > { %v4589_v52 = vpack.c.bf16 %v1009_v48, %v1007_v47 }
 0x155   : > { %v4669_v53 = vpack.c.bf16 %v1166_v51, %v1164_v50 }
 0x156   : > { %4765 = vst [vmem:[#allocation6 + $0x20] sm:$0xff] %v4589_v52  }
 0x157   : > { %4780 = vst [vmem:[#allocation7 + $0x28] sm:$0xff] %v4669_v53   ;;  %v1048_v54 = vpop.f32.mrf.mxu2 }
 0x158   : > { %v1049_v56 = vadd.f32 %v5780_v58, %v1048_v54  ;;  %v1205_v57 = vpop.f32.mrf.mxu3 }
 0x159   : > { %v1206_v61 = vadd.f32 %v5785_v59, %v1205_v57  ;;  %v1011_v62 = vpop.f32.mrf.mxu0 }
 0x15a   : > { %v4629_v63 = vpack.c.bf16 %v1049_v56, %v1047_v55  ;;  %v1168_v24 = vpop.f32.mrf.mxu1  ;;  %v1012_v29 = vadd.f32 %v5780_v58, %v1011_v62 }
 0x15b   : > { %v4709_v25 = vpack.c.bf16 %v1206_v61, %v1204_v60  ;;  %v1169_v32 = vadd.f32 %v5785_v59, %v1168_v24 }
 0x15c   : > { %4773 = vst [vmem:[#allocation6 + $0x48] sm:$0xff] %v4629_v63  }
 0x15d   : > { %4788 = vst [vmem:[#allocation7 + $0x10] sm:$0xff] %v4709_v25  }
 0x15f   : > { %v1051_v26 = vpop.f32.mrf.mxu2 }
 0x160   : > { %v1208_v27 = vpop.f32.mrf.mxu3  ;;  %v1052_v37 = vadd.f32 %v5780_v58, %v1051_v26 }
 0x161   : > { %v1013_v28 = vpop.f32.mrf.mxu0  ;;  %v1209_v40 = vadd.f32 %v5785_v59, %v1208_v27 }
 0x162   : > { %v1014_v30 = vadd.f32 %v5780_v58, %v1013_v28  ;;  %v1170_v31 = vpop.f32.mrf.mxu1 }
 0x163   : > { %v1171_v33 = vadd.f32 %v5785_v59, %v1170_v31 }
 0x164   : > { %v4594_v34 = vpack.c.bf16 %v1014_v30, %v1012_v29 }
 0x165   : > { %v4674_v35 = vpack.c.bf16 %v1171_v33, %v1169_v32 }
 0x166   : > { %4766 = vst [vmem:[#allocation6 + $0x70] sm:$0xff] %v4594_v34  }
 0x167   : > { %4781 = vst [vmem:[#allocation7 + $0x38] sm:$0xff] %v4674_v35   ;;  %v1053_v36 = vpop.f32.mrf.mxu2 }
 0x168   : > { %v1054_v38 = vadd.f32 %v5780_v58, %v1053_v36  ;;  %v1210_v39 = vpop.f32.mrf.mxu3 }
 0x169   : > { %v1211_v41 = vadd.f32 %v5785_v59, %v1210_v39  ;;  %v1016_v42 = vpop.f32.mrf.mxu0 }
 0x16a   : > { %v4634_v43 = vpack.c.bf16 %v1054_v38, %v1052_v37  ;;  %v1173_v44 = vpop.f32.mrf.mxu1  ;;  %v1017_v49 = vadd.f32 %v5780_v58, %v1016_v42 }
 0x16b   : > { %v4714_v45 = vpack.c.bf16 %v1211_v41, %v1209_v40  ;;  %v1174_v52 = vadd.f32 %v5785_v59, %v1173_v44 }
 0x16c   : > { %4774 = vst [vmem:[#allocation6 + $0x78] sm:$0xff] %v4634_v43  }
 0x16d   : > { %4789 = vst [vmem:[#allocation7 + $0x68] sm:$0xff] %v4714_v45  }
 0x16f   : > { %v1056_v46 = vpop.f32.mrf.mxu2 }
 0x170   : > { %v1213_v47 = vpop.f32.mrf.mxu3  ;;  %v1057_v57 = vadd.f32 %v5780_v58, %v1056_v46 }
 0x171   : > { %v1018_v48 = vpop.f32.mrf.mxu0  ;;  %v1214_v62 = vadd.f32 %v5785_v59, %v1213_v47 }
 0x172   : > { %v1019_v50 = vadd.f32 %v5780_v58, %v1018_v48  ;;  %v1175_v51 = vpop.f32.mrf.mxu1 }
 0x173   : > { %v1176_v53 = vadd.f32 %v5785_v59, %v1175_v51 }
 0x174   : > { %v4599_v54 = vpack.c.bf16 %v1019_v50, %v1017_v49 }
 0x175   : > { %v4679_v55 = vpack.c.bf16 %v1176_v53, %v1174_v52 }
 0x176   : > { %4767 = vst [vmem:[#allocation6 + $0x10] sm:$0xff] %v4599_v54  }
 0x177   : > { %4782 = vst [vmem:[#allocation7 + $0x20] sm:$0xff] %v4679_v55   ;;  %v1058_v56 = vpop.f32.mrf.mxu2 }
 0x178   : > { %v1059_v60 = vadd.f32 %v5780_v58, %v1058_v56  ;;  %v1215_v61 = vpop.f32.mrf.mxu3 }
 0x179   : > { %v1216_v63 = vadd.f32 %v5785_v59, %v1215_v61 }
 0x17a   : > { %v4639_v24 = vpack.c.bf16 %v1059_v60, %v1057_v57 }
 0x17b   : > { %v4719_v25 = vpack.c.bf16 %v1216_v63, %v1214_v62 }
 0x17c   : > { %4775 = vst [vmem:[#allocation6 + $0x30] sm:$0xff] %v4639_v24  }
 0x17d   : > { %4790 = vst [vmem:[#allocation7 + $0x48] sm:$0xff] %v4719_v25  }
 0x17e PF: > { %v4480_v26 = vld [vmem:[#allocation8 + $0x38] sm:$0xff]  ;;  %v4479_v27 = vld [vmem:[#allocation8 + $0x30] sm:$0xff]  ;;  %v4478_v28 = vld [vmem:[#allocation8 + $0x28] sm:$0xff]  ;;  %v4047_v32 = vor.u32 %v5712_v2, %v5710_v1  ;;  %v4051_v33 = vor.u32 %v5718_v5, %v5716_v4  ;;  %v4055_v34 = vor.u32 %v5724_v8, %v5722_v7  ;;  %v4059_v35 = vor.u32 %v5730_v11, %v5728_v10  ;;  %s4108_s16 = sshll.u32 %s5423_s25, 1  ;;  %s6699_s8 = sld [smem:[#allocation61_spill]] }
 0x17f   : > { %1471 = vmatpush.bf16.msra.mxu0 %v4480_v26  ;;  %v4477_v29 = vld [vmem:[#allocation8 + $0x20] sm:$0xff]  ;;  %v4476_v30 = vld [vmem:[#allocation8 + $0x18] sm:$0xff]  ;;  %v4475_v58 = vld [vmem:[#allocation8 + $0x10] sm:$0xff]  ;;  %v4063_v2 = vor.u32 %v5736_v14, %v5734_v13  ;;  %v4067_v10 = vor.u32 %v5742_v17, %v5740_v16  ;;  %v4071_v13 = vor.u32 %v5748_v20, %v5746_v19  ;;  %v4075_v16 = vor.u32 %v5754_v23, %v5752_v22  ;;  %s1704_s26 = scalar_lea.vmem %s6574_s2, %s4108_s16  ;;  %s3690_s20 = sadd.s32 %s5419_s24, %s4108_s16 }
 0x180   : > { %v4474_v31 = vld [vmem:[#allocation8 + $0x8] sm:$0xff]  ;;  %v4473_v59 = vld [vmem:[#allocation8] sm:$0xff]  ;;  %v4488_v36 = vld [vmem:[#allocation6 + $0x10] sm:$0xff]  ;;  %vm1568_vm0 = vcmask 7168   ;;  %s6704_s17 = sld [smem:[#allocation63_spill]]  ;;  %s3681_s12 = scalar_lea.sflag [#allocation10], %s720_s0 }
 0x181   : > { %1855 = vmatpush.bf16.xpose.msra.mxu1 %v4488_v36  ;;  %v4487_v38 = vld [vmem:[#allocation6 + $0x70] sm:$0xff]  ;;  %v4495_v1 = vld [vmem:[#allocation6 + $0x78] sm:$0xff]  ;;  %v4486_v4 = vld [vmem:[#allocation6 + $0x20] sm:$0xff] }
 0x182   : > { %v4494_v5 = vld [vmem:[#allocation6 + $0x48] sm:$0xff]  ;;  %v4493_v8 = vld [vmem:[#allocation6 + $0x58] sm:$0xff]  ;;  %v4484_v11 = vld [vmem:[#allocation6 + $0x60] sm:$0xff] }
 0x183   : > { %1472 = vmatpush.bf16.msra.mxu0 %v4479_v27  ;;  %v4496_v37 = vld [vmem:[#allocation6 + $0x30] sm:$0xff]  ;;  %v4485_v7 = vld [vmem:[#allocation6 + $0x68] sm:$0xff]  ;;  %v4491_v40 = vld [vmem:[#allocation6 + $0x38] sm:$0xff] }
 0x184   : > { %1904 = vmatpush.bf16.xpose.msra.mxu2 %v4496_v37  ;;  %v4492_v39 = vld [vmem:[#allocation6 + $0x8] sm:$0xff]  ;;  %v4483_v14 = vld [vmem:[#allocation6 + $0x50] sm:$0xff]  ;;  %v4482_v41 = vld [vmem:[#allocation6 + $0x18] sm:$0xff] }
 0x185   : > { %v4490_v42 = vld [vmem:[#allocation6 + $0x40] sm:$0xff]  ;;  %v4489_v43 = vld [vmem:[#allocation6 + $0x28] sm:$0xff]  ;;  %v4503_v21 = vld [vmem:[#allocation7 + $0x38] sm:$0xff] }
 0x186   : > { %v4481_v17 = vld [vmem:[#allocation6] sm:$0xff]  ;;  %v4511_v18 = vld [vmem:[#allocation7 + $0x68] sm:$0xff]  ;;  %v4507_v3 = vld [vmem:[#allocation7 + $0x18] sm:$0xff]  ;;  %s3691_s13 = scalar_lea.hbm %s6704_s17, %s3690_s20  ;;  %s5345_s5 = scalar_lea.hbm %s6704_s17, 4 }
 0x187   : > { %1473 = vmatpush.bf16.msra.mxu0 %v4478_v28  ;;  %v5867_v45 = vld [vmem:[#allocation11] ss:$0 sm:$0xff]  ;;  %v4497_v0 = vld [vmem:[#allocation7 + $0x30] sm:$0xff]  ;;  %s3695_s29 = sshll.u32 %s3691_s13, 4  ;;  %s3696_s29 = int_to_ptr.hbm [resolvable:$true] %s3695_s29 }
 0x188   : > { %v4509_v9 = vld [vmem:[#allocation7 + $0x60] sm:$0xff]  ;;  %s5339_s19 = sshra.s32 %s3696_s29, 4  ;;  %s5340_s19 = int_to_ptr.hbm [resolvable:$true] %s5339_s19 }
 0x189   : > { %1856 = vmatpush.bf16.xpose.msra.mxu1 %v4487_v38  ;;  %v4499_v6 = vld [vmem:[#allocation7 + $0x40] sm:$0xff]  ;;  %s5341_s24 = scalar_lea.hbm %s5340_s19, 1  ;;  %p5346_p9 = scmp.lt.s32.totalorder %s5340_s19, %s6704_s17 }
 0x18a   : > { %p5342_p5 = scmp.ne.s32.totalorder %s5340_s19, %s5341_s24  ;;  %p5347_p10 = scmp.lt.s32.totalorder %s5345_s5, %s5341_s24 }
 0x18b   : > { %1474 = vmatpush.bf16.msra.mxu0 %v4477_v29 }
 0x18c   : > { %1905 = vmatpush.bf16.xpose.msra.mxu2 %v4495_v1  ;;  %p5343_p6 = pnand %p5342_p5, %p5588_p3  ;;  %p5348_p11 = por %p5347_p10, %p5346_p9 }
 0x18e   : > { %p5344_p7 = pneg %p5343_p6 }
 0x18f   : > { %1475 = vmatpush.bf16.msra.mxu0 %v4476_v30 }
 0x190   : > { %p5349_p12 = pnand %p5348_p11, %p5344_p7 }
 0x191   : > { %1857 = vmatpush.bf16.xpose.msra.mxu1 %v4486_v4 }
 0x193   : > { %1476 = vmatpush.bf16.msra.mxu0 %v4475_v58 }
 0x194   : > { %1906 = vmatpush.bf16.xpose.msra.mxu2 %v4494_v5 }
 0x197   : > { %1477 = vmatpush.bf16.msra.mxu0 %v4474_v31 }
 0x199   : > { %1858 = vmatpush.bf16.xpose.msra.mxu1 %v4485_v7 }
 0x19b   : > { %1478 = vmatpush.bf16.msra.mxu0 %v4473_v59 }
 0x19c   : > { %1907 = vmatpush.bf16.xpose.msra.mxu2 %v4493_v8 }
 0x19e   : > { %1479 = vmatmul.bf16.vlgmr.msra.gmra.mxu0 %v4047_v32 }
 0x1a1   : > { %1859 = vmatpush.bf16.xpose.msra.mxu1 %v4484_v11 }
 0x1a4   : > { %1908 = vmatpush.bf16.xpose.msra.mxu2 %v4492_v39 }
 0x1a9   : > { %1860 = vmatpush.bf16.xpose.msra.mxu1 %v4483_v14 }
 0x1ac   : > { %1909 = vmatpush.bf16.xpose.msra.mxu2 %v4491_v40 }
 0x1ae   : > { %1484 = vmatmul.bf16.gmra.mxu0 %v4051_v33 }
 0x1b1   : > { %1861 = vmatpush.bf16.xpose.msra.mxu1 %v4482_v41 }
 0x1b4   : > { %1910 = vmatpush.bf16.xpose.msra.mxu2 %v4490_v42 }
 0x1b9   : > { %1862 = vmatpush.bf16.xpose.msra.mxu1 %v4481_v17 }
 0x1bc   : > { %1911 = vmatpush.bf16.xpose.msra.mxu2 %v4489_v43 }
 0x1be   : > { %1489 = vmatmul.bf16.gmra.mxu0 %v4055_v34 }
 0x1ce   : > { %1494 = vmatmul.bf16.gmra.mxu0 %v4059_v35 }
 0x1de   : > { %1499 = vmatmul.bf16.gmra.mxu0 %v4063_v2 }
 0x1ee   : > { %1504 = vmatmul.bf16.gmra.mxu0 %v4067_v10 }
 0x1fe   : > { %1509 = vmatmul.bf16.gmra.mxu0 %v4071_v13 }
 0x20e   : > { %1514 = vmatmul.bf16.gmra.mxu0 %v4075_v16 }
 0x21b   : > { %v1480_v44 = vpop.f32.mrf.mxu0 }
 0x21c   : > { %v1481_v19 = vadd.f32 %v5867_v45, %v1480_v44 }
 0x21e   : > { %v1520_v47 = vmul.f32 0.088388346, %v1481_v19 }
 0x223   : > { %v1482_v20 = vpop.f32.mrf.mxu0 }
 0x224   : > { %v1483_v46 = vadd.f32 %v5867_v45, %v1482_v20 }
 0x226   : > { %v1521_v48 = vmul.f32 0.088388346, %v1483_v46 }
 0x228   : > { %v4724_v49 = vpack.c.bf16 %v1521_v48, %v1520_v47 }
 0x22a   : > { %4725 = vst [vmem:[#allocation2 + $0x30] sm:$0xff] %v4724_v49  }
 0x22b   : > { %v1485_v50 = vpop.f32.mrf.mxu0 }
 0x22c   : > { %v1486_v22 = vadd.f32 %v5867_v45, %v1485_v50 }
 0x22e   : > { %v1522_v53 = vmul.f32 0.088388346, %v1486_v22  ;;  %v1705_v22 = vld [vmem:[%s1704_s26] sm:$0x3]  ;;  %s3693_s26 = sshll.u32 %s5758_s23, 4  ;;  %s3694_s26 = int_to_ptr.vmem [resolvable:$true] %s3693_s26 }
 0x231   : > { %v4513_v51 = vld [vmem:[#allocation2 + $0x30] sm:$0xff] }
 0x232   : > { %1863 = vmatmul.bf16.vlgmr.msra.gmra.mxu1 %v4513_v51  ;;  %1912 = vmatmul.bf16.vlgmr.msra.gmra.mxu2 %v4513_v51 }
 0x233   : > { %v1487_v23 = vpop.f32.mrf.mxu0 }
 0x234   : > { %v1488_v52 = vadd.f32 %v5867_v45, %v1487_v23 }
 0x236   : > { %v1523_v54 = vmul.f32 0.088388346, %v1488_v52  ;;  %v5891_v52 = vperm.slane %v1705_v22, 0 }
 0x238   : > { %v4729_v55 = vpack.c.bf16 %v1523_v54, %v1522_v53  ;;  %v5893_v53 = vperm.slane %v1705_v22, 1 }
 0x23a   : > { %4791 = vst [vmem:[#allocation2] sm:$0xff] %v4729_v55  }
 0x23b   : > { %v1490_v56 = vpop.f32.mrf.mxu0 }
 0x23c   : > { %v1491_v60 = vadd.f32 %v5867_v45, %v1490_v56 }
 0x23e   : > { %v1524_v63 = vmul.f32 0.088388346, %v1491_v60 }
 0x241   : > { %v4514_v57 = vld [vmem:[#allocation2] sm:$0xff] }
 0x242   : > { %1868 = vmatmul.bf16.gmra.mxu1 %v4514_v57  ;;  %1917 = vmatmul.bf16.gmra.mxu2 %v4514_v57 }
 0x243   : > { %v1492_v61 = vpop.f32.mrf.mxu0 }
 0x244   : > { %v1493_v62 = vadd.f32 %v5867_v45, %v1492_v61 }
 0x246   : > { %v1525_v24 = vmul.f32 0.088388346, %v1493_v62 }
 0x248   : > { %v4734_v25 = vpack.c.bf16 %v1525_v24, %v1524_v63 }
 0x24a   : > { %4792 = vst [vmem:[#allocation2 + $0x18] sm:$0xff] %v4734_v25  }
 0x24b   : > { %v1495_v26 = vpop.f32.mrf.mxu0 }
 0x24c   : > { %v1496_v28 = vadd.f32 %v5867_v45, %v1495_v26 }
 0x24e   : > { %v1526_v58 = vmul.f32 0.088388346, %v1496_v28 }
 0x251   : > { %v4515_v27 = vld [vmem:[#allocation2 + $0x18] sm:$0xff] }
 0x252   : > { %1873 = vmatmul.bf16.gmra.mxu1 %v4515_v27  ;;  %1922 = vmatmul.bf16.gmra.mxu2 %v4515_v27 }
 0x253   : > { %v1497_v29 = vpop.f32.mrf.mxu0 }
 0x254   : > { %v1498_v30 = vadd.f32 %v5867_v45, %v1497_v29 }
 0x256   : > { %v1527_v31 = vmul.f32 0.088388346, %v1498_v30 }
 0x258   : > { %v4739_v59 = vpack.c.bf16 %v1527_v31, %v1526_v58 }
 0x25a   : > { %4793 = vst [vmem:[#allocation2 + $0x10] sm:$0xff] %v4739_v59  }
 0x25b   : > { %v1500_v32 = vpop.f32.mrf.mxu0 }
 0x25c   : > { %v1501_v34 = vadd.f32 %v5867_v45, %v1500_v32 }
 0x25e   : > { %v1528_v37 = vmul.f32 0.088388346, %v1501_v34 }
 0x261   : > { %v4516_v33 = vld [vmem:[#allocation2 + $0x10] sm:$0xff] }
 0x262   : > { %1878 = vmatmul.bf16.gmra.mxu1 %v4516_v33  ;;  %1927 = vmatmul.bf16.gmra.mxu2 %v4516_v33 }
 0x263   : > { %v1502_v35 = vpop.f32.mrf.mxu0 }
 0x264   : > { %v1503_v36 = vadd.f32 %v5867_v45, %v1502_v35 }
 0x266   : > { %v1529_v38 = vmul.f32 0.088388346, %v1503_v36 }
 0x268   : > { %v4744_v1 = vpack.c.bf16 %v1529_v38, %v1528_v37 }
 0x26a   : > { %4794 = vst [vmem:[#allocation2 + $0x8] sm:$0xff] %v4744_v1  }
 0x26b   : > { %v1505_v2 = vpop.f32.mrf.mxu0 }
 0x26c   : > { %v1506_v5 = vadd.f32 %v5867_v45, %v1505_v2 }
 0x26e   : > { %v1530_v10 = vmul.f32 0.088388346, %v1506_v5 }
 0x271   : > { %v4517_v4 = vld [vmem:[#allocation2 + $0x8] sm:$0xff] }
 0x272   : > { %1883 = vmatmul.bf16.gmra.mxu1 %v4517_v4  ;;  %1932 = vmatmul.bf16.gmra.mxu2 %v4517_v4 }
 0x273   : > { %v1507_v7 = vpop.f32.mrf.mxu0 }
 0x274   : > { %v1508_v8 = vadd.f32 %v5867_v45, %v1507_v7 }
 0x276   : > { %v1531_v11 = vmul.f32 0.088388346, %v1508_v8 }
 0x278   : > { %v4749_v39 = vpack.c.bf16 %v1531_v11, %v1530_v10 }
 0x27a   : > { %4795 = vst [vmem:[#allocation2 + $0x20] sm:$0xff] %v4749_v39  }
 0x27b   : > { %v1510_v13 = vpop.f32.mrf.mxu0 }
 0x27c   : > { %v1511_v40 = vadd.f32 %v5867_v45, %v1510_v13 }
 0x27e   : > { %v1532_v16 = vmul.f32 0.088388346, %v1511_v40 }
 0x281   : > { %v4518_v14 = vld [vmem:[#allocation2 + $0x20] sm:$0xff] }
 0x282   : > { %1888 = vmatmul.bf16.gmra.mxu1 %v4518_v14  ;;  %1937 = vmatmul.bf16.gmra.mxu2 %v4518_v14 }
 0x283   : > { %v1512_v41 = vpop.f32.mrf.mxu0 }
 0x284   : > { %v1513_v42 = vadd.f32 %v5867_v45, %v1512_v41 }
 0x286   : > { %v1533_v17 = vmul.f32 0.088388346, %v1513_v42 }
 0x288   : > { %v4754_v43 = vpack.c.bf16 %v1533_v17, %v1532_v16 }
 0x28a   : > { %4796 = vst [vmem:[#allocation2 + $0x28] sm:$0xff] %v4754_v43  }
 0x28b   : > { %v1515_v44 = vpop.f32.mrf.mxu0 }
 0x28c   : > { %v1516_v20 = vadd.f32 %v5867_v45, %v1515_v44 }
 0x28e   : > { %v1534_v48 = vmul.f32 0.088388346, %v1516_v20 }
 0x291   : > { %v4519_v19 = vld [vmem:[#allocation2 + $0x28] sm:$0xff] }
 0x292   : > { %1893 = vmatmul.bf16.gmra.mxu1 %v4519_v19  ;;  %1942 = vmatmul.bf16.gmra.mxu2 %v4519_v19 }
 0x293   : > { %v1517_v46 = vpop.f32.mrf.mxu0 }
 0x294   : > { %v1518_v47 = vadd.f32 %v5867_v45, %v1517_v46 }
 0x296   : > { %v1535_v49 = vmul.f32 0.088388346, %v1518_v47 }
 0x298   : > { %v4759_v50 = vpack.c.bf16 %v1535_v49, %v1534_v48 }
 0x29a   : > { %4797 = vst [vmem:[#allocation2 + $0x38] sm:$0xff] %v4759_v50  }
 0x2a1   : > { %v4520_v51 = vld [vmem:[#allocation2 + $0x38] sm:$0xff] }
 0x2a2   : > { %1898 = vmatmul.bf16.gmra.mxu1 %v4520_v51  ;;  %1947 = vmatmul.bf16.gmra.mxu2 %v4520_v51 }
 0x2af   : > { %v1864_v23 = vpop.f32.mrf.mxu1 }
 0x2b0   : > { %v5896_v54 = vadd.f32 %v1864_v23, %v5891_v52  ;;  %v5448_v23 = vmov -inf  }
 0x2b1   : > { %1569 = vst.msk [vmem:[#allocation3] sm:$0xff] %vm1568_vm0, %v5448_v23 }
 0x2b2   : > { %1570 = vst.msk [vmem:[#allocation3 + $0x8] sm:$0xff] %vm1568_vm0, %v5448_v23 }
 0x2b3   : > { %1571 = vst.msk [vmem:[#allocation3 + $0x10] sm:$0xff] %vm1568_vm0, %v5448_v23 }
 0x2b4   : > { %1572 = vst.msk [vmem:[#allocation3 + $0x18] sm:$0xff] %vm1568_vm0, %v5448_v23 }
 0x2b5   : > { %v1913_v45 = vpop.f32.mrf.mxu2  ;;  %1573 = vst.msk [vmem:[#allocation3 + $0x20] sm:$0xff] %vm1568_vm0, %v5448_v23 }
 0x2b6   : > { %v5899_v55 = vadd.f32 %v1913_v45, %v5893_v53  ;;  %1574 = vst.msk [vmem:[#allocation3 + $0x28] sm:$0xff] %vm1568_vm0, %v5448_v23 }
 0x2b7   : > { %v1866_v56 = vpop.f32.mrf.mxu1  ;;  %1575 = vst.msk [vmem:[#allocation3 + $0x30] sm:$0xff] %vm1568_vm0, %v5448_v23 }
 0x2b8   : > { %v1969_v57 = vmax.f32 %v5896_v54, %v5899_v55  ;;  %v5904_v61 = vadd.f32 %v1866_v56, %v5891_v52  ;;  %1576 = vst.msk [vmem:[#allocation3 + $0x38] sm:$0xff] %vm1568_vm0, %v5448_v23 }
 0x2b9   : > { %1577 = vst.msk [vmem:[#allocation3 + $0x40] sm:$0xff] %vm1568_vm0, %v5448_v23 }
 0x2ba   : > { %1970 = vmax.xlane.f32.xlu0 %v1969_v57  ;;  %1578 = vst.msk [vmem:[#allocation3 + $0x48] sm:$0xff] %vm1568_vm0, %v5448_v23 }
 0x2bb   : > { %1579 = vst.msk [vmem:[#allocation3 + $0x50] sm:$0xff] %vm1568_vm0, %v5448_v23 }
 0x2bc   : > { %1580 = vst.msk [vmem:[#allocation3 + $0x58] sm:$0xff] %vm1568_vm0, %v5448_v23 }
 0x2bd   : > { %v1915_v60 = vpop.f32.mrf.mxu2  ;;  %1581 = vst.msk [vmem:[#allocation3 + $0x60] sm:$0xff] %vm1568_vm0, %v5448_v23 }
 0x2be   : > { %v5907_v62 = vadd.f32 %v1915_v60, %v5893_v53  ;;  %1582 = vst.msk [vmem:[#allocation3 + $0x68] sm:$0xff] %vm1568_vm0, %v5448_v23 }
 0x2bf   : > { %v1869_v63 = vpop.f32.mrf.mxu1  ;;  %1583 = vst.msk [vmem:[#allocation3 + $0x70] sm:$0xff] %vm1568_vm0, %v5448_v23 }
 0x2c0   : > { %v1972_v24 = vmax.f32 %v5904_v61, %v5907_v62  ;;  %v5912_v26 = vadd.f32 %v1869_v63, %v5891_v52  ;;  %1584 = vst.msk [vmem:[#allocation3 + $0x78] sm:$0xff] %vm1568_vm0, %v5448_v23 }
 0x2c2   : > { %1973 = vmax.xlane.f32.xlu0 %v1972_v24 }
 0x2c4   : > { %v6151_v15 = vld [vmem:[#allocation3 + $0x60] sm:$0xff] }
 0x2c5   : > { %v1918_v25 = vpop.f32.mrf.mxu2  ;;  %6659 = vst [vmem:[#allocation48_spill] sm:$0xff] %v6151_v15 }
 0x2c6   : > { %v5915_v27 = vadd.f32 %v1918_v25, %v5893_v53 }
 0x2c7   : > { %v1871_v28 = vpop.f32.mrf.mxu1 }
 0x2c8   : > { %v1975_v29 = vmax.f32 %v5912_v26, %v5915_v27  ;;  %v5920_v58 = vadd.f32 %v1871_v28, %v5891_v52 }
 0x2ca   : > { %1976 = vmax.xlane.f32.xlu1 %v1975_v29  ;;  %v5449_v29 = vmov 0  }
 0x2cb   : > { %4981 = vset.pattern.permute.xlu0 %v5449_v29  ;;  %4982 = vset.pattern.permute.xlu1 %v5449_v29 }
 0x2cc   : > { %4983 = vset.pattern.permute.xlu2 %v5449_v29 }
 0x2cd   : > { %v1920_v30 = vpop.f32.mrf.mxu2 }
 0x2ce   : > { %v5923_v31 = vadd.f32 %v1920_v30, %v5893_v53 }
 0x2cf   : > { %v1874_v59 = vpop.f32.mrf.mxu1 }
 0x2d0   : > { %v1978_v32 = vmax.f32 %v5920_v58, %v5923_v31  ;;  %v5928_v34 = vadd.f32 %v1874_v59, %v5891_v52 }
 0x2d2   : > { %1979 = vmax.xlane.f32.xlu1 %v1978_v32  ;;  %v5450_v32 = vmov 0.0  }
 0x2d3   : > { %1585 = vst.msk [vmem:[#allocation4] sm:$0xff] %vm1568_vm0, %v5450_v32 }
 0x2d4   : > { %1586 = vst.msk [vmem:[#allocation4 + $0x8] sm:$0xff] %vm1568_vm0, %v5450_v32 }
 0x2d5   : > { %v1923_v33 = vpop.f32.mrf.mxu2  ;;  %1587 = vst.msk [vmem:[#allocation4 + $0x10] sm:$0xff] %vm1568_vm0, %v5450_v32 }
 0x2d6   : > { %v5931_v35 = vadd.f32 %v1923_v33, %v5893_v53  ;;  %1588 = vst.msk [vmem:[#allocation4 + $0x18] sm:$0xff] %vm1568_vm0, %v5450_v32 }
 0x2d7   : > { %v1876_v36 = vpop.f32.mrf.mxu1  ;;  %1589 = vst.msk [vmem:[#allocation4 + $0x20] sm:$0xff] %vm1568_vm0, %v5450_v32 }
 0x2d8   : > { %v1981_v37 = vmax.f32 %v5928_v34, %v5931_v35  ;;  %v5936_v1 = vadd.f32 %v1876_v36, %v5891_v52  ;;  %1590 = vst.msk [vmem:[#allocation4 + $0x28] sm:$0xff] %vm1568_vm0, %v5450_v32 }
 0x2d9   : > { %1591 = vst.msk [vmem:[#allocation4 + $0x30] sm:$0xff] %vm1568_vm0, %v5450_v32 }
 0x2da   : > { %1982 = vmax.xlane.f32.xlu2 %v1981_v37  ;;  %1592 = vst.msk [vmem:[#allocation4 + $0x38] sm:$0xff] %vm1568_vm0, %v5450_v32 }
 0x2db   : > { %1593 = vst.msk [vmem:[#allocation4 + $0x40] sm:$0xff] %vm1568_vm0, %v5450_v32 }
 0x2dc   : > { %1594 = vst.msk [vmem:[#allocation4 + $0x48] sm:$0xff] %vm1568_vm0, %v5450_v32 }
 0x2dd   : > { %v1925_v38 = vpop.f32.mrf.mxu2  ;;  %1595 = vst.msk [vmem:[#allocation4 + $0x50] sm:$0xff] %vm1568_vm0, %v5450_v32 }
 0x2de   : > { %v5939_v2 = vadd.f32 %v1925_v38, %v5893_v53  ;;  %1596 = vst.msk [vmem:[#allocation4 + $0x58] sm:$0xff] %vm1568_vm0, %v5450_v32 }
 0x2df   : > { %v1879_v4 = vpop.f32.mrf.mxu1  ;;  %1597 = vst.msk [vmem:[#allocation4 + $0x60] sm:$0xff] %vm1568_vm0, %v5450_v32 }
 0x2e0   : > { %v1984_v5 = vmax.f32 %v5936_v1, %v5939_v2  ;;  %v5944_v8 = vadd.f32 %v1879_v4, %v5891_v52  ;;  %1598 = vst.msk [vmem:[#allocation4 + $0x68] sm:$0xff] %vm1568_vm0, %v5450_v32 }
 0x2e1   : > { %1599 = vst.msk [vmem:[#allocation4 + $0x70] sm:$0xff] %vm1568_vm0, %v5450_v32 }
 0x2e2   : > { %1985 = vmax.xlane.f32.xlu2 %v1984_v5  ;;  %1600 = vst.msk [vmem:[#allocation4 + $0x78] sm:$0xff] %vm1568_vm0, %v5450_v32  ;;  %v1956_v32 = vld [vmem:[#allocation3 + $0x18] sm:$0xff] }
 0x2e5   : > { %v1928_v7 = vpop.f32.mrf.mxu2 }
 0x2e6   : > { %v5947_v10 = vadd.f32 %v1928_v7, %v5893_v53 }
 0x2e7   : > { %v1881_v11 = vpop.f32.mrf.mxu1 }
 0x2e8   : > { %v1987_v39 = vmax.f32 %v5944_v8, %v5947_v10  ;;  %v5952_v14 = vadd.f32 %v1881_v11, %v5891_v52 }
 0x2ea   : > { %1988 = vmax.xlane.f32.xlu2 %v1987_v39 }
 0x2ed   : > { %v1930_v13 = vpop.f32.mrf.mxu2 }
 0x2ee   : > { %v5955_v40 = vadd.f32 %v1930_v13, %v5893_v53 }
 0x2ef   : > { %v1884_v41 = vpop.f32.mrf.mxu1 }
 0x2f0   : > { %v1990_v42 = vmax.f32 %v5952_v14, %v5955_v40  ;;  %v5960_v17 = vadd.f32 %v1884_v41, %v5891_v52 }
 0x2f2   : > { %1991 = vmax.xlane.f32.xlu2 %v1990_v42 }
 0x2f5   : > { %v1933_v16 = vpop.f32.mrf.mxu2 }
 0x2f6   : > { %v5963_v43 = vadd.f32 %v1933_v16, %v5893_v53  ;;  %v6047_v16 = vld [vmem:[#allocation3] sm:$0xff] }
 0x2f7   : > { %v1886_v44 = vpop.f32.mrf.mxu1 }
 0x2f8   : > { %v1993_v19 = vmax.f32 %v5960_v17, %v5963_v43  ;;  %v5968_v46 = vadd.f32 %v1886_v44, %v5891_v52 }
 0x2fa   : > { %1994 = vmax.xlane.f32.xlu1 %v1993_v19 }
 0x2fd   : > { %v1935_v20 = vpop.f32.mrf.mxu2 }
 0x2fe   : > { %v5971_v47 = vadd.f32 %v1935_v20, %v5893_v53 }
 0x2ff   : > { %v1889_v48 = vpop.f32.mrf.mxu1 }
 0x300   : > { %v1996_v49 = vmax.f32 %v5968_v46, %v5971_v47  ;;  %v5976_v51 = vadd.f32 %v1889_v48, %v5891_v52 }
 0x302   : > { %1997 = vmax.xlane.f32.xlu0 %v1996_v49 }
 0x305   : > { %v1938_v50 = vpop.f32.mrf.mxu2 }
 0x306   : > { %v5979_v22 = vadd.f32 %v1938_v50, %v5893_v53 }
 0x307   : > { %v1891_v45 = vpop.f32.mrf.mxu1 }
 0x308   : > { %v1999_v56 = vmax.f32 %v5976_v51, %v5979_v22  ;;  %v5992_v60 = vadd.f32 %v1891_v45, %v5891_v52  ;;  %v1954_v45 = vld [vmem:[#allocation3 + $0x8] sm:$0xff] }
 0x30a   : > { %2000 = vmax.xlane.f32.xlu2 %v1999_v56 }
 0x30d   : > { %v1940_v57 = vpop.f32.mrf.mxu2 }
 0x30e   : > { %v5995_v63 = vadd.f32 %v1940_v57, %v5893_v53 }
 0x30f   : > { %v1894_v24 = vpop.f32.mrf.mxu1 }
 0x310   : > { %v2002_v25 = vmax.f32 %v5992_v60, %v5995_v63  ;;  %v6008_v30 = vadd.f32 %v1894_v24, %v5891_v52 }
 0x312   : > { %2003 = vmax.xlane.f32.xlu1 %v2002_v25 }
 0x315   : > { %v1943_v28 = vpop.f32.mrf.mxu2 }
 0x316   : > { %v6011_v59 = vadd.f32 %v1943_v28, %v5893_v53 }
 0x317   : > { %v1896_v33 = vpop.f32.mrf.mxu1 }
 0x318   : > { %v2005_v36 = vmax.f32 %v6008_v30, %v6011_v59  ;;  %v6024_v38 = vadd.f32 %v1896_v33, %v5891_v52 }
 0x31a   : > { %2006 = vmax.xlane.f32.xlu2 %v2005_v36 }
 0x31d   : > { %v1945_v37 = vpop.f32.mrf.mxu2 }
 0x31e   : > { %v6027_v4 = vadd.f32 %v1945_v37, %v5893_v53 }
 0x31f   : > { %v1899_v7 = vpop.f32.mrf.mxu1 }
 0x320   : > { %v2008_v5 = vmax.f32 %v6024_v38, %v6027_v4  ;;  %v6040_v39 = vadd.f32 %v1899_v7, %v5891_v52  ;;  %v1957_v7 = vld [vmem:[#allocation3 + $0x20] sm:$0xff] }
 0x322   : > { %2009 = vmax.xlane.f32.xlu0 %v2008_v5 }
 0x325   : > { %v1948_v11 = vpop.f32.mrf.mxu2 }
 0x326   : > { %v6043_v13 = vadd.f32 %v1948_v11, %v5893_v53 }
 0x327   : > { %v1901_v42 = vpop.f32.mrf.mxu1 }
 0x328   : > { %v2011_v41 = vmax.f32 %v6040_v39, %v6043_v13  ;;  %v6050_v20 = vadd.f32 %v1901_v42, %v5891_v52 }
 0x32a   : > { %2012 = vmax.xlane.f32.xlu1 %v2011_v41 }
 0x32d   : > { %v1950_v44 = vpop.f32.mrf.mxu2  ;;  %v1971_v19 = vpop.xlane.xlu0 %1970 }
 0x32e   : > { %v6053_v48 = vadd.f32 %v1950_v44, %v5893_v53  ;;  %v6056_v49 = vmax.f32 %v6047_v16, %v1971_v19  ;;  %v1955_v53 = vld [vmem:[#allocation3 + $0x10] sm:$0xff] }
 0x330   : > { %2724 = vst.msk [vmem:[#allocation3] sm:$0xff] %vm1568_vm0, %v6056_v49  ;;  %v2014_v23 = vmax.f32 %v6050_v20, %v6053_v48 }
 0x332   : > { %2015 = vmax.xlane.f32.xlu2 %v2014_v23 }
 0x335   : > { %v1974_v56 = vpop.xlane.xlu0 %1973 }
 0x336   : > { %v2018_v52 = vmax.f32 %v1954_v45, %v1974_v56  ;;  %2083 = vperm.xlu0 %4981, %v6056_v49  }
 0x338   : > { %2725 = vst.msk [vmem:[#allocation3 + $0x8] sm:$0xff] %vm1568_vm0, %v2018_v52  ;;  %v2034_v57 = vsub.f32 %v1954_v45, %v2018_v52  ;;  %v6075_v45 = vld [vmem:[#allocation3 + $0x28] sm:$0xff] }
 0x33a   : > { %v2051_v28 = vmul.f32 1.442695, %v2034_v57  ;;  %v6141_v57 = vld [vmem:[#allocation3 + $0x58] sm:$0xff] }
 0x33b   : > { %6657 = vst [vmem:[#allocation46_spill] sm:$0xff] %v6141_v57 }
 0x33c   : > { %4987 = vpow2.f32 %v2051_v28 }
 0x33d   : > { %v1977_v24 = vpop.xlane.xlu1 %1976 }
 0x33e   : > { %v2019_v25 = vmax.f32 %v1955_v53, %v1977_v24 }
 0x340   : > { %2726 = vst.msk [vmem:[#allocation3 + $0x10] sm:$0xff] %vm1568_vm0, %v2019_v25  ;;  %v2035_v29 = vsub.f32 %v1955_v53, %v2019_v25 }
 0x342   : > { %v2053_v37 = vmul.f32 1.442695, %v2035_v29  ;;  %v6068_v5 = vpop.eup %4987 }
 0x343   : > { %2088 = vperm.xlu1 %4982, %v2018_v52  }
 0x344   : > { %4989 = vpow2.f32 %v2053_v37 }
 0x345   : > { %v1980_v33 = vpop.xlane.xlu1 %1979 }
 0x346   : > { %v2020_v36 = vmax.f32 %v1956_v32, %v1980_v33 }
 0x348   : > { %2727 = vst.msk [vmem:[#allocation3 + $0x18] sm:$0xff] %vm1568_vm0, %v2020_v36  ;;  %v2036_v23 = vsub.f32 %v1956_v32, %v2020_v36  ;;  %v4501_v32 = vld [vmem:[#allocation7 + $0x8] sm:$0xff] }
 0x34a   : > { %2093 = vperm.xlu2 %4983, %v2019_v25   ;;  %v6072_v44 = vpop.eup %4989  ;;  %v2055_v53 = vmul.f32 1.442695, %v2036_v23  ;;  %v6087_v25 = vld [vmem:[#allocation3 + $0x30] sm:$0xff] }
 0x34b   : > { %2393 = vperm.xlu1 %4982, %v6068_v5  }
 0x34d   : > { %v1983_v11 = vpop.xlane.xlu2 %1982 }
 0x34e   : > { %v2021_v41 = vmax.f32 %v1957_v7, %v1983_v11 }
 0x350   : > { %v2037_v42 = vsub.f32 %v1957_v7, %v2021_v41  ;;  %2728 = vst.msk [vmem:[#allocation3 + $0x20] sm:$0xff] %vm1568_vm0, %v2021_v41 }
 0x352   : > { %v2057_v19 = vmul.f32 1.442695, %v2037_v42  ;;  %2398 = vperm.xlu2 %4983, %v6072_v44  }
 0x353   : > { %2098 = vperm.xlu1 %4982, %v2020_v36   ;;  %v6100_v36 = vld [vmem:[#allocation3 + $0x38] sm:$0xff] }
 0x354   : > { %4991 = vpow2.f32 %v2057_v19 }
 0x355   : > { %v1986_v56 = vpop.xlane.xlu2 %1985  ;;  %4993 = vpow2.f32 %v2055_v53 }
 0x356   : > { %v6078_v52 = vmax.f32 %v6075_v45, %v1986_v56  ;;  %v6121_v56 = vld [vmem:[#allocation3 + $0x48] sm:$0xff] }
 0x358   : > { %2729 = vst.msk [vmem:[#allocation3 + $0x28] sm:$0xff] %vm1568_vm0, %v6078_v52 }
 0x35a   : > { %v6084_v24 = vpop.eup %4991  ;;  %2103 = vperm.xlu2 %4983, %v2021_v41   ;;  %v6111_v41 = vld [vmem:[#allocation3 + $0x40] sm:$0xff] }
 0x35b   : > { %2408 = vperm.xlu1 %4982, %v6084_v24   ;;  %v6097_v33 = vpop.eup %4993 }
 0x35d   : > { %v1989_v28 = vpop.xlane.xlu2 %1988 }
 0x35e   : > { %v6090_v29 = vmax.f32 %v6087_v25, %v1989_v28 }
 0x360   : > { %2730 = vst.msk [vmem:[#allocation3 + $0x30] sm:$0xff] %vm1568_vm0, %v6090_v29  ;;  %2113 = vperm.xlu0 %4981, %v6090_v29  }
 0x362   : > { %2403 = vperm.xlu2 %4983, %v6097_v33  }
 0x365   : > { %v1992_v37 = vpop.xlane.xlu2 %1991 }
 0x366   : > { %v6103_v7 = vmax.f32 %v6100_v36, %v1992_v37  ;;  %v4512_v37 = vld [vmem:[#allocation7 + $0x48] sm:$0xff] }
 0x367   : > { %2643 = vmatpush.bf16.msrb.mxu0 %v4512_v37  ;;  %4822 = vmatpush.bf16.msrb.mxu1 %v4512_v37  ;;  %v4502_v37 = vld [vmem:[#allocation7 + $0x28] sm:$0xff] }
 0x368   : > { %2731 = vst.msk [vmem:[#allocation3 + $0x38] sm:$0xff] %vm1568_vm0, %v6103_v7  ;;  %2118 = vperm.xlu1 %4982, %v6103_v7  }
 0x36a   : > { %2108 = vperm.xlu2 %4983, %v6078_v52  }
 0x36b   : > { %2644 = vmatpush.bf16.msrb.mxu0 %v4511_v18  ;;  %4823 = vmatpush.bf16.msrb.mxu1 %v4511_v18  ;;  %v6161_v18 = vld [vmem:[#allocation3 + $0x68] sm:$0xff] }
 0x36c   : > { %6661 = vst [vmem:[#allocation50_spill] sm:$0xff] %v6161_v18 }
 0x36d   : > { %v1995_v42 = vpop.xlane.xlu1 %1994 }
 0x36e   : > { %v6114_v19 = vmax.f32 %v6111_v41, %v1995_v42  ;;  %v6131_v42 = vld [vmem:[#allocation3 + $0x50] sm:$0xff] }
 0x36f   : > { %6655 = vst [vmem:[#allocation44_spill] sm:$0xff] %v6131_v42 }
 0x370   : > { %2732 = vst.msk [vmem:[#allocation3 + $0x40] sm:$0xff] %vm1568_vm0, %v6114_v19 }
 0x372   : > { %2123 = vperm.xlu2 %4983, %v6114_v19  }
 0x375   : > { %v1998_v53 = vpop.xlane.xlu0 %1997 }
 0x376   : > { %v6124_v28 = vmax.f32 %v6121_v56, %v1998_v53  ;;  %v4504_v53 = vld [vmem:[#allocation7 + $0x20] sm:$0xff] }
 0x377   : > { %2594 = vmatpush.bf16.msrb.mxu2 %v4504_v53  ;;  %4814 = vmatpush.bf16.msra.mxu3 %v4504_v53  ;;  %v4510_v53 = vld [vmem:[#allocation7 + $0x10] sm:$0xff] }
 0x378   : > { %2733 = vst.msk [vmem:[#allocation3 + $0x48] sm:$0xff] %vm1568_vm0, %v6124_v28  ;;  %2128 = vperm.xlu1 %4982, %v6124_v28   ;;  %2645 = vmatpush.bf16.msrb.mxu0 %v4510_v53 }
 0x379   : > { %4824 = vmatpush.bf16.msrb.mxu1 %v4510_v53 }
 0x37b   : > { %2595 = vmatpush.bf16.msrb.mxu2 %v4503_v21  ;;  %4815 = vmatpush.bf16.msra.mxu3 %v4503_v21  ;;  %v4500_v21 = vld [vmem:[#allocation7 + $0x58] sm:$0xff] }
 0x37c   : > { %2646 = vmatpush.bf16.msrb.mxu0 %v4509_v9 }
 0x37d   : > { %v2001_v23 = vpop.xlane.xlu2 %2000  ;;  %4825 = vmatpush.bf16.msrb.mxu1 %v4509_v9  ;;  %v6171_v9 = vld [vmem:[#allocation3 + $0x70] sm:$0xff] }
 0x37e   : > { %v6134_v11 = vmax.f32 %v6131_v42, %v2001_v23  ;;  %6663 = vst [vmem:[#allocation52_spill] sm:$0xff] %v6171_v9 }
 0x37f   : > { %2596 = vmatpush.bf16.msrb.mxu2 %v4502_v37  ;;  %4816 = vmatpush.bf16.msra.mxu3 %v4502_v37 }
 0x380   : > { %6656 = vst [vmem:[#allocation45_spill] sm:$0xff] %v6134_v11  ;;  %2133 = vperm.xlu0 %4981, %v6134_v11  }
 0x381   : > { %2734 = vst.msk [vmem:[#allocation3 + $0x50] sm:$0xff] %vm1568_vm0, %v6134_v11 }
 0x383   : > { %2597 = vmatpush.bf16.msrb.mxu2 %v4501_v32  ;;  %4817 = vmatpush.bf16.msra.mxu3 %v4501_v32  ;;  %v4498_v32 = vld [vmem:[#allocation7] sm:$0xff] }
 0x385   : > { %v2004_v50 = vpop.xlane.xlu1 %2003 }
 0x386   : > { %v6144_v23 = vmax.f32 %v6141_v57, %v2004_v50 }
 0x387   : > { %2598 = vmatpush.bf16.msrb.mxu2 %v4500_v21  ;;  %4818 = vmatpush.bf16.msra.mxu3 %v4500_v21 }
 0x388   : > { %6658 = vst [vmem:[#allocation47_spill] sm:$0xff] %v6144_v23  ;;  %2138 = vperm.xlu1 %4982, %v6144_v23  }
 0x389   : > { %2735 = vst.msk [vmem:[#allocation3 + $0x58] sm:$0xff] %vm1568_vm0, %v6144_v23 }
 0x38b   : > { %2599 = vmatpush.bf16.msrb.mxu2 %v4499_v6  ;;  %4819 = vmatpush.bf16.msra.mxu3 %v4499_v6 }
 0x38d   : > { %v2007_v50 = vpop.xlane.xlu2 %2006 }
 0x38e   : > { %v6154_v12 = vmax.f32 %v6151_v15, %v2007_v50  ;;  %v4508_v50 = vld [vmem:[#allocation7 + $0x70] sm:$0xff] }
 0x38f   : > { %2647 = vmatpush.bf16.msrb.mxu0 %v4508_v50  ;;  %4826 = vmatpush.bf16.msrb.mxu1 %v4508_v50 }
 0x390   : > { %6660 = vst [vmem:[#allocation49_spill] sm:$0xff] %v6154_v12  ;;  %2143 = vperm.xlu0 %4981, %v6154_v12   ;;  %2600 = vmatpush.bf16.msrb.mxu2 %v4498_v32 }
 0x391   : > { %2736 = vst.msk [vmem:[#allocation3 + $0x60] sm:$0xff] %vm1568_vm0, %v6154_v12  ;;  %4820 = vmatpush.bf16.msra.mxu3 %v4498_v32  ;;  %v4505_v12 = vld [vmem:[#allocation7 + $0x78] sm:$0xff] }
 0x393   : > { %2648 = vmatpush.bf16.msrb.mxu0 %v4507_v3  ;;  %4827 = vmatpush.bf16.msrb.mxu1 %v4507_v3  ;;  %v6181_v3 = vld [vmem:[#allocation3 + $0x78] sm:$0xff] }
 0x394   : > { %2601 = vmatpush.bf16.msrb.mxu2 %v4497_v0  ;;  %6665 = vst [vmem:[#allocation54_spill] sm:$0xff] %v6181_v3 }
 0x395   : > { %v2010_v37 = vpop.xlane.xlu0 %2009  ;;  %4821 = vmatpush.bf16.msra.mxu3 %v4497_v0 }
 0x396   : > { %v6164_v53 = vmax.f32 %v6161_v18, %v2010_v37  ;;  %v4506_v37 = vld [vmem:[#allocation7 + $0x50] sm:$0xff] }
 0x397   : > { %2649 = vmatpush.bf16.msrb.mxu0 %v4506_v37  ;;  %4828 = vmatpush.bf16.msrb.mxu1 %v4506_v37 }
 0x398   : > { %6662 = vst [vmem:[#allocation51_spill] sm:$0xff] %v6164_v53  ;;  %2148 = vperm.xlu2 %4983, %v6164_v53  }
 0x399   : > { %2737 = vst.msk [vmem:[#allocation3 + $0x68] sm:$0xff] %vm1568_vm0, %v6164_v53 }
 0x39b   : > { %2650 = vmatpush.bf16.msrb.mxu0 %v4505_v12  ;;  %4829 = vmatpush.bf16.msrb.mxu1 %v4505_v12 }
 0x39d   : > { %v2013_v21 = vpop.xlane.xlu1 %2012 }
 0x39e   : > { %v6174_v50 = vmax.f32 %v6171_v9, %v2013_v21 }
 0x3a0   : > { %6664 = vst [vmem:[#allocation53_spill] sm:$0xff] %v6174_v50  ;;  %2153 = vperm.xlu2 %4983, %v6174_v50  }
 0x3a1   : > { %2738 = vst.msk [vmem:[#allocation3 + $0x70] sm:$0xff] %vm1568_vm0, %v6174_v50 }
 0x3a5   : > { %v2016_v6 = vpop.xlane.xlu2 %2015 }
 0x3a6   : > { %v6184_v32 = vmax.f32 %v6181_v3, %v2016_v6 }
 0x3a8   : > { %6666 = vst [vmem:[#allocation55_spill] sm:$0xff] %v6184_v32  ;;  %2158 = vperm.xlu2 %4983, %v6184_v32   ;;  %v2084_v21 = vpop.permute.xlu0 %2083 }
 0x3a9   : > { %2739 = vst.msk [vmem:[#allocation3 + $0x78] sm:$0xff] %vm1568_vm0, %v6184_v32  ;;  %v2161_v15 = vsub.f32 %v5896_v54, %v2084_v21  ;;  %v2162_v0 = vsub.f32 %v5899_v55, %v2084_v21 }
 0x3ab   : > { %v2193_v12 = vmul.f32 1.442695, %v2161_v15  ;;  %v2195_v50 = vmul.f32 1.442695, %v2162_v0 }
 0x3ad   : > { %v2094_v9 = vpop.permute.xlu2 %2093  ;;  %4995 = vpow2.f32 %v2193_v12 }
 0x3ae   : > { %4997 = vpow2.f32 %v2195_v50  ;;  %v2165_v15 = vsub.f32 %v5912_v26, %v2094_v9  ;;  %v2166_v50 = vsub.f32 %v5915_v27, %v2094_v9 }
 0x3b0   : > { %v2201_v12 = vmul.f32 1.442695, %v2165_v15 }
 0x3b3   : > { %v4996_v6 = vpop.eup %4995 }
 0x3b4   : > { %v4998_v53 = vpop.eup %4997 }
 0x3b5   : > { %v6193_v18 = vpop.permute.xlu2 %2398  ;;  %v2089_v37 = vpop.permute.xlu1 %2088  ;;  %v2289_v11 = vadd.f32 %v4998_v53, %v4996_v6 }
 0x3b6   : > { %6667 = vst [vmem:[#allocation56_spill] sm:$0xff] %v6193_v18  ;;  %v2163_v3 = vsub.f32 %v5904_v61, %v2089_v37  ;;  %v2164_v23 = vsub.f32 %v5907_v62, %v2089_v37  ;;  %v2203_v61 = vmul.f32 1.442695, %v2166_v50 }
 0x3b8   : > { %v2197_v32 = vmul.f32 1.442695, %v2163_v3  ;;  %v2199_v57 = vmul.f32 1.442695, %v2164_v23 }
 0x3ba   : > { %4999 = vpow2.f32 %v2197_v32  ;;  %2290 = vadd.xlane.f32.xlu0 %v2289_v11 }
 0x3bb   : > { %5001 = vpow2.f32 %v2199_v57 }
 0x3bc   : > { %5003 = vpow2.f32 %v2201_v12 }
 0x3bd   : > { %v2104_v54 = vpop.permute.xlu2 %2103  ;;  %v6198_v55 = vpop.permute.xlu1 %2393  ;;  %5005 = vpow2.f32 %v2203_v61 }
 0x3be   : > { %v2169_v27 = vsub.f32 %v5928_v34, %v2104_v54  ;;  %v2170_v32 = vsub.f32 %v5931_v35, %v2104_v54 }
 0x3c0   : > { %v5000_v21 = vpop.eup %4999  ;;  %v2211_v37 = vmul.f32 1.442695, %v2170_v32 }
 0x3c1   : > { %v5002_v0 = vpop.eup %5001  ;;  %v2482_v18 = vpack.c.bf16 %v5000_v21, %v4996_v6 }
 0x3c2   : > { %v2292_v42 = vadd.f32 %v5002_v0, %v5000_v21  ;;  %v2483_v62 = vpack.c.bf16 %v5002_v0, %v4998_v53  ;;  %v5004_v53 = vpop.eup %5003 }
 0x3c3   : > { %2602 = vmatmul.bf16.vlgmr.msrb.gmra.mxu2 %v2482_v18  ;;  %v2209_v18 = vmul.f32 1.442695, %v2169_v27 }
 0x3c4   : > { %2293 = vadd.xlane.f32.xlu1 %v2292_v42  ;;  %2651 = vmatmul.bf16.vlgmr.msrb.gmra.mxu0 %v2483_v62  ;;  %v5006_v42 = vpop.eup %5005 }
 0x3c5   : > { %v6201_v11 = vpop.permute.xlu2 %2403  ;;  %v2099_v57 = vpop.permute.xlu1 %2098 }
 0x3c6   : > { %v2167_v26 = vsub.f32 %v5920_v58, %v2099_v57  ;;  %v2168_v23 = vsub.f32 %v5923_v31, %v2099_v57  ;;  %v2295_v58 = vadd.f32 %v5006_v42, %v5004_v53 }
 0x3c8   : > { %v2205_v9 = vmul.f32 1.442695, %v2167_v26  ;;  %v2207_v3 = vmul.f32 1.442695, %v2168_v23 }
 0x3ca   : > { %5007 = vpow2.f32 %v2205_v9 }
 0x3cb   : > { %5009 = vpow2.f32 %v2207_v3 }
 0x3cc   : > { %5011 = vpow2.f32 %v2209_v18 }
 0x3cd   : > { %v2109_v6 = vpop.permute.xlu2 %2108  ;;  %5013 = vpow2.f32 %v2211_v37  ;;  %v6209_v54 = vpop.permute.xlu1 %2408 }
 0x3ce   : > { %v2171_v15 = vsub.f32 %v5936_v1, %v2109_v6  ;;  %v2172_v50 = vsub.f32 %v5939_v2, %v2109_v6 }
 0x3d0   : > { %v5008_v21 = vpop.eup %5007  ;;  %v2213_v31 = vmul.f32 1.442695, %v2171_v15  ;;  %v2215_v34 = vmul.f32 1.442695, %v2172_v50 }
 0x3d1   : > { %v5010_v0 = vpop.eup %5009  ;;  %2296 = vadd.xlane.f32.xlu2 %v2295_v58  ;;  %v2484_v35 = vpack.c.bf16 %v5008_v21, %v5004_v53 }
 0x3d2   : > { %5015 = vpow2.f32 %v2213_v31  ;;  %v2114_v12 = vpop.permute.xlu0 %2113  ;;  %v2485_v61 = vpack.c.bf16 %v5010_v0, %v5006_v42  ;;  %v2298_v62 = vadd.f32 %v5010_v0, %v5008_v21  ;;  %v5012_v27 = vpop.eup %5011 }
 0x3d3   : > { %5017 = vpow2.f32 %v2215_v34  ;;  %v2173_v1 = vsub.f32 %v5944_v8, %v2114_v12  ;;  %v2174_v2 = vsub.f32 %v5947_v10, %v2114_v12  ;;  %2607 = vmatmul.bf16.gmra.mxu2 %v2484_v35  ;;  %v5014_v3 = vpop.eup %5013 }
 0x3d4   : > { %2656 = vmatmul.bf16.gmra.mxu0 %v2485_v61  ;;  %2299 = vadd.xlane.f32.xlu0 %v2298_v62  ;;  %v2301_v10 = vadd.f32 %v5014_v3, %v5012_v27 }
 0x3d5   : > { %v2217_v57 = vmul.f32 1.442695, %v2173_v1  ;;  %v2219_v26 = vmul.f32 1.442695, %v2174_v2  ;;  %v2124_v23 = vpop.permute.xlu2 %2123 }
 0x3d6   : > { %v2177_v9 = vsub.f32 %v5960_v17, %v2124_v23  ;;  %v2178_v42 = vsub.f32 %v5963_v43, %v2124_v23 }
 0x3d7   : > { %5019 = vpow2.f32 %v2217_v57 }
 0x3d8   : > { %v5016_v32 = vpop.eup %5015  ;;  %5021 = vpow2.f32 %v2219_v26  ;;  %v2225_v18 = vmul.f32 1.442695, %v2177_v9  ;;  %v2227_v50 = vmul.f32 1.442695, %v2178_v42 }
 0x3d9   : > { %v5018_v53 = vpop.eup %5017  ;;  %v2486_v43 = vpack.c.bf16 %v5016_v32, %v5012_v27 }
 0x3da   : > { %v2119_v8 = vpop.permute.xlu1 %2118  ;;  %v2304_v37 = vadd.f32 %v5018_v53, %v5016_v32  ;;  %5023 = vpow2.f32 %v2225_v18  ;;  %v2487_v34 = vpack.c.bf16 %v5018_v53, %v5014_v3 }
 0x3db   : > { %v2175_v6 = vsub.f32 %v5952_v14, %v2119_v8  ;;  %v2176_v15 = vsub.f32 %v5955_v40, %v2119_v8 }
 0x3dc   : > { %2305 = vadd.xlane.f32.xlu1 %v2304_v37  ;;  %2302 = vadd.xlane.f32.xlu0 %v2301_v10 }
 0x3dd   : > { %v2221_v58 = vmul.f32 1.442695, %v2175_v6  ;;  %v2223_v17 = vmul.f32 1.442695, %v2176_v15  ;;  %v5020_v21 = vpop.eup %5019 }
 0x3de   : > { %v5022_v31 = vpop.eup %5021 }
 0x3df   : > { %5025 = vpow2.f32 %v2221_v58  ;;  %v2307_v0 = vadd.f32 %v5022_v31, %v5020_v21 }
 0x3e0   : > { %5027 = vpow2.f32 %v2223_v17  ;;  %v5024_v35 = vpop.eup %5023 }
 0x3e1   : > { %5029 = vpow2.f32 %v2227_v50 }
 0x3e3   : > { %2612 = vmatmul.bf16.gmra.mxu2 %v2486_v43 }
 0x3e4   : > { %2661 = vmatmul.bf16.gmra.mxu0 %v2487_v34  ;;  %2308 = vadd.xlane.f32.xlu0 %v2307_v0 }
 0x3e5   : > { %v5026_v14 = vpop.eup %5025 }
 0x3e6   : > { %v5028_v40 = vpop.eup %5027  ;;  %v2488_v12 = vpack.c.bf16 %v5026_v14, %v5020_v21 }
 0x3e7   : > { %v5030_v61 = vpop.eup %5029  ;;  %v2310_v62 = vadd.f32 %v5028_v40, %v5026_v14  ;;  %v2489_v32 = vpack.c.bf16 %v5028_v40, %v5022_v31 }
 0x3e8   : > { %2617 = vmatmul.bf16.vlgmr.msra.gmra.mxu3 %v2488_v12  ;;  %v2313_v2 = vadd.f32 %v5030_v61, %v5024_v35 }
 0x3e9   : > { %2311 = vadd.xlane.f32.xlu1 %v2310_v62 }
 0x3ea   : > { %v2129_v1 = vpop.permute.xlu1 %2128 }
 0x3eb   : > { %v2179_v57 = vsub.f32 %v5968_v46, %v2129_v1  ;;  %v2180_v26 = vsub.f32 %v5971_v47, %v2129_v1 }
 0x3ec   : > { %2314 = vadd.xlane.f32.xlu0 %v2313_v2 }
 0x3ed   : > { %v2229_v23 = vmul.f32 1.442695, %v2179_v57  ;;  %v2231_v27 = vmul.f32 1.442695, %v2180_v26 }
 0x3ef   : > { %5031 = vpow2.f32 %v2229_v23 }
 0x3f0   : > { %5033 = vpow2.f32 %v2231_v27 }
 0x3f2   : > { %v2149_v9 = vpop.permute.xlu2 %2148  ;;  %v2134_v3 = vpop.permute.xlu0 %2133 }
 0x3f3   : > { %v2181_v53 = vsub.f32 %v5976_v51, %v2134_v3  ;;  %v2182_v42 = vsub.f32 %v5979_v22, %v2134_v3  ;;  %v2187_v17 = vsub.f32 %v6024_v38, %v2149_v9  ;;  %v2188_v34 = vsub.f32 %v6027_v4, %v2149_v9 }
 0x3f4   : > { %2666 = vmatmul.bf16.gmra.mxu0 %v2489_v32 }
 0x3f5   : > { %v5032_v18 = vpop.eup %5031  ;;  %v2233_v8 = vmul.f32 1.442695, %v2181_v53  ;;  %v2235_v10 = vmul.f32 1.442695, %v2182_v42  ;;  %v2245_v40 = vmul.f32 1.442695, %v2187_v17 }
 0x3f6   : > { %v5034_v37 = vpop.eup %5033  ;;  %v2490_v46 = vpack.c.bf16 %v5032_v18, %v5024_v35 }
 0x3f7   : > { %v2316_v6 = vadd.f32 %v5034_v37, %v5032_v18  ;;  %5035 = vpow2.f32 %v2233_v8 }
 0x3f8   : > { %2622 = vmatmul.bf16.gmra.mxu3 %v2490_v46  ;;  %5037 = vpow2.f32 %v2235_v10 }
 0x3f9   : > { %2317 = vadd.xlane.f32.xlu1 %v2316_v6 }
 0x3fa   : > { %v2139_v47 = vpop.permute.xlu1 %2138  ;;  %v2154_v15 = vpop.permute.xlu2 %2153 }
 0x3fb   : > { %v2183_v50 = vsub.f32 %v5992_v60, %v2139_v47  ;;  %v2184_v58 = vsub.f32 %v5995_v63, %v2139_v47  ;;  %v2189_v51 = vsub.f32 %v6040_v39, %v2154_v15  ;;  %v2190_v22 = vsub.f32 %v6043_v13, %v2154_v15 }
 0x3fc   : > { %v2247_v63 = vmul.f32 1.442695, %v2188_v34  ;;  %v2491_v13 = vpack.c.bf16 %v5034_v37, %v5030_v61 }
 0x3fd   : > { %v2237_v21 = vmul.f32 1.442695, %v2183_v50  ;;  %v2239_v31 = vmul.f32 1.442695, %v2184_v58  ;;  %v2249_v43 = vmul.f32 1.442695, %v2189_v51  ;;  %v5036_v35 = vpop.eup %5035  ;;  %v6668_v50 = vsub.f32 %v6047_v16, %v6056_v49 }
 0x3fe   : > { %v2251_v0 = vmul.f32 1.442695, %v2190_v22  ;;  %v5038_v14 = vpop.eup %5037 }
 0x3ff   : > { %5039 = vpow2.f32 %v2237_v21  ;;  %v2319_v60 = vadd.f32 %v5038_v14, %v5036_v35  ;;  %v2049_v58 = vmul.f32 1.442695, %v6668_v50  ;;  %v2257_v21 = vld [vmem:[#allocation4] sm:$0xff] }
 0x400   : > { %5041 = vpow2.f32 %v2239_v31  ;;  %v2265_v50 = vld [vmem:[#allocation4 + $0x40] sm:$0xff] }
 0x401   : > { %5043 = vpow2.f32 %v2249_v43  ;;  %2320 = vadd.xlane.f32.xlu2 %v2319_v60  ;;  %v2259_v60 = vld [vmem:[#allocation4 + $0x10] sm:$0xff] }
 0x402   : > { %5045 = vpow2.f32 %v2251_v0  ;;  %v2159_v39 = vpop.permute.xlu2 %2158  ;;  %v2144_v12 = vpop.permute.xlu0 %2143  ;;  %v2258_v0 = vld [vmem:[#allocation4 + $0x8] sm:$0xff] }
 0x403   : > { %v2191_v38 = vsub.f32 %v6050_v20, %v2159_v39  ;;  %v2192_v62 = vsub.f32 %v6053_v48, %v2159_v39  ;;  %v2185_v4 = vsub.f32 %v6008_v30, %v2144_v12  ;;  %v2186_v1 = vsub.f32 %v6011_v59, %v2144_v12 }
 0x404   : > { %2671 = vmatmul.bf16.gmra.mxu0 %v2491_v13  ;;  %5047 = vpow2.f32 %v2245_v40  ;;  %v2275_v13 = vmul.f32 %v6072_v44, %v2259_v60  ;;  %v2262_v44 = vld [vmem:[#allocation4 + $0x28] sm:$0xff] }
 0x405   : > { %v5040_v2 = vpop.eup %5039  ;;  %v2253_v57 = vmul.f32 1.442695, %v2191_v38  ;;  %v2255_v26 = vmul.f32 1.442695, %v2192_v62  ;;  %v2241_v23 = vmul.f32 1.442695, %v2185_v4  ;;  %5049 = vpow2.f32 %v2247_v63 }
 0x406   : > { %v5042_v27 = vpop.eup %5041  ;;  %v2243_v9 = vmul.f32 1.442695, %v2186_v1  ;;  %v2492_v3 = vpack.c.bf16 %v5040_v2, %v5036_v35  ;;  %v2274_v35 = vmul.f32 %v6068_v5, %v2258_v0  ;;  %v6669_v63 = vsub.f32 %v6075_v45, %v6078_v52  ;;  %v2260_v38 = vld [vmem:[#allocation4 + $0x18] sm:$0xff] }
 0x407   : > { %v5044_v61 = vpop.eup %5043  ;;  %5051 = vpow2.f32 %v2253_v57  ;;  %v2322_v32 = vadd.f32 %v5042_v27, %v5040_v2  ;;  %v2493_v20 = vpack.c.bf16 %v5042_v27, %v5038_v14  ;;  %v2276_v4 = vmul.f32 %v6097_v33, %v2260_v38  ;;  %v6678_v38 = vld [vmem:[#allocation47_spill] sm:$0xff] }
 0x408   : > { %v5046_v53 = vpop.eup %5045  ;;  %5053 = vpow2.f32 %v2255_v26  ;;  %2627 = vmatmul.bf16.gmra.mxu3 %v2492_v3  ;;  %v2059_v39 = vmul.f32 1.442695, %v6669_v63  ;;  %v6670_v26 = vsub.f32 %v6087_v25, %v6090_v29  ;;  %v6671_v27 = vsub.f32 %v6100_v36, %v6103_v7  ;;  %v2263_v36 = vld [vmem:[#allocation4 + $0x30] sm:$0xff] }
 0x409   : > { %5055 = vpow2.f32 %v2241_v23  ;;  %2323 = vadd.xlane.f32.xlu0 %v2322_v32  ;;  %2676 = vmatmul.bf16.vlgmr.msrb.gmra.mxu1 %v2493_v20  ;;  %v6231_v30 = vadd.f32 %v5046_v53, %v5044_v61  ;;  %v2261_v23 = vld [vmem:[#allocation4 + $0x20] sm:$0xff] }
 0x40a   : > { %5057 = vpow2.f32 %v2243_v9  ;;  %v5048_v59 = vpop.eup %5047  ;;  %v2061_v45 = vmul.f32 1.442695, %v6670_v26  ;;  %v2063_v33 = vmul.f32 1.442695, %v6671_v27  ;;  %v2277_v3 = vmul.f32 %v6084_v24, %v2261_v23  ;;  %v6680_v26 = vld [vmem:[#allocation50_spill] sm:$0xff] }
 0x40b   : > { %v5050_v48 = vpop.eup %5049  ;;  %5059 = vpow2.f32 %v2049_v58 }
 0x40c   : > { %v2328_v37 = vadd.f32 %v5050_v48, %v5048_v59 }
 0x40d   : > { %v5052_v42 = vpop.eup %5051 }
 0x40e   : > { %v5054_v18 = vpop.eup %5053  ;;  %v2496_v22 = vpack.c.bf16 %v5052_v42, %v5044_v61 }
 0x40f   : > { %v5056_v8 = vpop.eup %5055  ;;  %v6233_v10 = vadd.f32 %v5054_v18, %v5052_v42  ;;  %v2497_v17 = vpack.c.bf16 %v5054_v18, %v5046_v53  ;;  %v6672_v53 = vsub.f32 %v6111_v41, %v6114_v19 }
 0x410   : > { %v5058_v46 = vpop.eup %5057  ;;  %v2494_v47 = vpack.c.bf16 %v5048_v59, %v5056_v8 }
 0x411   : > { %2329 = vadd.xlane.f32.xlu0 %v2328_v37  ;;  %v6235_v6 = vadd.f32 %v5058_v46, %v5056_v8  ;;  %v2495_v15 = vpack.c.bf16 %v5050_v48, %v5058_v46  ;;  %v5060_v51 = vpop.eup %5059  ;;  %v2065_v59 = vmul.f32 1.442695, %v6672_v53  ;;  %v2264_v46 = vld [vmem:[#allocation4 + $0x38] sm:$0xff] }
 0x412   : > { %v2273_v31 = vmul.f32 %v5060_v51, %v2257_v21 }
 0x418   : > { %2632 = vmatmul.bf16.gmra.mxu3 %v2494_v47 }
 0x419   : > { %2681 = vmatmul.bf16.gmra.mxu1 %v2495_v15 }
 0x425   : > { %2388 = vperm.xlu0 %4981, %v5060_v51  }
 0x428   : > { %2637 = vmatmul.bf16.gmra.mxu3 %v2496_v22 }
 0x429   : > { %2686 = vmatmul.bf16.gmra.mxu1 %v2497_v17  ;;  %v6673_v17 = vsub.f32 %v6121_v56, %v6124_v28  ;;  %v6675_v56 = vld [vmem:[#allocation45_spill] sm:$0xff] }
 0x42b   : > { %v2067_v21 = vmul.f32 1.442695, %v6673_v17 }
 0x42d   : > { %v2291_v43 = vpop.xlane.xlu0 %2290 }
 0x42e   : > { %v2337_v34 = vadd.f32 %v2291_v43, %v2273_v31 }
 0x430   : > { %2354 = vst.msk [vmem:[#allocation4] sm:$0xff] %vm1568_vm0, %v2337_v34 }
 0x437   : > { %v2294_v14 = vpop.xlane.xlu1 %2293  ;;  %v2759_v40 = vld [vmem:[#allocation4] sm:$0xff] }
 0x438   : > { %v2338_v16 = vadd.f32 %v2294_v14, %v2274_v35  ;;  %5061 = vrcp.f32 %v2759_v40  ;;  %v6674_v40 = vld [vmem:[#allocation44_spill] sm:$0xff] }
 0x439   : > { %v6676_v28 = vsub.f32 %v6674_v40, %v6675_v56 }
 0x43a   : > { %2355 = vst.msk [vmem:[#allocation4 + $0x8] sm:$0xff] %vm1568_vm0, %v2338_v16 }
 0x43b   : > { %v2069_v16 = vmul.f32 1.442695, %v6676_v28  ;;  %v6683_v28 = vld [vmem:[#allocation54_spill] sm:$0xff] }
 0x43e   : > { %v5062_v49 = vpop.eup %5061 }
 0x43f   : > { %2793 = vperm.xlu2 %4983, %v5062_v49   ;;  %v2266_v49 = vld [vmem:[#allocation4 + $0x48] sm:$0xff] }
 0x441   : > { %v2760_v12 = vld [vmem:[#allocation4 + $0x8] sm:$0xff] }
 0x442   : > { %5063 = vrcp.f32 %v2760_v12 }
 0x443   : > { %5065 = vpow2.f32 %v2059_v39 }
 0x444   : > { %v2297_v62 = vpop.xlane.xlu2 %2296  ;;  %5067 = vpow2.f32 %v2061_v45  ;;  %v6681_v45 = vld [vmem:[#allocation51_spill] sm:$0xff] }
 0x445   : > { %v2339_v5 = vadd.f32 %v2297_v62, %v2275_v13  ;;  %v6677_v13 = vld [vmem:[#allocation46_spill] sm:$0xff] }
 0x446   : > { %v6679_v62 = vsub.f32 %v6677_v13, %v6678_v38  ;;  %v2469_v13 = vmul.f32 0.0, %v6201_v11 }
 0x447   : > { %2356 = vst.msk [vmem:[#allocation4 + $0x10] sm:$0xff] %vm1568_vm0, %v2339_v5  ;;  %v2300_v1 = vpop.xlane.xlu0 %2299 }
 0x448   : > { %v5064_v2 = vpop.eup %5063  ;;  %v2340_v57 = vadd.f32 %v2300_v1, %v2276_v4  ;;  %v2071_v5 = vmul.f32 1.442695, %v6679_v62  ;;  %v2267_v1 = vld [vmem:[#allocation4 + $0x50] sm:$0xff] }
 0x449   : > { %2798 = vperm.xlu0 %4981, %v5064_v2   ;;  %v5066_v52 = vpop.eup %5065 }
 0x44a   : > { %2357 = vst.msk [vmem:[#allocation4 + $0x18] sm:$0xff] %vm1568_vm0, %v2340_v57  ;;  %v2278_v9 = vmul.f32 %v5066_v52, %v2262_v44  ;;  %v5068_v48 = vpop.eup %5067 }
 0x44b   : > { %v2279_v42 = vmul.f32 %v5068_v48, %v2263_v36  ;;  %v4527_v36 = vld [vmem:[#allocation16 + $0x30] sm:$0xff] }
 0x44e   : > { %v2761_v61 = vld [vmem:[#allocation4 + $0x10] sm:$0xff] }
 0x44f   : > { %v2306_v32 = vpop.xlane.xlu1 %2305  ;;  %v2303_v20 = vpop.xlane.xlu0 %2302  ;;  %5069 = vrcp.f32 %v2761_v61 }
 0x450   : > { %v2342_v25 = vadd.f32 %v2306_v32, %v2278_v9  ;;  %v2341_v29 = vadd.f32 %v2303_v20, %v2277_v3  ;;  %5071 = vpow2.f32 %v2063_v33  ;;  %v2268_v9 = vld [vmem:[#allocation4 + $0x58] sm:$0xff] }
 0x451   : > { %2413 = vperm.xlu0 %4981, %v5066_v52   ;;  %v2762_v7 = vld [vmem:[#allocation4 + $0x18] sm:$0xff]  ;;  %5073 = vpow2.f32 %v2065_v59  ;;  %v6682_v52 = vsub.f32 %v6680_v26, %v6681_v45 }
 0x452   : > { %2359 = vst.msk [vmem:[#allocation4 + $0x28] sm:$0xff] %vm1568_vm0, %v2342_v25  ;;  %5075 = vrcp.f32 %v2762_v7  ;;  %v4528_v20 = vld [vmem:[#allocation16 + $0x38] sm:$0xff]  ;;  %v4526_v7 = vld [vmem:[#allocation16 + $0x28] sm:$0xff] }
 0x453   : > { %2358 = vst.msk [vmem:[#allocation4 + $0x20] sm:$0xff] %vm1568_vm0, %v2341_v29  ;;  %v2075_v44 = vmul.f32 1.442695, %v6682_v52  ;;  %v2270_v29 = vld [vmem:[#allocation4 + $0x68] sm:$0xff]  ;;  %2963 = vmatpush.bf16.msrb.mxu3 %v4528_v20 }
 0x455   : > { %v5070_v24 = vpop.eup %5069 }
 0x456   : > { %2803 = vperm.xlu2 %4983, %v5070_v24   ;;  %v5072_v8 = vpop.eup %5071  ;;  %v4525_v24 = vld [vmem:[#allocation16 + $0x20] sm:$0xff] }
 0x457   : > { %v2309_v18 = vpop.xlane.xlu0 %2308  ;;  %v6263_v47 = vpop.eup %5073  ;;  %v2280_v15 = vmul.f32 %v5072_v8, %v2264_v46  ;;  %2964 = vmatpush.bf16.msrb.mxu3 %v4527_v36  ;;  %v4522_v46 = vld [vmem:[#allocation16 + $0x8] sm:$0xff] }
 0x458   : > { %v2343_v37 = vadd.f32 %v2309_v18, %v2279_v42  ;;  %v5076_v51 = vpop.eup %5075  ;;  %v2281_v31 = vmul.f32 %v6263_v47, %v2265_v50  ;;  %v4524_v42 = vld [vmem:[#allocation16 + $0x18] sm:$0xff]  ;;  %v2603_v18 = vpop.f32.mrf.mxu2  ;;  %v4521_v50 = vld [vmem:[#allocation16] sm:$0xff] }
 0x459   : > { %v2764_v41 = vld [vmem:[#allocation4 + $0x28] sm:$0xff] }
 0x45a   : > { %2360 = vst.msk [vmem:[#allocation4 + $0x30] sm:$0xff] %vm1568_vm0, %v2343_v37  ;;  %5077 = vrcp.f32 %v2764_v41  ;;  %v2763_v19 = vld [vmem:[#allocation4 + $0x20] sm:$0xff]  ;;  %v4523_v37 = vld [vmem:[#allocation16 + $0x10] sm:$0xff] }
 0x45b   : > { %5079 = vrcp.f32 %v2763_v19  ;;  %2965 = vmatpush.bf16.msrb.mxu3 %v4526_v7 }
 0x45c   : > { %v2312_v58 = vpop.xlane.xlu1 %2311  ;;  %5081 = vpow2.f32 %v2067_v21 }
 0x45d   : > { %v2344_v22 = vadd.f32 %v2312_v58, %v2280_v15  ;;  %5083 = vpow2.f32 %v2069_v16  ;;  %v6684_v16 = vld [vmem:[#allocation55_spill] sm:$0xff] }
 0x45e   : > { %2808 = vperm.xlu2 %4983, %v5076_v51  }
 0x45f   : > { %2361 = vst.msk [vmem:[#allocation4 + $0x38] sm:$0xff] %vm1568_vm0, %v2344_v22  ;;  %v2315_v43 = vpop.xlane.xlu0 %2314  ;;  %2966 = vmatpush.bf16.msrb.mxu3 %v4525_v24  ;;  %v3549_v24 = vld [vmem:[%s5706_s21 + $0x18] sm:$0xff] }
 0x460   : > { %v5078_v34 = vpop.eup %5077  ;;  %v2345_v0 = vadd.f32 %v2315_v43, %v2281_v31  ;;  %v2605_v19 = vpop.f32.mrf.mxu2 }
 0x461   : > { %v5080_v35 = vpop.eup %5079  ;;  %2818 = vperm.xlu0 %4981, %v5078_v34   ;;  %v2765_v39 = vld [vmem:[#allocation4 + $0x30] sm:$0xff] }
 0x462   : > { %2362 = vst.msk [vmem:[#allocation4 + $0x40] sm:$0xff] %vm1568_vm0, %v2345_v0  ;;  %2813 = vperm.xlu1 %4982, %v5080_v35   ;;  %v6271_v14 = vpop.eup %5081  ;;  %5085 = vrcp.f32 %v2765_v39 }
 0x463   : > { %v2282_v60 = vmul.f32 %v6271_v14, %v2266_v49  ;;  %v5084_v4 = vpop.eup %5083  ;;  %5087 = vpow2.f32 %v2071_v5  ;;  %2967 = vmatpush.bf16.msrb.mxu3 %v4524_v42  ;;  %v6685_v49 = vsub.f32 %v6683_v28, %v6684_v16  ;;  %v2271_v28 = vld [vmem:[#allocation4 + $0x70] sm:$0xff]  ;;  %v2269_v16 = vld [vmem:[#allocation4 + $0x60] sm:$0xff] }
 0x464   : > { %v2283_v57 = vmul.f32 %v5084_v4, %v2267_v1  ;;  %5089 = vpow2.f32 %v2075_v44  ;;  %v6687_v44 = vld [vmem:[#allocation48_spill] sm:$0xff] }
 0x466   : > { %2418 = vperm.xlu2 %4983, %v5068_v48   ;;  %v2766_v41 = vld [vmem:[#allocation4 + $0x38] sm:$0xff] }
 0x467   : > { %2968 = vmatpush.bf16.msrb.mxu3 %v4523_v37  ;;  %5091 = vrcp.f32 %v2766_v41  ;;  %v3552_v37 = vld [vmem:[%s5706_s21 + $0x30] sm:$0xff]  ;;  %v2470_v41 = vmul.f32 0.0, %v6209_v54  ;;  %v6690_v54 = vld [vmem:[#allocation52_spill] sm:$0xff] }
 0x468   : > { %v5086_v2 = vpop.eup %5085  ;;  %v2608_v51 = vpop.f32.mrf.mxu2 }
 0x469   : > { %v6284_v33 = vpop.eup %5087  ;;  %v2767_v15 = vld [vmem:[#allocation4 + $0x40] sm:$0xff] }
 0x46a   : > { %v2284_v3 = vmul.f32 %v6284_v33, %v2268_v9  ;;  %v6289_v25 = vpop.eup %5089  ;;  %5093 = vrcp.f32 %v2767_v15 }
 0x46b   : > { %v2286_v53 = vmul.f32 %v6289_v25, %v2270_v29  ;;  %2969 = vmatpush.bf16.msrb.mxu3 %v4522_v46 }
 0x46c   : > { %v2318_v63 = vpop.xlane.xlu1 %2317 }
 0x46d   : > { %v2346_v12 = vadd.f32 %v2318_v63, %v2282_v60  ;;  %v2079_v60 = vmul.f32 1.442695, %v6685_v49 }
 0x46e   : > { %2423 = vperm.xlu2 %4983, %v5072_v8   ;;  %v2652_v8 = vpop.f32.mrf.mxu0 }
 0x46f   : > { %2363 = vst.msk [vmem:[#allocation4 + $0x48] sm:$0xff] %vm1568_vm0, %v2346_v12  ;;  %2970 = vmatpush.bf16.msrb.mxu3 %v4521_v50  ;;  %v6686_v12 = vld [vmem:[#allocation56_spill] sm:$0xff]  ;;  %v2653_v62 = vadd.f32 %v2652_v8, %v2603_v18 }
 0x474   : > { %v2321_v23 = vpop.xlane.xlu2 %2320 }
 0x475   : > { %v2347_v27 = vadd.f32 %v2321_v23, %v2283_v57  ;;  %v6688_v23 = vld [vmem:[#allocation49_spill] sm:$0xff] }
 0x476   : > { %2823 = vperm.xlu2 %4983, %v5086_v2   ;;  %v2654_v58 = vpop.f32.mrf.mxu0  ;;  %v2768_v21 = vld [vmem:[#allocation4 + $0x48] sm:$0xff]  ;;  %v2467_v2 = vmul.f32 0.0, %v6198_v55 }
 0x477   : > { %2364 = vst.msk [vmem:[#allocation4 + $0x50] sm:$0xff] %vm1568_vm0, %v2347_v27  ;;  %5095 = vrcp.f32 %v2768_v21  ;;  %v2655_v5 = vadd.f32 %v2654_v58, %v2605_v19  ;;  %v6689_v27 = vsub.f32 %v6687_v44, %v6688_v23  ;;  %v2618_v21 = vpop.f32.mrf.mxu3 }
 0x479   : > { %v2073_v9 = vmul.f32 1.442695, %v6689_v27  ;;  %v2693_v11 = vadd.f32 %v2655_v5, %v2467_v2 }
 0x47c   : > { %v2324_v61 = vpop.xlane.xlu0 %2323 }
 0x47d   : > { %v2348_v32 = vadd.f32 %v2324_v61, %v2284_v3 }
 0x47e   : > { %v2657_v22 = vpop.f32.mrf.mxu0  ;;  %v2769_v31 = vld [vmem:[#allocation4 + $0x50] sm:$0xff] }
 0x47f   : > { %2365 = vst.msk [vmem:[#allocation4 + $0x58] sm:$0xff] %vm1568_vm0, %v2348_v32  ;;  %5097 = vrcp.f32 %v2769_v31  ;;  %v2658_v35 = vadd.f32 %v2657_v22, %v2608_v51  ;;  %v3555_v22 = vld [vmem:[%s5706_s21 + $0x48] sm:$0xff]  ;;  %v3558_v31 = vld [vmem:[%s5706_s21 + $0x60] sm:$0xff] }
 0x484   : > { %v2330_v59 = vpop.xlane.xlu0 %2329 }
 0x485   : > { %v2350_v48 = vadd.f32 %v2330_v59, %v2286_v53 }
 0x486   : > { %v2770_v43 = vld [vmem:[#allocation4 + $0x58] sm:$0xff]  ;;  %v2659_v0 = vpop.f32.mrf.mxu0 }
 0x487   : > { %2367 = vst.msk [vmem:[#allocation4 + $0x68] sm:$0xff] %vm1568_vm0, %v2350_v48  ;;  %5099 = vrcp.f32 %v2770_v43  ;;  %v3546_v48 = vld [vmem:[%s5706_s21] sm:$0xff]  ;;  %v2620_v43 = vpop.f32.mrf.mxu3 }
 0x488   : > { %5101 = vpow2.f32 %v2079_v60 }
 0x489   : > { %5103 = vpow2.f32 %v2073_v9 }
 0x48b   : > { %2332 = vadd.xlane.f32.xlu0 %v6231_v30  ;;  %v5092_v30 = vpop.eup %5091 }
 0x48c   : > { %2326 = vadd.xlane.f32.xlu1 %v6235_v6  ;;  %v5094_v6 = vpop.eup %5093 }
 0x48d   : > { %v5096_v56 = vpop.eup %5095 }
 0x48e   : > { %v5098_v39 = vpop.eup %5097  ;;  %v2772_v29 = vld [vmem:[#allocation4 + $0x68] sm:$0xff]  ;;  %v2662_v7 = vpop.f32.mrf.mxu0 }
 0x48f   : > { %v5100_v38 = vpop.eup %5099  ;;  %5105 = vrcp.f32 %v2772_v29  ;;  %v4543_v29 = vld [vmem:[#allocation17 + $0x74] sm:$0xf] }
 0x490   : > { %v6308_v53 = vpop.eup %5101 }
 0x491   : > { %v5104_v59 = vpop.eup %5103 }
 0x492   : > { %v2285_v60 = vmul.f32 %v5104_v59, %v2269_v16  ;;  %v4536_v16 = vld [vmem:[#allocation17 + $0x34] sm:$0xf0] }
 0x495   : > { %v5106_v36 = vpop.eup %5105 }
 0x496   : > { %v2664_v46 = vpop.f32.mrf.mxu0 }
 0x499   : > { %v2794_v17 = vpop.permute.xlu2 %2793 }
 0x49f   : > { %2428 = vperm.xlu0 %4981, %v6263_v47   ;;  %2335 = vadd.xlane.f32.xlu2 %v6233_v10  ;;  %v2610_v47 = vpop.f32.mrf.mxu2  ;;  %v2389_v10 = vpop.permute.xlu0 %2388 }
 0x4a0   : > { %v2660_v40 = vadd.f32 %v2659_v0, %v2610_v47  ;;  %v2466_v63 = vmul.f32 0.0, %v2389_v10  ;;  %v3561_v47 = vld [vmem:[%s5706_s21 + $0x78] sm:$0xff] }
 0x4a2   : > { %v2695_v1 = vadd.f32 %v2660_v40, %v2469_v13  ;;  %v2692_v57 = vadd.f32 %v2653_v62, %v2466_v63  ;;  %v2667_v62 = vpop.f32.mrf.mxu0 }
 0x4a4   : > { %v2871_v32 = vmul.f32 %v2794_v17, %v2692_v57 }
 0x4a5   : > { %2828 = vperm.xlu1 %4982, %v5092_v30  }
 0x4a7   : > { %2833 = vperm.xlu0 %4981, %v5094_v6  }
 0x4aa   : > { %v2669_v57 = vpop.f32.mrf.mxu0 }
 0x4ad   : > { %2433 = vperm.xlu1 %4982, %v6271_v14   ;;  %v2468_v14 = vmul.f32 0.0, %v6686_v12 }
 0x4af   : > { %2438 = vperm.xlu0 %4981, %v5084_v4   ;;  %v2694_v4 = vadd.f32 %v2658_v35, %v2468_v14  ;;  %v6322_v35 = vpop.f32.mrf.mxu3 }
 0x4b0   : > { %v2804_v34 = vpop.permute.xlu2 %2803 }
 0x4b1   : > { %v2873_v45 = vmul.f32 %v2804_v34, %v2694_v4  ;;  %v6691_v34 = vld [vmem:[#allocation53_spill] sm:$0xff] }
 0x4b2   : > { %v6692_v10 = vsub.f32 %v6690_v54, %v6691_v34  ;;  %v4538_v34 = vld [vmem:[#allocation17 + $0x44] sm:$0xf0] }
 0x4b4   : > { %v2077_v0 = vmul.f32 1.442695, %v6692_v10  ;;  %v4537_v10 = vld [vmem:[#allocation17 + $0x44] sm:$0xf] }
 0x4b5   : > { %2838 = vperm.xlu1 %4982, %v5096_v56  }
 0x4b6   : > { %5107 = vpow2.f32 %v2077_v0  ;;  %v4337_v0 = vld [vmem:[#allocation17 + $0x48] sm:$0xf0] }
 0x4b7   : > { %2848 = vperm.xlu0 %4981, %v5100_v38   ;;  %2843 = vperm.xlu2 %4983, %v5098_v39   ;;  %v6324_v39 = vpop.f32.mrf.mxu3 }
 0x4b8   : > { %v2809_v26 = vpop.permute.xlu2 %2808 }
 0x4b9   : > { %v2874_v52 = vmul.f32 %v2809_v26, %v2695_v1  ;;  %v2272_v26 = vld [vmem:[#allocation4 + $0x78] sm:$0xff] }
 0x4ba   : > { %v2288_v44 = vmul.f32 %v6308_v53, %v2272_v26  ;;  %v2677_v26 = vpop.f32.mrf.mxu1 }
 0x4bb   : > { %v2799_v3 = vpop.permute.xlu0 %2798  ;;  %v2888_v61 = vpack.c.bf16 %v2874_v52, %v2873_v45 }
 0x4bc   : > { %v2872_v20 = vmul.f32 %v2799_v3, %v2693_v11  ;;  %v5108_v56 = vpop.eup %5107  ;;  %v4359_v11 = vld [vmem:[#allocation17 + $0x70] sm:$0xf]  ;;  %v4544_v3 = vld [vmem:[#allocation17 + $0x74] sm:$0xf0] }
 0x4bd   : > { %2443 = vperm.xlu1 %4982, %v6284_v33   ;;  %v2613_v33 = vpop.f32.mrf.mxu2  ;;  %v2287_v49 = vmul.f32 %v5108_v56, %v2271_v28  ;;  %v4327_v28 = vld [vmem:[#allocation17 + $0x30] sm:$0xf] }
 0x4be   : > { %v2887_v55 = vpack.c.bf16 %v2872_v20, %v2871_v32  ;;  %v4360_v20 = vor.u32 %v4544_v3, %v4359_v11 }
 0x4bf   : > { %2453 = vperm.xlu0 %4981, %v6289_v25   ;;  %2463 = vperm.xlu2 %4983, %v6308_v53   ;;  %v2663_v25 = vadd.f32 %v2662_v7, %v2613_v33  ;;  %v6328_v4 = vpop.f32.mrf.mxu3  ;;  %v3547_v33 = vld [vmem:[%s5706_s21 + $0x8] sm:$0xff]  ;;  %v2672_v7 = vpop.f32.mrf.mxu0 }
 0x4c0   : > { %2971 = vmatmul.bf16.vlgmr.msrb.gmra.mxu3 %v2887_v55  ;;  %v2419_v40 = vpop.permute.xlu2 %2418  ;;  %v4361_v55 = vld [vmem:[#allocation17 + $0x78] sm:$0xf0]  ;;  %3154 = vmatpush.bf16.msra.mxu1 %v4360_v20  ;;  %v4321_v20 = vld [vmem:[#allocation17 + $0x28] sm:$0xf0] }
 0x4c1   : > { %v2696_v58 = vadd.f32 %v2663_v25, %v2470_v41  ;;  %v2472_v23 = vmul.f32 0.0, %v2419_v40  ;;  %v4541_v25 = vld [vmem:[#allocation17 + $0x64] sm:$0xf]  ;;  %v4353_v41 = vld [vmem:[#allocation17 + $0x68] sm:$0xf0] }
 0x4c3   : > { %v2414_v42 = vpop.permute.xlu0 %2413 }
 0x4c4   : > { %v2471_v8 = vmul.f32 0.0, %v2414_v42  ;;  %v4351_v42 = vld [vmem:[#allocation17 + $0x60] sm:$0xf] }
 0x4c5   : > { %2448 = vperm.xlu1 %4982, %v5104_v59   ;;  %v2615_v18 = vpop.f32.mrf.mxu2  ;;  %v2668_v59 = vadd.f32 %v2667_v62, %v2618_v21  ;;  %v3550_v21 = vld [vmem:[%s5706_s21 + $0x20] sm:$0xff] }
 0x4c6   : > { %v2665_v19 = vadd.f32 %v2664_v46, %v2615_v18  ;;  %v4542_v18 = vld [vmem:[#allocation17 + $0x64] sm:$0xf0] }
 0x4c7   : > { %2858 = vperm.xlu0 %4981, %v5106_v36   ;;  %3564 = vperm.xlu2 %4983, %v3546_v48   ;;  %v2670_v48 = vadd.f32 %v2669_v57, %v2620_v43  ;;  %v4364_v36 = vor.u32 %v4543_v29, %v4361_v55  ;;  %v2698_v53 = vadd.f32 %v2668_v59, %v2472_v23  ;;  %v4319_v23 = vld [vmem:[#allocation17 + $0x20] sm:$0xf]  ;;  %v4311_v29 = vld [vmem:[#allocation17 + $0x10] sm:$0xf]  ;;  %v4532_v59 = vld [vmem:[#allocation17 + $0x14] sm:$0xf0] }
 0x4c8   : > { %v2697_v30 = vadd.f32 %v2665_v19, %v2471_v8  ;;  %v2424_v13 = vpop.permute.xlu2 %2423  ;;  %v4352_v46 = vor.u32 %v4542_v18, %v4351_v42  ;;  %v3556_v18 = vld [vmem:[%s5706_s21 + $0x50] sm:$0xff] }
 0x4c9   : > { %v2473_v27 = vmul.f32 0.0, %v2424_v13  ;;  %3203 = vmatpush.bf16.msra.mxu2 %v4364_v36  ;;  %v4328_v13 = vor.u32 %v4536_v16, %v4327_v28  ;;  %v4313_v36 = vld [vmem:[#allocation17 + $0x18] sm:$0xf0] }
 0x4ca   : > { %3155 = vmatpush.bf16.msra.mxu1 %v4352_v46  ;;  %v3557_v28 = vld [vmem:[%s5706_s21 + $0x58] sm:$0xff]  ;;  %v6358_v16 = vld [vmem:[%s6583_s11] ss:$0 sm:$0xff] }
 0x4cf   : > { %3579 = vperm.xlu2 %4983, %v3549_v24   ;;  %v2699_v24 = vadd.f32 %v2670_v48, %v2473_v27  ;;  %v4534_v27 = vld [vmem:[#allocation17 + $0x24] sm:$0xf0]  ;;  %v4531_v48 = vld [vmem:[#allocation17 + $0x14] sm:$0xf] }
 0x4d0   : > { %2976 = vmatmul.bf16.gmra.mxu3 %v2888_v61  ;;  %v2824_v2 = vpop.permute.xlu2 %2823  ;;  %v6331_v61 = vpop.f32.mrf.mxu3  ;;  %v4320_v3 = vor.u32 %v4534_v27, %v4319_v23 }
 0x4d1   : > { %v2877_v19 = vmul.f32 %v2824_v2, %v2698_v53  ;;  %v2673_v2 = vadd.f32 %v2672_v7, %v6322_v35  ;;  %v4312_v7 = vor.u32 %v4532_v59, %v4311_v29  ;;  %v6695_v29 = vld [vmem:[#allocation38_spill] sm:$0xff] }
 0x4d3   : > { %v2819_v50 = vpop.permute.xlu0 %2818 }
 0x4d4   : > { %v2814_v15 = vpop.permute.xlu1 %2813  ;;  %v2876_v51 = vmul.f32 %v2819_v50, %v2697_v30  ;;  %v4356_v50 = vor.u32 %v4541_v25, %v4353_v41  ;;  %v4343_v30 = vld [vmem:[#allocation17 + $0x50] sm:$0xf]  ;;  %v4303_v25 = vld [vmem:[#allocation17] sm:$0xf] }
 0x4d5   : > { %v2875_v6 = vmul.f32 %v2814_v15, %v2696_v58 }
 0x4d6   : > { %3204 = vmatpush.bf16.msra.mxu2 %v4356_v50 }
 0x4d7   : > { %3594 = vperm.xlu2 %4983, %v3552_v37   ;;  %v2889_v17 = vpack.c.bf16 %v2876_v51, %v2875_v6  ;;  %v4540_v6 = vld [vmem:[#allocation17 + $0x54] sm:$0xf0]  ;;  %v4539_v51 = vld [vmem:[#allocation17 + $0x54] sm:$0xf] }
 0x4d8   : > { %v6336_v54 = vpop.f32.mrf.mxu3 }
 0x4df   : > { %3609 = vperm.xlu2 %4983, %v3555_v22   ;;  %v4344_v22 = vor.u32 %v4540_v6, %v4343_v30 }
 0x4e0   : > { %2981 = vmatmul.bf16.gmra.mxu3 %v2889_v17  ;;  %v4345_v17 = vld [vmem:[#allocation17 + $0x58] sm:$0xf0] }
 0x4e1   : > { %v4348_v43 = vor.u32 %v4539_v51, %v4345_v17  ;;  %3156 = vmatpush.bf16.msra.mxu1 %v4344_v22  ;;  %v3551_v22 = vld [vmem:[%s5706_s21 + $0x28] sm:$0xff]  ;;  %v2678_v17 = vadd.f32 %v2677_v26, %v6328_v4 }
 0x4e2   : > { %v6694_v26 = vld [vmem:[#allocation37_spill] sm:$0xff] }
 0x4e3   : > { %3205 = vmatpush.bf16.msra.mxu2 %v4348_v43 }
 0x4e7   : > { %3624 = vperm.xlu2 %4983, %v3558_v31  }
 0x4ef   : > { %3639 = vperm.xlu2 %4983, %v3561_v47   ;;  %v4335_v47 = vld [vmem:[#allocation17 + $0x40] sm:$0xf] }
 0x4f0   : > { %v4336_v40 = vor.u32 %v4538_v34, %v4335_v47  ;;  %v3559_v47 = vld [vmem:[%s5706_s21 + $0x68] sm:$0xff] }
 0x4f2   : > { %3157 = vmatpush.bf16.msra.mxu1 %v4336_v40 }
 0x4f6   : > { %3158 = vmatpush.bf16.msra.mxu1 %v4328_v13 }
 0x4fa   : > { %3159 = vmatpush.bf16.msra.mxu1 %v4320_v3 }
 0x4fe   : > { %v2333_v63 = vpop.xlane.xlu0 %2332  ;;  %3160 = vmatpush.bf16.msra.mxu1 %v4312_v7 }
 0x4ff   : > { %v2327_v12 = vpop.xlane.xlu1 %2326  ;;  %v2351_v14 = vadd.f32 %v2333_v63, %v2287_v49  ;;  %v4329_v63 = vld [vmem:[#allocation17 + $0x38] sm:$0xf0] }
 0x500   : > { %v2349_v38 = vadd.f32 %v2327_v12, %v2285_v60  ;;  %v4535_v60 = vld [vmem:[#allocation17 + $0x34] sm:$0xf]  ;;  %v2674_v12 = vpop.f32.mrf.mxu0 }
 0x501   : > { %2368 = vst.msk [vmem:[#allocation4 + $0x70] sm:$0xff] %vm1568_vm0, %v2351_v14  ;;  %v2675_v57 = vadd.f32 %v2674_v12, %v6324_v39 }
 0x502   : > { %2366 = vst.msk [vmem:[#allocation4 + $0x60] sm:$0xff] %vm1568_vm0, %v2349_v38 }
 0x508   : > { %v2773_v5 = vld [vmem:[#allocation4 + $0x70] sm:$0xff] }
 0x509   : > { %v2771_v1 = vld [vmem:[#allocation4 + $0x60] sm:$0xff]  ;;  %5109 = vrcp.f32 %v2773_v5  ;;  %v4332_v5 = vor.u32 %v4535_v60, %v4329_v63 }
 0x50a   : > { %5111 = vrcp.f32 %v2771_v1  ;;  %v6693_v63 = vld [vmem:[#allocation36_spill] sm:$0xff] }
 0x50b   : > { %v3012_v12 = vunpack.c.l.bf16 %v6693_v63 }
 0x50f   : > { %v5110_v45 = vpop.eup %5109 }
 0x510   : > { %v5112_v52 = vpop.eup %5111  ;;  %2863 = vperm.xlu0 %4981, %v5110_v45   ;;  %v3553_v45 = vld [vmem:[%s5706_s21 + $0x38] sm:$0xff] }
 0x511   : > { %2853 = vperm.xlu1 %4982, %v5112_v52   ;;  %v2429_v8 = vpop.permute.xlu0 %2428 }
 0x512   : > { %v2336_v9 = vpop.xlane.xlu2 %2335  ;;  %v2474_v38 = vmul.f32 0.0, %v2429_v8  ;;  %v4530_v8 = vld [vmem:[#allocation17 + $0x4] sm:$0xf0] }
 0x513   : > { %v2352_v32 = vadd.f32 %v2336_v9, %v2288_v44  ;;  %v6341_v9 = vpop.f32.mrf.mxu3  ;;  %v4304_v41 = vor.u32 %v4530_v8, %v4303_v25 }
 0x514   : > { %v2700_v52 = vadd.f32 %v2673_v2, %v2474_v38 }
 0x515   : > { %2369 = vst.msk [vmem:[#allocation4 + $0x78] sm:$0xff] %vm1568_vm0, %v2352_v32  ;;  %v4533_v32 = vld [vmem:[#allocation17 + $0x24] sm:$0xf]  ;;  %3161 = vmatpush.bf16.msra.mxu1 %v4304_v41 }
 0x516   : > { %v4324_v55 = vor.u32 %v4533_v32, %v4321_v20 }
 0x517   : > { %v2829_v37 = vpop.permute.xlu1 %2828 }
 0x518   : > { %v2878_v15 = vmul.f32 %v2829_v37, %v2699_v24  ;;  %3569 = vperm.xlu0 %4981, %v3547_v33   ;;  %v3548_v33 = vld [vmem:[%s5706_s21 + $0x10] sm:$0xff]  ;;  %v4316_v24 = vor.u32 %v4531_v48, %v4313_v36  ;;  %v2679_v37 = vpop.f32.mrf.mxu1 }
 0x519   : > { %2458 = vperm.xlu1 %4982, %v5108_v56   ;;  %v4340_v56 = vor.u32 %v4537_v10, %v4337_v0  ;;  %v2834_v14 = vpop.permute.xlu0 %2833  ;;  %v2680_v50 = vadd.f32 %v2679_v37, %v6331_v61  ;;  %v3554_v0 = vld [vmem:[%s5706_s21 + $0x40] sm:$0xff] }
 0x51a   : > { %v2890_v58 = vpack.c.bf16 %v2878_v15, %v2877_v19  ;;  %v2879_v35 = vmul.f32 %v2834_v14, %v2700_v52  ;;  %v4529_v19 = vld [vmem:[#allocation17 + $0x4] sm:$0xf]  ;;  %v4305_v15 = vld [vmem:[#allocation17 + $0x8] sm:$0xf0]  ;;  %v2844_v34 = vpop.permute.xlu2 %2843  ;;  %v3013_v14 = vunpack.c.h.bf16 %v6693_v63  ;;  %v3015_v52 = vunpack.c.h.bf16 %v6694_v26  ;;  %v4560_v63 = vld [vmem:[#allocation19 + $0x78] sm:$0xff] }
 0x51b   : > { %3206 = vmatpush.bf16.msra.mxu2 %v4340_v56  ;;  %v4308_v6 = vor.u32 %v4529_v19, %v4305_v15  ;;  %v6346_v51 = vpop.f32.mrf.mxu3  ;;  %3481 = vmatpush.bf16.msra.mxu3 %v4560_v63 }
 0x51c   : > { %2986 = vmatmul.bf16.gmra.mxu3 %v2890_v58  ;;  %v2774_v31 = vld [vmem:[#allocation4 + $0x78] sm:$0xff] }
 0x51d   : > { %5113 = vrcp.f32 %v2774_v31 }
 0x51f   : > { %v2434_v49 = vpop.permute.xlu1 %2433  ;;  %3207 = vmatpush.bf16.msra.mxu2 %v4332_v5 }
 0x520   : > { %3584 = vperm.xlu0 %4981, %v3550_v21   ;;  %v2475_v62 = vmul.f32 0.0, %v2434_v49  ;;  %v3560_v49 = vld [vmem:[%s5706_s21 + $0x70] sm:$0xff]  ;;  %v2682_v7 = vpop.f32.mrf.mxu1  ;;  %s6702_s21 = sld [smem:[#allocation62_spill]] }
 0x521   : > { %v2439_v42 = vpop.permute.xlu0 %2438  ;;  %v2683_v8 = vadd.f32 %v2682_v7, %v6336_v54  ;;  %v4546_v7 = vld [vmem:[#allocation19 + $0x8] sm:$0xff] }
 0x522   : > { %v2701_v44 = vadd.f32 %v2675_v57, %v2475_v62  ;;  %v2476_v58 = vmul.f32 0.0, %v2439_v42 }
 0x523   : > { %v5114_v1 = vpop.eup %5113  ;;  %3208 = vmatpush.bf16.msra.mxu2 %v4324_v55  ;;  %v6352_v56 = vpop.f32.mrf.mxu3 }
 0x524   : > { %2868 = vperm.xlu1 %4982, %v5114_v1   ;;  %v2702_v31 = vadd.f32 %v2678_v17, %v2476_v58  ;;  %v2464_v17 = vpop.permute.xlu2 %2463 }
 0x526   : > { %v2881_v10 = vmul.f32 %v2844_v34, %v2702_v31 }
 0x527   : > { %v2839_v11 = vpop.permute.xlu1 %2838  ;;  %3209 = vmatpush.bf16.msra.mxu2 %v4316_v24 }
 0x528   : > { %v2880_v39 = vmul.f32 %v2839_v11, %v2701_v44  ;;  %3599 = vperm.xlu0 %4981, %v3553_v45   ;;  %v3014_v45 = vunpack.c.l.bf16 %v6694_v26  ;;  %v2684_v42 = vpop.f32.mrf.mxu1 }
 0x529   : > { %v2849_v43 = vpop.permute.xlu0 %2848  ;;  %v2685_v37 = vadd.f32 %v2684_v42, %v6341_v9 }
 0x52a   : > { %v2891_v53 = vpack.c.bf16 %v2880_v39, %v2879_v35  ;;  %v3016_v35 = vunpack.c.l.bf16 %v6695_v29  ;;  %v3017_v39 = vunpack.c.h.bf16 %v6695_v29  ;;  %v4556_v29 = vld [vmem:[#allocation19 + $0x58] sm:$0xff] }
 0x52b   : > { %3210 = vmatpush.bf16.msra.mxu2 %v4308_v6 }
 0x52c   : > { %2991 = vmatmul.bf16.gmra.mxu3 %v2891_v53  ;;  %3574 = vperm.xlu1 %4982, %v3548_v33  }
 0x52f   : > { %v2444_v46 = vpop.permute.xlu1 %2443 }
 0x530   : > { %v2477_v30 = vmul.f32 0.0, %v2444_v46  ;;  %3614 = vperm.xlu0 %4981, %v3556_v18   ;;  %v2687_v6 = vpop.f32.mrf.mxu1 }
 0x531   : > { %v2454_v53 = vpop.permute.xlu0 %2453  ;;  %v2688_v31 = vadd.f32 %v2687_v6, %v6346_v51 }
 0x532   : > { %v2703_v21 = vadd.f32 %v2680_v50, %v2477_v30  ;;  %v2479_v18 = vmul.f32 0.0, %v2454_v53 }
 0x534   : > { %3589 = vperm.xlu1 %4982, %v3551_v22   ;;  %v2882_v61 = vmul.f32 %v2849_v43, %v2703_v21  ;;  %v2705_v41 = vadd.f32 %v2685_v37, %v2479_v18  ;;  %v2481_v43 = vmul.f32 0.0, %v2464_v17  ;;  %v4554_v37 = vld [vmem:[#allocation19 + $0x48] sm:$0xff] }
 0x536   : > { %v2892_v40 = vpack.c.bf16 %v2882_v61, %v2881_v10 }
 0x537   : > { %v2449_v24 = vpop.permute.xlu1 %2448 }
 0x538   : > { %3629 = vperm.xlu0 %4981, %v3559_v47   ;;  %v2478_v25 = vmul.f32 0.0, %v2449_v24  ;;  %v2689_v47 = vpop.f32.mrf.mxu1  ;;  %v4555_v24 = vld [vmem:[#allocation19 + $0x50] sm:$0xff] }
 0x539   : > { %v2859_v46 = vpop.permute.xlu0 %2858  ;;  %v2690_v54 = vadd.f32 %v2689_v47, %v6352_v56 }
 0x53a   : > { %v2704_v19 = vadd.f32 %v2683_v8, %v2478_v25  ;;  %v2884_v50 = vmul.f32 %v2859_v46, %v2705_v41  ;;  %v4545_v25 = vld [vmem:[#allocation19] sm:$0xff] }
 0x53b   : > { %v2707_v9 = vadd.f32 %v2690_v54, %v2481_v43  ;;  %v4553_v41 = vld [vmem:[#allocation19 + $0x40] sm:$0xff] }
 0x53c   : > { %2996 = vmatmul.bf16.gmra.mxu3 %v2892_v40  ;;  %3604 = vperm.xlu1 %4982, %v3554_v0  }
 0x543   : > { %v2972_v4 = vpop.f32.mrf.mxu3 }
 0x544   : > { %3619 = vperm.xlu1 %4982, %v3557_v28   ;;  %v2973_v60 = vadd.f32 %v6358_v16, %v2972_v4 }
 0x546   : > { %v6365_v62 = vadd.f32 %v3012_v12, %v2973_v60  ;;  %v4551_v60 = vld [vmem:[#allocation19 + $0x30] sm:$0xff]  ;;  %v6696_v12 = vld [vmem:[#allocation39_spill] sm:$0xff] }
 0x547   : > { %v3019_v56 = vunpack.c.h.bf16 %v6696_v12 }
 0x54b   : > { %v2974_v13 = vpop.f32.mrf.mxu3 }
 0x54c   : > { %v2975_v38 = vadd.f32 %v6358_v16, %v2974_v13  ;;  %3634 = vperm.xlu1 %4982, %v3560_v49   ;;  %v4552_v49 = vld [vmem:[#allocation19 + $0x38] sm:$0xff] }
 0x54d   : > { %3432 = vmatpush.bf16.msra.mxu0 %v4552_v49 }
 0x54e   : > { %v6367_v5 = vadd.f32 %v3013_v14, %v2975_v38  ;;  %v3018_v14 = vunpack.c.l.bf16 %v6696_v12  ;;  %v4550_v38 = vld [vmem:[#allocation19 + $0x28] sm:$0xff] }
 0x550   : > { %v3044_v1 = vpack.c.bf16 %v6367_v5, %v6365_v62 }
 0x551   : > { %3433 = vmatpush.bf16.msra.mxu0 %v4551_v60 }
 0x552   : > { %3162 = vmatmul.bf16.vlgmr.msra.gmra.mxu1 %v3044_v1  ;;  %3211 = vmatmul.bf16.vlgmr.msra.gmra.mxu2 %v3044_v1 }
 0x553   : > { %v2977_v2 = vpop.f32.mrf.mxu3 }
 0x554   : > { %v2978_v57 = vadd.f32 %v6358_v16, %v2977_v2  ;;  %v4559_v2 = vld [vmem:[#allocation19 + $0x70] sm:$0xff] }
 0x555   : > { %3434 = vmatpush.bf16.msra.mxu0 %v4550_v38  ;;  %3482 = vmatpush.bf16.msra.mxu3 %v4559_v2 }
 0x556   : > { %v6375_v27 = vadd.f32 %v3014_v45, %v2978_v57  ;;  %v4549_v45 = vld [vmem:[#allocation19 + $0x20] sm:$0xff] }
 0x559   : > { %3435 = vmatpush.bf16.msra.mxu0 %v4549_v45 }
 0x55b   : > { %v2979_v44 = vpop.f32.mrf.mxu3 }
 0x55c   : > { %v2980_v23 = vadd.f32 %v6358_v16, %v2979_v44  ;;  %v4558_v44 = vld [vmem:[#allocation19 + $0x68] sm:$0xff] }
 0x55d   : > { %3483 = vmatpush.bf16.msra.mxu3 %v4558_v44 }
 0x55e   : > { %v6377_v11 = vadd.f32 %v3015_v52, %v2980_v23 }
 0x560   : > { %v3045_v3 = vpack.c.bf16 %v6377_v11, %v6375_v27 }
 0x562   : > { %3167 = vmatmul.bf16.gmra.mxu1 %v3045_v3  ;;  %3216 = vmatmul.bf16.gmra.mxu2 %v3045_v3  ;;  %v4548_v3 = vld [vmem:[#allocation19 + $0x18] sm:$0xff] }
 0x563   : > { %v2982_v32 = vpop.f32.mrf.mxu3  ;;  %3436 = vmatpush.bf16.msra.mxu0 %v4548_v3 }
 0x564   : > { %v2983_v20 = vadd.f32 %v6358_v16, %v2982_v32  ;;  %v4557_v32 = vld [vmem:[#allocation19 + $0x60] sm:$0xff] }
 0x565   : > { %3484 = vmatpush.bf16.msra.mxu3 %v4557_v32 }
 0x566   : > { %v6385_v48 = vadd.f32 %v3016_v35, %v2983_v20  ;;  %v4547_v20 = vld [vmem:[#allocation19 + $0x10] sm:$0xff] }
 0x567   : > { %3437 = vmatpush.bf16.msra.mxu0 %v4547_v20 }
 0x569   : > { %3485 = vmatpush.bf16.msra.mxu3 %v4556_v29 }
 0x56b   : > { %v2984_v55 = vpop.f32.mrf.mxu3  ;;  %3438 = vmatpush.bf16.msra.mxu0 %v4546_v7 }
 0x56c   : > { %v2985_v59 = vadd.f32 %v6358_v16, %v2984_v55 }
 0x56d   : > { %3486 = vmatpush.bf16.msra.mxu3 %v4555_v24 }
 0x56e   : > { %v6387_v36 = vadd.f32 %v3017_v39, %v2985_v59  ;;  %v6697_v39 = vld [vmem:[#allocation40_spill] sm:$0xff] }
 0x56f   : > { %v3020_v55 = vunpack.c.l.bf16 %v6697_v39  ;;  %v3021_v59 = vunpack.c.h.bf16 %v6697_v39  ;;  %3439 = vmatpush.bf16.msra.mxu0 %v4545_v25 }
 0x570   : > { %v3046_v33 = vpack.c.bf16 %v6387_v36, %v6385_v48 }
 0x571   : > { %3487 = vmatpush.bf16.msra.mxu3 %v4554_v37 }
 0x572   : > { %3172 = vmatmul.bf16.gmra.mxu1 %v3046_v33  ;;  %3221 = vmatmul.bf16.gmra.mxu2 %v3046_v33 }
 0x575   : > { %3488 = vmatpush.bf16.msra.mxu3 %v4553_v41 }
 0x582   : > { %v2864_v34 = vpop.permute.xlu0 %2863 }
 0x583   : > { %v2854_v15 = vpop.permute.xlu1 %2853 }
 0x584   : > { %v2883_v58 = vmul.f32 %v2854_v15, %v2704_v19  ;;  %v6698_v15 = vld [vmem:[#allocation41_spill] sm:$0xff] }
 0x586   : > { %v2893_v30 = vpack.c.bf16 %v2884_v50, %v2883_v58  ;;  %v3022_v50 = vunpack.c.l.bf16 %v6698_v15  ;;  %v3023_v58 = vunpack.c.h.bf16 %v6698_v15 }
 0x588   : > { %3001 = vmatmul.bf16.gmra.mxu3 %v2893_v30 }
 0x58b   : > { %v2459_v22 = vpop.permute.xlu1 %2458 }
 0x58c   : > { %v2480_v21 = vmul.f32 0.0, %v2459_v22 }
 0x58e   : > { %v2706_v61 = vadd.f32 %v2688_v31, %v2480_v21  ;;  %v3068_v31 = vld [vmem:[%s6699_s8] sm:$0x3] }
 0x58f   : > { %v6428_v47 = vperm.slane %v3068_v31, 0 }
 0x590   : > { %v2885_v0 = vmul.f32 %v2864_v34, %v2706_v61  ;;  %v6431_v34 = vperm.slane %v3068_v31, 1 }
 0x596   : > { %v2869_v10 = vpop.permute.xlu1 %2868 }
 0x597   : > { %v2886_v40 = vmul.f32 %v2869_v10, %v2707_v9 }
 0x599   : > { %v2894_v28 = vpack.c.bf16 %v2886_v40, %v2885_v0 }
 0x59b   : > { %3006 = vmatmul.bf16.gmra.mxu3 %v2894_v28 }
 0x59f   : > { %v2987_v4 = vpop.f32.mrf.mxu3 }
 0x5a0   : > { %v2988_v51 = vadd.f32 %v6358_v16, %v2987_v4 }
 0x5a2   : > { %v6399_v57 = vadd.f32 %v3018_v14, %v2988_v51 }
 0x5a7   : > { %v2989_v13 = vpop.f32.mrf.mxu3 }
 0x5a8   : > { %v2990_v1 = vadd.f32 %v6358_v16, %v2989_v13 }
 0x5aa   : > { %v6401_v26 = vadd.f32 %v3019_v56, %v2990_v1 }
 0x5ac   : > { %v3047_v52 = vpack.c.bf16 %v6401_v26, %v6399_v57 }
 0x5ae   : > { %3177 = vmatmul.bf16.gmra.mxu1 %v3047_v52  ;;  %3226 = vmatmul.bf16.gmra.mxu2 %v3047_v52 }
 0x5af   : > { %v2992_v23 = vpop.f32.mrf.mxu3 }
 0x5b0   : > { %v2993_v35 = vadd.f32 %v6358_v16, %v2992_v23 }
 0x5b2   : > { %v6409_v42 = vadd.f32 %v3020_v55, %v2993_v35 }
 0x5b7   : > { %v2994_v33 = vpop.f32.mrf.mxu3 }
 0x5b8   : > { %v2995_v53 = vadd.f32 %v6358_v16, %v2994_v33 }
 0x5ba   : > { %v6411_v18 = vadd.f32 %v3021_v59, %v2995_v53 }
 0x5bc   : > { %v3048_v8 = vpack.c.bf16 %v6411_v18, %v6409_v42 }
 0x5be   : > { %3182 = vmatmul.bf16.gmra.mxu1 %v3048_v8  ;;  %3231 = vmatmul.bf16.gmra.mxu2 %v3048_v8 }
 0x5bf   : > { %v2997_v46 = vpop.f32.mrf.mxu3 }
 0x5c0   : > { %v2998_v19 = vadd.f32 %v6358_v16, %v2997_v46 }
 0x5c2   : > { %v6419_v22 = vadd.f32 %v3022_v50, %v2998_v19 }
 0x5c7   : > { %v2999_v30 = vpop.f32.mrf.mxu3 }
 0x5c8   : > { %v3000_v6 = vadd.f32 %v6358_v16, %v2999_v30 }
 0x5ca   : > { %v6421_v17 = vadd.f32 %v3023_v58, %v3000_v6  ;;  %v6700_v58 = vld [vmem:[#allocation42_spill] sm:$0xff] }
 0x5cb   : > { %v3024_v30 = vunpack.c.l.bf16 %v6700_v58  ;;  %v3025_v6 = vunpack.c.h.bf16 %v6700_v58 }
 0x5cc   : > { %v3049_v21 = vpack.c.bf16 %v6421_v17, %v6419_v22 }
 0x5ce   : > { %3187 = vmatmul.bf16.gmra.mxu1 %v3049_v21  ;;  %3236 = vmatmul.bf16.gmra.mxu2 %v3049_v21 }
 0x5cf   : > { %v3163_v43 = vpop.f32.mrf.mxu1 }
 0x5d0   : > { %v3164_v61 = vadd.f32 %v3163_v43, %v6428_v47 }
 0x5d2   : > { %v3252_v0 = vmax.f32 %v3164_v61, 0.0 }
 0x5d5   : > { %v3212_v54 = vpop.f32.mrf.mxu2 }
 0x5d6   : > { %v3213_v28 = vadd.f32 %v3212_v54, %v6431_v34 }
 0x5d7   : > { %v3165_v9 = vpop.f32.mrf.mxu1 }
 0x5d8   : > { %v3166_v10 = vadd.f32 %v3165_v9, %v6428_v47  ;;  %v3253_v51 = vmax.f32 %v3213_v28, 0.0 }
 0x5da   : > { %v3254_v40 = vmax.f32 %v3166_v10, 0.0 }
 0x5dc   : > { %v3284_v4 = vpack.c.bf16 %v3254_v40, %v3252_v0  ;;  %v6701_v0 = vld [vmem:[#allocation43_spill] sm:$0xff] }
 0x5dd   : > { %v3214_v49 = vpop.f32.mrf.mxu2  ;;  %v3026_v40 = vunpack.c.l.bf16 %v6701_v0  ;;  %v3027_v28 = vunpack.c.h.bf16 %v6701_v0 }
 0x5de   : > { %v3215_v60 = vadd.f32 %v3214_v49, %v6431_v34  ;;  %3440 = vmatmul.bf16.vlgmr.msra.gmra.mxu0 %v3284_v4 }
 0x5df   : > { %v3168_v63 = vpop.f32.mrf.mxu1 }
 0x5e0   : > { %v3255_v12 = vmax.f32 %v3215_v60, 0.0  ;;  %v3169_v13 = vadd.f32 %v3168_v63, %v6428_v47 }
 0x5e2   : > { %v3285_v14 = vpack.c.bf16 %v3255_v12, %v3253_v51  ;;  %v3256_v2 = vmax.f32 %v3169_v13, 0.0 }
 0x5e4   : > { %3489 = vmatmul.bf16.vlgmr.msra.gmra.mxu3 %v3285_v14 }
 0x5e5   : > { %v3217_v56 = vpop.f32.mrf.mxu2 }
 0x5e6   : > { %v3218_v52 = vadd.f32 %v3217_v56, %v6431_v34 }
 0x5e7   : > { %v3170_v38 = vpop.f32.mrf.mxu1 }
 0x5e8   : > { %v3171_v1 = vadd.f32 %v3170_v38, %v6428_v47  ;;  %v3257_v20 = vmax.f32 %v3218_v52, 0.0 }
 0x5ea   : > { %v3258_v45 = vmax.f32 %v3171_v1, 0.0 }
 0x5ec   : > { %v3286_v44 = vpack.c.bf16 %v3258_v45, %v3256_v2 }
 0x5ed   : > { %v3219_v23 = vpop.f32.mrf.mxu2 }
 0x5ee   : > { %v3220_v3 = vadd.f32 %v3219_v23, %v6431_v34  ;;  %3445 = vmatmul.bf16.gmra.mxu0 %v3286_v44 }
 0x5ef   : > { %v3173_v32 = vpop.f32.mrf.mxu1 }
 0x5f0   : > { %v3259_v29 = vmax.f32 %v3220_v3, 0.0  ;;  %v3174_v55 = vadd.f32 %v3173_v32, %v6428_v47 }
 0x5f2   : > { %v3287_v35 = vpack.c.bf16 %v3259_v29, %v3257_v20  ;;  %v3260_v7 = vmax.f32 %v3174_v55, 0.0 }
 0x5f4   : > { %3494 = vmatmul.bf16.gmra.mxu3 %v3287_v35 }
 0x5f5   : > { %v3222_v39 = vpop.f32.mrf.mxu2 }
 0x5f6   : > { %v3223_v24 = vadd.f32 %v3222_v39, %v6431_v34 }
 0x5f7   : > { %v3175_v59 = vpop.f32.mrf.mxu1 }
 0x5f8   : > { %v3176_v33 = vadd.f32 %v3175_v59, %v6428_v47  ;;  %v3261_v46 = vmax.f32 %v3223_v24, 0.0 }
 0x5fa   : > { %v3262_v53 = vmax.f32 %v3176_v33, 0.0 }
 0x5fc   : > { %v3288_v25 = vpack.c.bf16 %v3262_v53, %v3260_v7 }
 0x5fd   : > { %v3224_v8 = vpop.f32.mrf.mxu2 }
 0x5fe   : > { %v3225_v37 = vadd.f32 %v3224_v8, %v6431_v34  ;;  %3450 = vmatmul.bf16.gmra.mxu0 %v3288_v25 }
 0x600   : > { %v3263_v41 = vmax.f32 %v3225_v37, 0.0 }
 0x602   : > { %v3289_v19 = vpack.c.bf16 %v3263_v41, %v3261_v46 }
 0x604   : > { %3499 = vmatmul.bf16.gmra.mxu3 %v3289_v19 }
 0x60b   : > { %v3002_v15 = vpop.f32.mrf.mxu3 }
 0x60c   : > { %v3003_v50 = vadd.f32 %v6358_v16, %v3002_v15 }
 0x60e   : > { %v6448_v43 = vadd.f32 %v3024_v30, %v3003_v50 }
 0x613   : > { %v3004_v21 = vpop.f32.mrf.mxu3 }
 0x614   : > { %v3005_v31 = vadd.f32 %v6358_v16, %v3004_v21 }
 0x616   : > { %v6450_v54 = vadd.f32 %v3025_v6, %v3005_v31 }
 0x618   : > { %v3050_v61 = vpack.c.bf16 %v6450_v54, %v6448_v43 }
 0x61a   : > { %3192 = vmatmul.bf16.gmra.mxu1 %v3050_v61  ;;  %3241 = vmatmul.bf16.gmra.mxu2 %v3050_v61 }
 0x61e   : > { %v3007_v9 = vpop.f32.mrf.mxu3 }
 0x61f   : > { %v3008_v10 = vadd.f32 %v6358_v16, %v3007_v9 }
 0x621   : > { %v6458_v60 = vadd.f32 %v3026_v40, %v3008_v10 }
 0x626   : > { %v3009_v4 = vpop.f32.mrf.mxu3 }
 0x627   : > { %v3010_v49 = vadd.f32 %v6358_v16, %v3009_v4  ;;  %v6479_v4 = vld [vmem:[%s6702_s21] ss:$0 sm:$0xff] }
 0x629   : > { %v6460_v63 = vadd.f32 %v3027_v28, %v3010_v49 }
 0x62b   : > { %v3178_v51 = vpop.f32.mrf.mxu1  ;;  %v3051_v12 = vpack.c.bf16 %v6460_v63, %v6458_v60 }
 0x62c   : > { %v3179_v56 = vadd.f32 %v3178_v51, %v6428_v47 }
 0x62d   : > { %3197 = vmatmul.bf16.gmra.mxu1 %v3051_v12  ;;  %3246 = vmatmul.bf16.gmra.mxu2 %v3051_v12 }
 0x62e   : > { %v3264_v1 = vmax.f32 %v3179_v56, 0.0 }
 0x631   : > { %v3227_v14 = vpop.f32.mrf.mxu2 }
 0x632   : > { %v3228_v16 = vadd.f32 %v3227_v14, %v6431_v34 }
 0x633   : > { %v3180_v13 = vpop.f32.mrf.mxu1 }
 0x634   : > { %v3181_v38 = vadd.f32 %v3180_v13, %v6428_v47  ;;  %v3265_v3 = vmax.f32 %v3228_v16, 0.0 }
 0x636   : > { %v3266_v2 = vmax.f32 %v3181_v38, 0.0 }
 0x638   : > { %v3290_v45 = vpack.c.bf16 %v3266_v2, %v3264_v1 }
 0x639   : > { %v3229_v52 = vpop.f32.mrf.mxu2 }
 0x63a   : > { %v3230_v44 = vadd.f32 %v3229_v52, %v6431_v34  ;;  %3455 = vmatmul.bf16.gmra.mxu0 %v3290_v45  ;;  %v3565_v45 = vpop.permute.xlu2 %3564  ;;  %v3570_v52 = vpop.permute.xlu0 %3569 }
 0x63b   : > { %v3183_v23 = vpop.f32.mrf.mxu1 }
 0x63c   : > { %v3267_v32 = vmax.f32 %v3230_v44, 0.0  ;;  %v3184_v35 = vadd.f32 %v3183_v23, %v6428_v47 }
 0x63e   : > { %v3291_v20 = vpack.c.bf16 %v3267_v32, %v3265_v3  ;;  %v3268_v59 = vmax.f32 %v3184_v35, 0.0 }
 0x640   : > { %3504 = vmatmul.bf16.gmra.mxu3 %v3291_v20 }
 0x641   : > { %v3232_v29 = vpop.f32.mrf.mxu2 }
 0x642   : > { %v3233_v7 = vadd.f32 %v3232_v29, %v6431_v34 }
 0x643   : > { %v3185_v39 = vpop.f32.mrf.mxu1 }
 0x644   : > { %v3186_v55 = vadd.f32 %v3185_v39, %v6428_v47  ;;  %v3269_v37 = vmax.f32 %v3233_v7, 0.0 }
 0x646   : > { %v3270_v33 = vmax.f32 %v3186_v55, 0.0  ;;  %v3575_v55 = vpop.permute.xlu1 %3574 }
 0x648   : > { %v3292_v53 = vpack.c.bf16 %v3270_v33, %v3268_v59 }
 0x649   : > { %v3234_v24 = vpop.f32.mrf.mxu2 }
 0x64a   : > { %v3235_v25 = vadd.f32 %v3234_v24, %v6431_v34  ;;  %3460 = vmatmul.bf16.gmra.mxu0 %v3292_v53  ;;  %v3580_v24 = vpop.permute.xlu2 %3579 }
 0x64b   : > { %v3188_v8 = vpop.f32.mrf.mxu1 }
 0x64c   : > { %v3271_v46 = vmax.f32 %v3235_v25, 0.0  ;;  %v3189_v15 = vadd.f32 %v3188_v8, %v6428_v47 }
 0x64e   : > { %v3293_v41 = vpack.c.bf16 %v3271_v46, %v3269_v37  ;;  %v3272_v30 = vmax.f32 %v3189_v15, 0.0 }
 0x650   : > { %3509 = vmatmul.bf16.gmra.mxu3 %v3293_v41 }
 0x651   : > { %v3237_v19 = vpop.f32.mrf.mxu2 }
 0x652   : > { %v3238_v21 = vadd.f32 %v3237_v19, %v6431_v34 }
 0x653   : > { %v3190_v50 = vpop.f32.mrf.mxu1 }
 0x654   : > { %v3191_v58 = vadd.f32 %v3190_v50, %v6428_v47  ;;  %v3273_v0 = vmax.f32 %v3238_v21, 0.0 }
 0x656   : > { %v3274_v6 = vmax.f32 %v3191_v58, 0.0 }
 0x658   : > { %v3294_v31 = vpack.c.bf16 %v3274_v6, %v3272_v30 }
 0x659   : > { %v3239_v61 = vpop.f32.mrf.mxu2 }
 0x65a   : > { %v3240_v9 = vadd.f32 %v3239_v61, %v6431_v34  ;;  %3465 = vmatmul.bf16.gmra.mxu0 %v3294_v31 }
 0x65b   : > { %v3441_v10 = vpop.f32.mrf.mxu0 }
 0x65c   : > { %v3275_v40 = vmax.f32 %v3240_v9, 0.0  ;;  %v3442_v51 = vadd.f32 %v6479_v4, %v3441_v10 }
 0x65e   : > { %v3295_v28 = vpack.c.bf16 %v3275_v40, %v3273_v0 }
 0x660   : > { %3514 = vmatmul.bf16.gmra.mxu3 %v3295_v28 }
 0x663   : > { %v3443_v49 = vpop.f32.mrf.mxu0 }
 0x664   : > { %v3444_v56 = vadd.f32 %v6479_v4, %v3443_v49 }
 0x667   : > { %v3490_v12 = vpop.f32.mrf.mxu3 }
 0x668   : > { %v3491_v14 = vadd.f32 %v3490_v12, %v3442_v51 }
 0x66a   : > { %v3530_v1 = vadd.f32 %v3491_v14, %v6365_v62 }
 0x66b   : > { %v3446_v13 = vpop.f32.mrf.mxu0 }
 0x66c   : > { %v3642_v44 = vmul.f32 %v3565_v45, %v3530_v1  ;;  %v3447_v3 = vadd.f32 %v6479_v4, %v3446_v13 }
 0x66f   : > { %v3492_v38 = vpop.f32.mrf.mxu3 }
 0x670   : > { %v3493_v2 = vadd.f32 %v3492_v38, %v3444_v56 }
 0x672   : > { %v3531_v16 = vadd.f32 %v3493_v2, %v6367_v5 }
 0x673   : > { %v3448_v35 = vpop.f32.mrf.mxu0 }
 0x674   : > { %v3643_v23 = vmul.f32 %v3570_v52, %v3531_v16  ;;  %v3449_v33 = vadd.f32 %v6479_v4, %v3448_v35 }
 0x676   : > { %v3658_v32 = vadd.f32 %v3643_v23, %v3642_v44 }
 0x677   : > { %v3495_v20 = vpop.f32.mrf.mxu3 }
 0x678   : > { %v3496_v29 = vadd.f32 %v3495_v20, %v3447_v3 }
 0x67a   : > { %v3532_v39 = vadd.f32 %v3496_v29, %v6375_v27  ;;  %v3585_v27 = vpop.permute.xlu0 %3584 }
 0x67b   : > { %v3451_v25 = vpop.f32.mrf.mxu0 }
 0x67c   : > { %v3644_v59 = vmul.f32 %v3575_v55, %v3532_v39  ;;  %v3452_v37 = vadd.f32 %v6479_v4, %v3451_v25 }
 0x67e   : > { %v3659_v62 = vadd.f32 %v3658_v32, %v3644_v59 }
 0x67f   : > { %v3497_v7 = vpop.f32.mrf.mxu3 }
 0x680   : > { %v3498_v53 = vadd.f32 %v3497_v7, %v3449_v33 }
 0x682   : > { %v3533_v5 = vadd.f32 %v3498_v53, %v6377_v11 }
 0x683   : > { %v3453_v20 = vpop.f32.mrf.mxu0 }
 0x684   : > { %v3645_v8 = vmul.f32 %v3580_v24, %v3533_v5 }
 0x686   : > { %v3660_v46 = vadd.f32 %v3659_v62, %v3645_v8  ;;  %v3590_v8 = vpop.permute.xlu1 %3589 }
 0x687   : > { %v3500_v41 = vpop.f32.mrf.mxu3 }
 0x688   : > { %v3501_v19 = vadd.f32 %v3500_v41, %v3452_v37  ;;  %v3454_v37 = vadd.f32 %v6479_v4, %v3453_v20 }
 0x68a   : > { %v3534_v15 = vadd.f32 %v3501_v19, %v6385_v48 }
 0x68c   : > { %v3646_v50 = vmul.f32 %v3585_v27, %v3534_v15 }
 0x68e   : > { %v6491_v58 = vadd.f32 %v3660_v46, %v3646_v50  ;;  %v3595_v46 = vpop.permute.xlu2 %3594 }
 0x68f   : > { %v3502_v29 = vpop.f32.mrf.mxu3 }
 0x690   : > { %v3503_v41 = vadd.f32 %v3502_v29, %v3454_v37 }
 0x697   : > { %v3193_v30 = vpop.f32.mrf.mxu1 }
 0x698   : > { %v3194_v21 = vadd.f32 %v3193_v30, %v6428_v47  ;;  %v3600_v30 = vpop.permute.xlu0 %3599 }
 0x69a   : > { %v3276_v61 = vmax.f32 %v3194_v21, 0.0 }
 0x69d   : > { %v3242_v6 = vpop.f32.mrf.mxu2 }
 0x69e   : > { %v3243_v10 = vadd.f32 %v3242_v6, %v6431_v34  ;;  %v3535_v6 = vadd.f32 %v3503_v41, %v6387_v36 }
 0x69f   : > { %v3195_v31 = vpop.f32.mrf.mxu1 }
 0x6a0   : > { %v3196_v11 = vadd.f32 %v3195_v31, %v6428_v47  ;;  %v3277_v48 = vmax.f32 %v3243_v10, 0.0 }
 0x6a2   : > { %v3278_v9 = vmax.f32 %v3196_v11, 0.0 }
 0x6a4   : > { %v3296_v0 = vpack.c.bf16 %v3278_v9, %v3276_v61  ;;  %v3605_v61 = vpop.permute.xlu1 %3604 }
 0x6a5   : > { %v3244_v40 = vpop.f32.mrf.mxu2 }
 0x6a6   : > { %v3245_v28 = vadd.f32 %v3244_v40, %v6431_v34  ;;  %3470 = vmatmul.bf16.gmra.mxu0 %v3296_v0  ;;  %v3647_v40 = vmul.f32 %v3590_v8, %v3535_v6 }
 0x6a8   : > { %v3279_v49 = vmax.f32 %v3245_v28, 0.0 }
 0x6aa   : > { %v3297_v51 = vpack.c.bf16 %v3279_v49, %v3277_v48  ;;  %v3198_v12 = vpop.f32.mrf.mxu1 }
 0x6ab   : > { %v3199_v56 = vadd.f32 %v3198_v12, %v6428_v47 }
 0x6ac   : > { %3519 = vmatmul.bf16.gmra.mxu3 %v3297_v51  ;;  %v3610_v51 = vpop.permute.xlu2 %3609 }
 0x6ad   : > { %v3280_v1 = vmax.f32 %v3199_v56, 0.0 }
 0x6b0   : > { %v3247_v14 = vpop.f32.mrf.mxu2 }
 0x6b1   : > { %v3248_v16 = vadd.f32 %v3247_v14, %v6431_v34 }
 0x6b2   : > { %v3200_v13 = vpop.f32.mrf.mxu1 }
 0x6b3   : > { %v3201_v38 = vadd.f32 %v3200_v13, %v6428_v47  ;;  %v3281_v23 = vmax.f32 %v3248_v16, 0.0 }
 0x6b5   : > { %v3282_v2 = vmax.f32 %v3201_v38, 0.0  ;;  %v3662_v38 = vadd.f32 %v6491_v58, %v3647_v40 }
 0x6b7   : > { %v3298_v45 = vpack.c.bf16 %v3282_v2, %v3280_v1  ;;  %v3456_v35 = vpop.f32.mrf.mxu0 }
 0x6b8   : > { %v3249_v52 = vpop.f32.mrf.mxu2  ;;  %v3457_v19 = vadd.f32 %v6479_v4, %v3456_v35 }
 0x6b9   : > { %v3250_v44 = vadd.f32 %v3249_v52, %v6431_v34  ;;  %3475 = vmatmul.bf16.gmra.mxu0 %v3298_v45  ;;  %v3615_v45 = vpop.permute.xlu0 %3614 }
 0x6bb   : > { %v3283_v3 = vmax.f32 %v3250_v44, 0.0 }
 0x6bd   : > { %v3299_v32 = vpack.c.bf16 %v3283_v3, %v3281_v23 }
 0x6bf   : > { %3524 = vmatmul.bf16.gmra.mxu3 %v3299_v32  ;;  %v3458_v55 = vpop.f32.mrf.mxu0  ;;  %v3620_v32 = vpop.permute.xlu1 %3619 }
 0x6c0   : > { %v3459_v27 = vadd.f32 %v6479_v4, %v3458_v55 }
 0x6c3   : > { %v3505_v39 = vpop.f32.mrf.mxu3 }
 0x6c4   : > { %v3506_v50 = vadd.f32 %v3505_v39, %v3457_v19 }
 0x6c6   : > { %v3536_v9 = vadd.f32 %v3506_v50, %v6399_v57 }
 0x6c7   : > { %v3461_v47 = vpop.f32.mrf.mxu0  ;;  %v3635_v41 = vpop.permute.xlu1 %3634 }
 0x6c8   : > { %v3462_v11 = vadd.f32 %v6479_v4, %v3461_v47  ;;  %v3648_v12 = vmul.f32 %v3595_v46, %v3536_v9 }
 0x6ca   : > { %v3663_v52 = vadd.f32 %v3662_v38, %v3648_v12 }
 0x6cb   : > { %v3507_v59 = vpop.f32.mrf.mxu3 }
 0x6cc   : > { %v3508_v21 = vadd.f32 %v3507_v59, %v3459_v27 }
 0x6ce   : > { %v3537_v28 = vadd.f32 %v3508_v21, %v6401_v26 }
 0x6cf   : > { %v3463_v62 = vpop.f32.mrf.mxu0 }
 0x6d0   : > { %v3464_v10 = vadd.f32 %v6479_v4, %v3463_v62  ;;  %v3649_v57 = vmul.f32 %v3600_v30, %v3537_v28  ;;  %v3625_v62 = vpop.permute.xlu2 %3624 }
 0x6d2   : > { %v3664_v20 = vadd.f32 %v3663_v52, %v3649_v57 }
 0x6d3   : > { %v3510_v33 = vpop.f32.mrf.mxu3 }
 0x6d4   : > { %v3511_v0 = vadd.f32 %v3510_v33, %v3462_v11 }
 0x6d6   : > { %v3538_v36 = vadd.f32 %v3511_v0, %v6409_v42 }
 0x6d7   : > { %v3466_v53 = vpop.f32.mrf.mxu0 }
 0x6d8   : > { %v3467_v48 = vadd.f32 %v6479_v4, %v3466_v53  ;;  %v3650_v44 = vmul.f32 %v3605_v61, %v3538_v36  ;;  %v3640_v30 = vpop.permute.xlu2 %3639 }
 0x6da   : > { %v3665_v55 = vadd.f32 %v3664_v20, %v3650_v44 }
 0x6db   : > { %v3512_v7 = vpop.f32.mrf.mxu3 }
 0x6dc   : > { %v3513_v49 = vadd.f32 %v3512_v7, %v3464_v10 }
 0x6de   : > { %v3539_v2 = vadd.f32 %v3513_v49, %v6411_v18 }
 0x6df   : > { %v3468_v24 = vpop.f32.mrf.mxu0 }
 0x6e0   : > { %v3469_v56 = vadd.f32 %v6479_v4, %v3468_v24  ;;  %v3651_v29 = vmul.f32 %v3610_v51, %v3539_v2 }
 0x6e2   : > { %v3666_v7 = vadd.f32 %v3665_v55, %v3651_v29 }
 0x6e3   : > { %v3515_v5 = vpop.f32.mrf.mxu3 }
 0x6e4   : > { %v3516_v13 = vadd.f32 %v3515_v5, %v3467_v48 }
 0x6e6   : > { %v3540_v23 = vadd.f32 %v3516_v13, %v6419_v22 }
 0x6e8   : > { %v3652_v59 = vmul.f32 %v3615_v45, %v3540_v23 }
 0x6ea   : > { %v3667_v24 = vadd.f32 %v3666_v7, %v3652_v59 }
 0x6eb   : > { %v3517_v25 = vpop.f32.mrf.mxu3 }
 0x6ec   : > { %v3518_v16 = vadd.f32 %v3517_v25, %v3469_v56 }
 0x6ee   : > { %v3541_v58 = vadd.f32 %v3518_v16, %v6421_v17  ;;  %v3630_v17 = vpop.permute.xlu0 %3629 }
 0x6f0   : > { %v3653_v22 = vmul.f32 %v3620_v32, %v3541_v58 }
 0x6f2   : > { %v3668_v8 = vadd.f32 %v3667_v24, %v3653_v22 }
 0x723   : > { %v3471_v34 = vpop.f32.mrf.mxu0 }
 0x724   : > { %v3472_v26 = vadd.f32 %v6479_v4, %v3471_v34 }
 0x72b   : > { %v3473_v31 = vpop.f32.mrf.mxu0 }
 0x72c   : > { %v3474_v3 = vadd.f32 %v6479_v4, %v3473_v31 }
 0x72f   : > { %v3520_v15 = vpop.f32.mrf.mxu3 }
 0x730   : > { %v3521_v42 = vadd.f32 %v3520_v15, %v3472_v26 }
 0x732   : > { %v3542_v47 = vadd.f32 %v3521_v42, %v6448_v43 }
 0x734   : > { %v3654_v25 = vmul.f32 %v3625_v62, %v3542_v47 }
 0x736   : > { %v3476_v1 = vpop.f32.mrf.mxu0  ;;  %v3669_v19 = vadd.f32 %v3668_v8, %v3654_v25 }
 0x737   : > { %v3522_v14 = vpop.f32.mrf.mxu3  ;;  %v3477_v39 = vadd.f32 %v6479_v4, %v3476_v1 }
 0x738   : > { %v3523_v35 = vadd.f32 %v3522_v14, %v3474_v3 }
 0x73a   : > { %v3543_v53 = vadd.f32 %v3523_v35, %v6450_v54 }
 0x73c   : > { %v3655_v37 = vmul.f32 %v3630_v17, %v3543_v53 }
 0x73e   : > { %v3478_v5 = vpop.f32.mrf.mxu0  ;;  %v3670_v50 = vadd.f32 %v3669_v19, %v3655_v37 }
 0x73f   : > { %v3479_v46 = vadd.f32 %v6479_v4, %v3478_v5 }
 0x742   : > { %v3525_v18 = vpop.f32.mrf.mxu3 }
 0x743   : > { %v3526_v33 = vadd.f32 %v3525_v18, %v3477_v39 }
 0x745   : > { %v3544_v34 = vadd.f32 %v3526_v33, %v6458_v60 }
 0x747   : > { %v3656_v15 = vmul.f32 %v3635_v41, %v3544_v34 }
 0x749   : > { %v3671_v6 = vadd.f32 %v3670_v50, %v3656_v15 }
 0x74a   : > { %v3527_v43 = vpop.f32.mrf.mxu3 }
 0x74b   : > { %v3528_v27 = vadd.f32 %v3527_v43, %v3479_v46 }
 0x74d   : > { %v3545_v54 = vadd.f32 %v3528_v27, %v6460_v63 }
 0x74f   : > { %v3657_v60 = vmul.f32 %v3640_v30, %v3545_v54 }
 0x751   : > { %v3672_v21 = vadd.f32 %v3671_v6, %v3657_v60 }
 0x753   : > { %v3673_v31 = vrot.slane %v3672_v21, 4 }
 0x755   : > { %v3674_v11 = vadd.f32 %v3673_v31, %v3672_v21 }
 0x757   : > { %v3675_v4 = vrot.slane %v3674_v11, 2 }
 0x759   : > { %v3676_v61 = vadd.f32 %v3675_v4, %v3674_v11 }
 0x75b   : > { %v3677_v63 = vrot.slane %v3676_v61, 1 }
 0x75d   : > { %v3678_v9 = vadd.f32 %v3677_v63, %v3676_v61 }
 0x75f   : > { %3679 = vst [vmem:[%s5758_s23] sm:$0x1] %v3678_v9 }
 0x760   : > { %5352 = shalt.err (!%p5349_p12)
}
 0x761   : > { %4858 = dma.vmem_to_hbm [thread:$0]  (%p5588_p3), %s3694_s26, 16, %s3696_s29, %s3681_s12  }
 0x762 PF: > { %s6705_s0 = sld [smem:[#allocation30_spill]] }
 0x763   : > { %s6706_s23 = sld [smem:[#allocation26_spill]] }
 0x768   : > { %p4900_p13 = scmp.ge.s32.totalorder %s6705_s0, 2 }
 0x769   : > { %s3707_s21 = sand.u32 1, %s6706_s23  }
 0x76a   : > { %p4883_p0 = pnand %p4900_p13, %p5597_p8  ;;  %s3708_s20 = scalar_lea.sflag [#allocation10], %s3707_s21 }
 0x76c   : > { %p4884_p1 = pneg %p4883_p0 }
 0x76e   : > { %5402 = dma.done.wait (%p4884_p1), %s3708_s20, 16  }
 0x76f   : > { %5404 = vsyncadd (%p4884_p1), %s3708_s20, 4294967280  ;;  %s33_s28 = sadd.s32 1, %s6705_s0   ;;  %s6708_s30 = sld [smem:[#allocation27_spill]] }
 0x770   : > { %p30_p2 = scmp.ge.s32.totalorder %s33_s28, 6   ;;  %s6709_s23 = sld [smem:[#allocation35_spill]] }
 0x771   : > { %s6710_s24 = sld [smem:[#allocation28_spill]]  ;;  %s6714_s21 = smov %s5411_s22 }
 0x772   : > { %s6711_s25 = sld [smem:[#allocation29_spill]]  ;;  %32 = sbr.rel (!%p30_p2) target bundleno = 17 (0x11), region = 171 }
 0x773   : > { %s6712_s26 = sld [smem:[#allocation31_spill]] }
 0x774   : > { %s6713_s27 = sld [smem:[#allocation33_spill]] }
 0x775   : > { %s6715_s22 = smov %s6708_s30 }
 0x777   :  { %3713 = vsyncpa [#allocation9], 1 }
 0x778   :  { %3715 = vsyncpa [#allocation9 + $0x1], 1 }
 0x779   :  { %3716 = vsyncpa [#allocation12], 1 }
 0x77a   :  { %3717 = vsyncpa [#allocation15], 1 }
 0x77b   :  { %3718 = vsyncpa [#allocation18], 1 }
 0x77c   :  { %3719 = vsyncpa [#allocation10], 1 }
 0x77d   :  { %3721 = vsyncpa [#allocation10 + $0x1], 1 }

</bundles_post_ra>
